<compile_context>
chip_gen: v6e
topology: v6e:2x2x1
jax: 0.10.0
libtpu: 0.0.40
codegen_flags: <defaults>
</compile_context>

<pallas_src>
import functools

import jax
import jax.numpy as jnp
from jax import lax
from jax.experimental import pallas as pl
from jax.experimental.pallas import tpu as pltpu


# =============================================================================
# Tile-size heuristics (VMEM-budgeted, megacore-aware)
# =============================================================================
def _pick_row_tile(n_rows, cap=256):
    """Row tile for the row-parallel matmul kernels.

    Aims for >=2 grid steps so the 'parallel' row axis can be sharded across the
    two v7x TensorCores, while keeping tiles a multiple of 8 sublanes.  A ragged
    last tile is safe: every op in those kernels is row-wise.
    """
    if n_rows <= 8:
        return n_rows
    half = -(-n_rows // 2)          # ceil(n/2) -> at least 2 grid steps
    half = -(-half // 8) * 8        # round up to a sublane multiple
    return max(8, min(cap, half))


def _pick_v_tile(v_padded, cap=512):
    """Largest multiple of 128 that divides the padded vocab and fits the cap.

    The vocab axis is the reduction axis of the online log-sum-exp, so its tiles
    must cover the padded vocab exactly (no ragged tiles along V).
    """
    m = v_padded // 128
    best = 128
    for k in range(1, m + 1):
        if m % k == 0 and 128 * k <= cap:
            best = 128 * k
    return best


def _bilstm_vmem_bytes(chunk, batch, hidden):
    """Approximate pipelined VMEM footprint of one time-chunk (both directions)."""
    gx_in = 2 * 2 * chunk * batch * 4 * hidden * 2   # bf16 gate inputs, 2 dirs, double-buffered
    outs = 2 * 2 * chunk * batch * hidden * 2        # bf16 hidden outputs, 2 dirs, double-buffered
    whh = 2 * 2 * hidden * 4 * hidden * 2            # bf16 recurrent weights, 2 dirs
    state = 4 * batch * hidden * 4                   # f32 h/c scratch
    return gx_in + outs + whh + state


def _pick_time_chunk(seq_len, batch, hidden, cap=128,
                     vmem_budget_bytes=48 * 1024 * 1024):
    """Biggest time chunk <= cap whose pipelined footprint fits the VMEM budget
    (48 MiB default keeps headroom on v7x's 64 MiB).  The sequence is padded up
    to a chunk multiple, so there is no divisibility constraint on T."""
    chunk = max(1, min(cap, seq_len))
    while chunk > 1 and _bilstm_vmem_bytes(chunk, batch, hidden) > vmem_budget_bytes:
        chunk = max(1, chunk // 2)
    return chunk


# =============================================================================
# Kernel 1: row-tiled fused projection  out = sum_k x_k @ w_k + b
# =============================================================================
def _proj_kernel(*refs, n_in):
    xs = refs[:n_in]
    ws = refs[n_in:2 * n_in]
    b_ref = refs[2 * n_in]
    out_ref = refs[2 * n_in + 1]

    acc = jnp.dot(xs[0][...], ws[0][...], preferred_element_type=jnp.float32)
    for k in range(1, n_in):
        acc = acc + jnp.dot(xs[k][...], ws[k][...],
                            preferred_element_type=jnp.float32)
    acc = acc + b_ref[...]
    out_ref[...] = acc.astype(out_ref.dtype)


def _fused_matmul(xs, ws, b, *, out_dtype=jnp.bfloat16, row_tile_cap=256):
    """Row-tiled out = sum_k xs[k] @ ws[k] + b (bf16 operands, f32 accumulate)."""
    n_in = len(xs)
    n_rows = xs[0].shape[0]
    d_out = ws[0].shape[1]
    tile = _pick_row_tile(n_rows, cap=row_tile_cap)
    grid = (pl.cdiv(n_rows, tile),)

    # TODO(synk): single-buffer the constant-index-map weight/bias operands via
    # pipeline_mode=pl.Buffered(1) once the auto-pipeliner supports it reliably.
    in_specs = (
        [pl.BlockSpec((tile, x.shape[1]), lambda i: (i, 0)) for x in xs]
        + [pl.BlockSpec(w.shape, lambda i: (0, 0)) for w in ws]
        + [pl.BlockSpec((1, d_out), lambda i: (0, 0))]
    )
    return pl.pallas_call(
        functools.partial(_proj_kernel, n_in=n_in),
        out_shape=jax.ShapeDtypeStruct((n_rows, d_out), out_dtype),
        grid=grid,
        in_specs=in_specs,
        out_specs=pl.BlockSpec((tile, d_out), lambda i: (i, 0)),
        compiler_params=pltpu.CompilerParams(
            dimension_semantics=("parallel",),
            vmem_limit_bytes=64 * 1024 * 1024),
    )(*xs, *ws, b)


# =============================================================================
# Kernel 2: fused bidirectional LSTM recurrence (time-chunked)
# =============================================================================
def _bilstm_chunk_kernel(gxf_ref, gxb_ref, whhf_ref, whhb_ref,
                         outf_ref, outb_ref,
                         hf_sc, cf_sc, hb_sc, cb_sc,
                         *, chunk, hidden):
    """One time-chunk of both LSTM directions.  Grid axis 0 = chunk (sequential).

    gxf_ref : (chunk, B, 4H) bf16 precomputed fwd input gates (ascending time)
    gxb_ref : (chunk, B, 4H) bf16 precomputed bwd input gates (chunk picked by index_map)
    whhf/whhb : (H, 4H) bf16 dense per-direction recurrent weights
    h/c scratch carried in f32 across chunks.
    """
    H = hidden

    @pl.when(pl.program_id(0) == 0)
    def _():
        hf_sc[...] = jnp.zeros_like(hf_sc)
        cf_sc[...] = jnp.zeros_like(cf_sc)
        hb_sc[...] = jnp.zeros_like(hb_sc)
        cb_sc[...] = jnp.zeros_like(cb_sc)

    whh_f = whhf_ref[...]                         # hoisted out of the time loop
    whh_b = whhb_ref[...]

    # NOTE: for production H use a multiple of 128 so the per-gate lane slices
    # below are free vreg selections (no masked relayout on the serial path).
    def cell(g, c):                               # PyTorch gate order: i, f, g, o
        i = jax.nn.sigmoid(g[:, 0:H])
        f = jax.nn.sigmoid(g[:, H:2 * H])
        gg = jnp.tanh(g[:, 2 * H:3 * H])
        o = jax.nn.sigmoid(g[:, 3 * H:4 * H])
        c_new = f * c + i * gg
        h_new = o * jnp.tanh(c_new)
        return h_new, c_new

    def step(s, carry):
        h_f, c_f, h_b, c_b = carry
        hh_f = jnp.dot(h_f.astype(jnp.bfloat16), whh_f,
                       preferred_element_type=jnp.float32)
        hh_b = jnp.dot(h_b.astype(jnp.bfloat16), whh_b,
                       preferred_element_type=jnp.float32)
        g_f = gxf_ref[s].astype(jnp.float32) + hh_f
        g_b = gxb_ref[chunk - 1 - s].astype(jnp.float32) + hh_b
        h_f, c_f = cell(g_f, c_f)
        h_b, c_b = cell(g_b, c_b)
        outf_ref[s] = h_f.astype(outf_ref.dtype)
        outb_ref[chunk - 1 - s] = h_b.astype(outb_ref.dtype)
        return (h_f, c_f, h_b, c_b)

    init = (hf_sc[...], cf_sc[...], hb_sc[...], cb_sc[...])
    # Partial unroll: LLO scheduling visibility without blowing the 64-vreg file.
    h_f, c_f, h_b, c_b = lax.fori_loop(0, chunk, step, init,
                                       unroll=min(8, chunk))
    hf_sc[...] = h_f
    cf_sc[...] = c_f
    hb_sc[...] = h_b
    cb_sc[...] = c_b


def bilstm_layer(gx_f, gx_b, whh_f, whh_b, hidden_dim, *, chunk_cap=128):
    """gx_f/gx_b: (T, B, 4H) bf16 precomputed input gates per direction.
    Returns (h_fwd, h_bwd), each (T, B, H) bf16, in original time order."""
    T, B, G = gx_f.shape
    H = hidden_dim
    assert G == 4 * H

    chunk = _pick_time_chunk(T, B, H, cap=chunk_cap)
    n_chunks = pl.cdiv(T, chunk)
    t_pad = n_chunks * chunk
    if t_pad != T:
        # Pad value -1e4 => input/output gates are exactly 0, so a zero state is
        # preserved through padded steps (the backward direction processes the
        # padded tail FIRST, so its initial state stays exactly zero).
        pad = ((0, t_pad - T), (0, 0), (0, 0))
        gx_f = jnp.pad(gx_f, pad, constant_values=-1e4)
        gx_b = jnp.pad(gx_b, pad, constant_values=-1e4)

    kernel = functools.partial(_bilstm_chunk_kernel, chunk=chunk, hidden=H)
    vmem_limit = min(128 * 1024 * 1024,
                     max(32 * 1024 * 1024, 2 * _bilstm_vmem_bytes(chunk, B, H)))

    out_f, out_b = pl.pallas_call(
        kernel,
        out_shape=(jax.ShapeDtypeStruct((t_pad, B, H), jnp.bfloat16),
                   jax.ShapeDtypeStruct((t_pad, B, H), jnp.bfloat16)),
        grid=(n_chunks,),
        in_specs=[
            # forward-direction gates, ascending chunks (contiguous DMA)
            pl.BlockSpec((chunk, B, 4 * H), lambda c: (c, 0, 0)),
            # backward-direction gates, descending chunks (reversal via index_map)
            pl.BlockSpec((chunk, B, 4 * H), lambda c: (n_chunks - 1 - c, 0, 0)),
            # dense per-direction recurrent weights, resident
            pl.BlockSpec((H, 4 * H), lambda c: (0, 0)),
            pl.BlockSpec((H, 4 * H), lambda c: (0, 0)),
        ],
        out_specs=(
            pl.BlockSpec((chunk, B, H), lambda c: (c, 0, 0)),
            pl.BlockSpec((chunk, B, H), lambda c: (n_chunks - 1 - c, 0, 0)),
        ),
        scratch_shapes=[
            pltpu.VMEM((B, H), jnp.float32),   # h forward
            pltpu.VMEM((B, H), jnp.float32),   # c forward
            pltpu.VMEM((B, H), jnp.float32),   # h backward
            pltpu.VMEM((B, H), jnp.float32),   # c backward
        ],
        compiler_params=pltpu.CompilerParams(
            dimension_semantics=("arbitrary",),
            vmem_limit_bytes=vmem_limit),
    )(gx_f, gx_b, whh_f, whh_b)
    return out_f[:T], out_b[:T]


# =============================================================================
# Kernel 3: V-tiled FC head with online log-sum-exp (pass 1) + normalize (pass 2)
# =============================================================================
def _head_lse_kernel(*refs, n_in):
    xs = refs[:n_in]
    ws = refs[n_in:2 * n_in]
    b_ref = refs[2 * n_in]
    logits_ref = refs[2 * n_in + 1]
    lse_ref = refs[2 * n_in + 2]
    m_sc = refs[2 * n_in + 3]
    l_sc = refs[2 * n_in + 4]

    v = pl.program_id(1)

    @pl.when(v == 0)
    def _():
        m_sc[...] = jnp.full_like(m_sc, -jnp.inf)
        l_sc[...] = jnp.zeros_like(l_sc)

    acc = jnp.dot(xs[0][...], ws[0][...], preferred_element_type=jnp.float32)
    for k in range(1, n_in):
        acc = acc + jnp.dot(xs[k][...], ws[k][...],
                            preferred_element_type=jnp.float32)
    acc = acc + b_ref[...]                           # padded lanes carry -1e30 bias
    logits_ref[...] = acc.astype(logits_ref.dtype)

    m_prev = m_sc[...]
    m_new = jnp.maximum(m_prev, jnp.max(acc, axis=-1, keepdims=True))
    l_sc[...] = (jnp.exp(m_prev - m_new) * l_sc[...]
                 + jnp.sum(jnp.exp(acc - m_new), axis=-1, keepdims=True))
    m_sc[...] = m_new

    @pl.when(v == pl.num_programs(1) - 1)
    def _():
        lse_ref[...] = m_sc[...] + jnp.log(l_sc[...])


def _head_norm_kernel(logits_ref, lse_ref, out_ref):
    out_ref[...] = (logits_ref[...] - lse_ref[...]).astype(out_ref.dtype)


def _log_softmax_head(xs, ws, b, *, v_tile_cap=512, row_tile_cap=256):
    """log_softmax(sum_k xs[k] @ ws[k] + b) with the vocab axis tiled so the
    (2H, V) weight never has to be VMEM-resident."""
    n_in = len(xs)
    n_rows = xs[0].shape[0]
    v_padded = ws[0].shape[1]
    tile_r = _pick_row_tile(n_rows, cap=row_tile_cap)
    tile_v = _pick_v_tile(v_padded, cap=v_tile_cap)
    grid = (pl.cdiv(n_rows, tile_r), v_padded // tile_v)

    in_specs = (
        [pl.BlockSpec((tile_r, x.shape[1]), lambda i, v: (i, 0)) for x in xs]
        + [pl.BlockSpec((w.shape[0], tile_v), lambda i, v: (0, v)) for w in ws]
        + [pl.BlockSpec((1, tile_v), lambda i, v: (0, v))]
    )
    logits, lse = pl.pallas_call(
        functools.partial(_head_lse_kernel, n_in=n_in),
        out_shape=(jax.ShapeDtypeStruct((n_rows, v_padded), jnp.float32),
                   jax.ShapeDtypeStruct((n_rows, 1), jnp.float32)),
        grid=grid,
        in_specs=in_specs,
        out_specs=(pl.BlockSpec((tile_r, tile_v), lambda i, v: (i, v)),
                   pl.BlockSpec((tile_r, 1), lambda i, v: (i, 0))),
        scratch_shapes=[pltpu.VMEM((tile_r, 1), jnp.float32),   # running max
                        pltpu.VMEM((tile_r, 1), jnp.float32)],  # running sum
        compiler_params=pltpu.CompilerParams(
            dimension_semantics=("parallel", "arbitrary"),
            vmem_limit_bytes=64 * 1024 * 1024),
    )(*xs, *ws, b)

    out = pl.pallas_call(
        _head_norm_kernel,
        out_shape=jax.ShapeDtypeStruct((n_rows, v_padded), jnp.float32),
        grid=grid,
        in_specs=[pl.BlockSpec((tile_r, tile_v), lambda i, v: (i, v)),
                  pl.BlockSpec((tile_r, 1), lambda i, v: (i, 0))],
        out_specs=pl.BlockSpec((tile_r, tile_v), lambda i, v: (i, v)),
        compiler_params=pltpu.CompilerParams(
            dimension_semantics=("parallel", "parallel"),
            vmem_limit_bytes=64 * 1024 * 1024),
    )(logits, lse)
    return out


# =============================================================================
# Parameter construction (PyTorch layout) + one-time fast-layout preparation
# =============================================================================
def build_params(key, vocab_size, embedding_dim, hidden_dim, lstm_layers):
    keys = jax.random.split(key, 3 + 8 * lstm_layers)
    ki = iter(keys)
    k = 1.0 / jnp.sqrt(hidden_dim)
    params = {
        "embedding": jax.random.normal(next(ki), (vocab_size, embedding_dim),
                                       jnp.float32),
        "lstm": [],
        "fc1_w": jax.random.uniform(next(ki), (vocab_size, 2 * hidden_dim),
                                    jnp.float32, -k, k),
        "fc1_b": jax.random.uniform(next(ki), (vocab_size,),
                                    jnp.float32, -k, k),
    }
    for layer in range(lstm_layers):
        in_size = embedding_dim if layer == 0 else 2 * hidden_dim
        dirs = []
        for _ in range(2):  # forward, reverse
            w_ih = jax.random.uniform(next(ki), (4 * hidden_dim, in_size),
                                      jnp.float32, -k, k)
            w_hh = jax.random.uniform(next(ki), (4 * hidden_dim, hidden_dim),
                                      jnp.float32, -k, k)
            b_ih = jax.random.uniform(next(ki), (4 * hidden_dim,),
                                      jnp.float32, -k, k)
            b_hh = jax.random.uniform(next(ki), (4 * hidden_dim,),
                                      jnp.float32, -k, k)
            dirs.append((w_ih, w_hh, b_ih, b_hh))
        params["lstm"].append(dirs)
    return params


def prepare_fast_params(params, hidden_dim):
    """Pre-transpose / pre-combine weights once into kernel-friendly layouts.

    Matmul operands are bf16 (MXU native on v5e/v6e/v7x); biases stay f32 and
    are added after the f32-accumulated matmul; h/c state stays f32.
    """
    H = hidden_dim
    fast = {"embedding": params["embedding"], "layers": []}
    for layer_idx, dirs in enumerate(params["lstm"]):
        layer_fast = []
        for (w_ih, w_hh, b_ih, b_hh) in dirs:
            wx = w_ih.T.astype(jnp.bfloat16)                     # (in, 4H)
            bx = (b_ih + b_hh)[None, :].astype(jnp.float32)      # bias folded once
            whh = w_hh.T.astype(jnp.bfloat16)                    # (H, 4H) dense
            if layer_idx == 0:
                wx_parts = (wx,)                                 # single input (embedding)
            else:
                wx_parts = (wx[:H], wx[H:])                      # rows for (h_fwd, h_bwd)
            layer_fast.append({"wx": wx_parts, "bx": bx, "whh": whh})
        fast["layers"].append(layer_fast)

    # FC head: transpose, pad vocab to a multiple of 128 lanes, split rows so the
    # kernel consumes (h_fwd, h_bwd) directly (no HBM concat anywhere).
    V = params["fc1_w"].shape[0]
    v_padded = ((V + 127) // 128) * 128
    w_t = params["fc1_w"].T.astype(jnp.float32)                  # (2H, V)
    w_pad = jnp.zeros((2 * H, v_padded), jnp.float32).at[:, :V].set(w_t)
    b_pad = jnp.full((1, v_padded), -1e30, jnp.float32).at[0, :V].set(
        params["fc1_b"].astype(jnp.float32))
    fast["fc_w"] = (w_pad[:H].astype(jnp.bfloat16),
                    w_pad[H:].astype(jnp.bfloat16))
    fast["fc_b"] = b_pad
    return fast


# =============================================================================
# Forward pass
# =============================================================================
@functools.partial(jax.jit, static_argnames=("hidden_dim", "vocab_size",
                                             "time_chunk_cap", "v_tile_cap"))
def language_model_forward(fast, token_ids, *, hidden_dim, vocab_size,
                           time_chunk_cap=128, v_tile_cap=512):
    """token_ids: (T, B) int32. Returns (T*B, |V|) log-probabilities (f32)."""
    H = hidden_dim
    T, B = token_ids.shape
    # TODO(synk): fuse the embedding gather into the layer-0 projection (scalar-
    # prefetched token ids) to avoid this (T*B, E) HBM round trip.
    emb = jnp.take(fast["embedding"], token_ids, axis=0).astype(jnp.bfloat16)
    xs = (emb.reshape(T * B, -1),)
    for layer in fast["layers"]:
        d_f, d_b = layer
        gx_f = _fused_matmul(xs, d_f["wx"], d_f["bx"])           # (T*B, 4H) bf16
        gx_b = _fused_matmul(xs, d_b["wx"], d_b["bx"])           # (T*B, 4H) bf16
        h_f, h_b = bilstm_layer(gx_f.reshape(T, B, 4 * H),
                                gx_b.reshape(T, B, 4 * H),
                                d_f["whh"], d_b["whh"], H,
                                chunk_cap=time_chunk_cap)
        xs = (h_f.reshape(T * B, H), h_b.reshape(T * B, H))
        # TODO(synk): inter-layer dropout skipped (eval semantics / dropout=0).
    out = _log_softmax_head(xs, fast["fc_w"], fast["fc_b"], v_tile_cap=v_tile_cap)
    return out[:, :vocab_size]


# =============================================================================
# Pure-JAX references (for correctness checks)
# =============================================================================
def _qb(x):
    """Round-trip through bf16 (mirrors the kernels' matmul-operand policy)."""
    return x.astype(jnp.bfloat16).astype(jnp.float32)


def _ref_lstm_dir(x, w_ih, w_hh, b_ih, b_hh, quantize):
    _, B_, _ = x.shape
    H = w_hh.shape[1]
    w_ih_m = _qb(w_ih) if quantize else w_ih
    w_hh_m = _qb(w_hh) if quantize else w_hh
    x_m = _qb(x) if quantize else x

    gx = jnp.einsum("tbe,ge->tbg", x_m, w_ih_m) + (b_ih + b_hh)
    if quantize:
        gx = _qb(gx)                       # kernel stores gx in bf16

    def step(carry, gxt):
        h, c = carry
        h_m = _qb(h) if quantize else h
        gates = gxt + h_m @ w_hh_m.T
        i = jax.nn.sigmoid(gates[:, 0:H])
        f = jax.nn.sigmoid(gates[:, H:2 * H])
        g = jnp.tanh(gates[:, 2 * H:3 * H])
        o = jax.nn.sigmoid(gates[:, 3 * H:4 * H])
        c = f * c + i * g
        h = o * jnp.tanh(c)
        return (h, c), h

    init = (jnp.zeros((B_, H), jnp.float32), jnp.zeros((B_, H), jnp.float32))
    _, hs = lax.scan(step, init, gx)
    return hs


def ref_forward(params, token_ids, quantize=False):
    emb = jnp.take(params["embedding"], token_ids, axis=0)
    layer_in = emb
    for layer_params in params["lstm"]:
        fwd = _ref_lstm_dir(layer_in, *layer_params[0], quantize)
        bwd = _ref_lstm_dir(layer_in[::-1], *layer_params[1], quantize)[::-1]
        layer_in = jnp.concatenate([fwd, bwd], axis=-1)
        if quantize:
            layer_in = _qb(layer_in)       # hidden states stored bf16 between layers
    T_, B_, D = layer_in.shape
    flat = layer_in.reshape(T_ * B_, D)
    w = _qb(params["fc1_w"]) if quantize else params["fc1_w"]
    logits = flat @ w.T + params["fc1_b"]
    return jax.nn.log_softmax(logits, axis=1)


# =============================================================================
if __name__ == "__main__":
    VOCAB = 300        # pads to 384 lanes -> exercises the multi-tile vocab head
    EMB = 32
    HIDDEN = 32
    LAYERS = 2
    T, B = 20, 8       # T=20 with chunk cap 8 -> 3 chunks incl. a padded tail

    key = jax.random.PRNGKey(0)
    pkey, dkey = jax.random.split(key)
    params = build_params(pkey, VOCAB, EMB, HIDDEN, LAYERS)
    fast = prepare_fast_params(params, HIDDEN)
    token_ids = jax.random.randint(dkey, (T, B), 0, VOCAB, dtype=jnp.int32)

    out = language_model_forward(fast, token_ids,
                                 hidden_dim=HIDDEN, vocab_size=VOCAB,
                                 time_chunk_cap=8, v_tile_cap=128)
    out = jax.block_until_ready(out)
    assert out.shape == (T * B, VOCAB), out.shape

    # Tight check vs a reference that mirrors the bf16-operand / f32-accumulate policy.
    ref_q = jax.block_until_ready(ref_forward(params, token_ids, quantize=True))
    if not jnp.allclose(out, ref_q, atol=5e-3, rtol=5e-3):
        max_err = float(jnp.max(jnp.abs(out - ref_q)))
        raise AssertionError(f"Pallas output does not match bf16-mirrored "
                             f"reference (max abs err {max_err})")

    # Loose sanity check vs the pure-f32 reference semantics of the module.
    ref_f = jax.block_until_ready(ref_forward(params, token_ids, quantize=False))
    if not jnp.allclose(out, ref_f, atol=1e-1, rtol=1e-1):
        max_err = float(jnp.max(jnp.abs(out - ref_f)))
        raise AssertionError(f"Pallas output deviates too far from f32 "
                             f"reference (max abs err {max_err})")

    print("KERNEL_OK")
</pallas_src>

<mosaic_0001>
module attributes {stable_mosaic.version = 11 : i64} {
  func.func @_proj_kernel(%arg0: i32, %arg1: memref<80x32xbf16, #tpu.memory_space<vmem>>, %arg2: memref<32x128xbf16, #tpu.memory_space<vmem>>, %arg3: memref<1x128xf32, #tpu.memory_space<vmem>>, %arg4: memref<80x128xbf16, #tpu.memory_space<vmem>>) attributes {dimension_semantics = [#tpu.dimension_semantics<parallel>], iteration_bounds = array<i64: 2>, scalar_prefetch = 0 : i64, scratch_operands = 0 : i64, tpu.core_type = #tpu.core_type<tc>, window_params = [{transform_indices = @transform_0, window_bounds = array<i64: 80, 32>}, {pipeline_mode = #tpu.pipeline_mode<synchronous>, transform_indices = @transform_1, window_bounds = array<i64: 32, 128>}, {pipeline_mode = #tpu.pipeline_mode<synchronous>, transform_indices = @transform_2, window_bounds = array<i64: 1, 128>}, {transform_indices = @transform_3, window_bounds = array<i64: 80, 128>}]} {
    %c0 = arith.constant 0 : index
    %c0_0 = arith.constant 0 : index
    %0 = vector.load %arg1[%c0, %c0_0] : memref<80x32xbf16, #tpu.memory_space<vmem>>, vector<80x32xbf16>
    %c0_1 = arith.constant 0 : index
    %c0_2 = arith.constant 0 : index
    %1 = vector.load %arg2[%c0_1, %c0_2] : memref<32x128xbf16, #tpu.memory_space<vmem>>, vector<32x128xbf16>
    %cst = arith.constant dense<0.000000e+00> : vector<80x128xf32>
    %2 = tpu.matmul %0, %1, %cst {dimension_numbers = #tpu.dot_dimension_numbers<[1], [0], [0], [1], [0, 0, 1, 1], [], []>} : vector<80x32xbf16>, vector<32x128xbf16>, vector<80x128xf32> -> vector<80x128xf32>
    %c0_3 = arith.constant 0 : index
    %c0_4 = arith.constant 0 : index
    %3 = vector.load %arg3[%c0_3, %c0_4] : memref<1x128xf32, #tpu.memory_space<vmem>>, vector<1x128xf32>
    %4 = vector.broadcast %3 : vector<1x128xf32> to vector<80x128xf32>
    %5 = arith.addf %2, %4 : vector<80x128xf32>
    %6 = arith.truncf %5 : vector<80x128xf32> to vector<80x128xbf16>
    %c0_5 = arith.constant 0 : index
    %c0_6 = arith.constant 0 : index
    %7 = vector.load %arg4[%c0_5, %c0_6] : memref<80x128xbf16, #tpu.memory_space<vmem>>, vector<80x128xbf16>
    tpu.vector_store %arg4[%c0_5, %c0_6], %6 {strides = array<i32>} : memref<80x128xbf16, #tpu.memory_space<vmem>>, vector<80x128xbf16>,
    return
  }
  func.func @transform_0(%arg0: i32) -> (i32, i32) {
    %c0_i32 = arith.constant 0 : i32
    %c0_i32_0 = arith.constant 0 : i32
    return %arg0, %c0_i32 : i32, i32
  }
  func.func @transform_1(%arg0: i32) -> (i32, i32) {
    %c0_i32 = arith.constant 0 : i32
    %c0_i32_0 = arith.constant 0 : i32
    %c0_i32_1 = arith.constant 0 : i32
    return %c0_i32, %c0_i32_0 : i32, i32
  }
  func.func @transform_2(%arg0: i32) -> (i32, i32) {
    %c0_i32 = arith.constant 0 : i32
    %c0_i32_0 = arith.constant 0 : i32
    %c0_i32_1 = arith.constant 0 : i32
    return %c0_i32, %c0_i32_0 : i32, i32
  }
  func.func @transform_3(%arg0: i32) -> (i32, i32) {
    %c0_i32 = arith.constant 0 : i32
    %c0_i32_0 = arith.constant 0 : i32
    return %arg0, %c0_i32 : i32, i32
  }
}

module attributes {stable_mosaic.version = 11 : i64} {
  func.func @_bilstm_chunk_kernel(%arg0: i32, %arg1: memref<8x8x128xbf16, #tpu.memory_space<vmem>>, %arg2: memref<8x8x128xbf16, #tpu.memory_space<vmem>>, %arg3: memref<32x128xbf16, #tpu.memory_space<vmem>>, %arg4: memref<32x128xbf16, #tpu.memory_space<vmem>>, %arg5: memref<8x8x32xbf16, #tpu.memory_space<vmem>>, %arg6: memref<8x8x32xbf16, #tpu.memory_space<vmem>>, %arg7: memref<8x32xf32, #tpu.memory_space<vmem>>, %arg8: memref<8x32xf32, #tpu.memory_space<vmem>>, %arg9: memref<8x32xf32, #tpu.memory_space<vmem>>, %arg10: memref<8x32xf32, #tpu.memory_space<vmem>>) attributes {dimension_semantics = [#tpu.dimension_semantics<arbitrary>], iteration_bounds = array<i64: 3>, scalar_prefetch = 0 : i64, scratch_operands = 4 : i64, tpu.core_type = #tpu.core_type<tc>, window_params = [{transform_indices = @transform_0, window_bounds = array<i64: 8, 8, 128>}, {transform_indices = @transform_1, window_bounds = array<i64: 8, 8, 128>}, {pipeline_mode = #tpu.pipeline_mode<synchronous>, transform_indices = @transform_2, window_bounds = array<i64: 32, 128>}, {pipeline_mode = #tpu.pipeline_mode<synchronous>, transform_indices = @transform_3, window_bounds = array<i64: 32, 128>}, {transform_indices = @transform_4, window_bounds = array<i64: 8, 8, 32>}, {transform_indices = @transform_5, window_bounds = array<i64: 8, 8, 32>}]} {
    %c0_i32 = arith.constant 0 : i32
    %0 = arith.cmpi eq, %arg0, %c0_i32 : i32
    %1 = arith.extui %0 : i1 to i32
    %c0_i32_0 = arith.constant 0 : i32
    %2 = arith.cmpi ne, %1, %c0_i32_0 : i32
    scf.if %2 {
      %cst_164 = arith.constant 0.000000e+00 : f32
      %621 = vector.broadcast %cst_164 : f32 to vector<8x32xf32>
      %c0_165 = arith.constant 0 : index
      %c0_166 = arith.constant 0 : index
      %622 = vector.load %arg7[%c0_165, %c0_166] : memref<8x32xf32, #tpu.memory_space<vmem>>, vector<8x32xf32>
      tpu.vector_store %arg7[%c0_165, %c0_166], %621 {strides = array<i32>} : memref<8x32xf32, #tpu.memory_space<vmem>>, vector<8x32xf32>,
      %cst_167 = arith.constant 0.000000e+00 : f32
      %623 = vector.broadcast %cst_167 : f32 to vector<8x32xf32>
      %c0_168 = arith.constant 0 : index
      %c0_169 = arith.constant 0 : index
      %624 = vector.load %arg8[%c0_168, %c0_169] : memref<8x32xf32, #tpu.memory_space<vmem>>, vector<8x32xf32>
      tpu.vector_store %arg8[%c0_168, %c0_169], %623 {strides = array<i32>} : memref<8x32xf32, #tpu.memory_space<vmem>>, vector<8x32xf32>,
      %cst_170 = arith.constant 0.000000e+00 : f32
      %625 = vector.broadcast %cst_170 : f32 to vector<8x32xf32>
      %c0_171 = arith.constant 0 : index
      %c0_172 = arith.constant 0 : index
      %626 = vector.load %arg9[%c0_171, %c0_172] : memref<8x32xf32, #tpu.memory_space<vmem>>, vector<8x32xf32>
      tpu.vector_store %arg9[%c0_171, %c0_172], %625 {strides = array<i32>} : memref<8x32xf32, #tpu.memory_space<vmem>>, vector<8x32xf32>,
      %cst_173 = arith.constant 0.000000e+00 : f32
      %627 = vector.broadcast %cst_173 : f32 to vector<8x32xf32>
      %c0_174 = arith.constant 0 : index
      %c0_175 = arith.constant 0 : index
      %628 = vector.load %arg10[%c0_174, %c0_175] : memref<8x32xf32, #tpu.memory_space<vmem>>, vector<8x32xf32>
      tpu.vector_store %arg10[%c0_174, %c0_175], %627 {strides = array<i32>} : memref<8x32xf32, #tpu.memory_space<vmem>>, vector<8x32xf32>,
    } else {
    }
    %c0 = arith.constant 0 : index
    %c0_1 = arith.constant 0 : index
    %3 = vector.load %arg3[%c0, %c0_1] : memref<32x128xbf16, #tpu.memory_space<vmem>>, vector<32x128xbf16>
    %c0_2 = arith.constant 0 : index
    %c0_3 = arith.constant 0 : index
    %4 = vector.load %arg4[%c0_2, %c0_3] : memref<32x128xbf16, #tpu.memory_space<vmem>>, vector<32x128xbf16>
    %c0_4 = arith.constant 0 : index
    %c0_5 = arith.constant 0 : index
    %5 = vector.load %arg7[%c0_4, %c0_5] : memref<8x32xf32, #tpu.memory_space<vmem>>, vector<8x32xf32>
    %c0_6 = arith.constant 0 : index
    %c0_7 = arith.constant 0 : index
    %6 = vector.load %arg8[%c0_6, %c0_7] : memref<8x32xf32, #tpu.memory_space<vmem>>, vector<8x32xf32>
    %c0_8 = arith.constant 0 : index
    %c0_9 = arith.constant 0 : index
    %7 = vector.load %arg9[%c0_8, %c0_9] : memref<8x32xf32, #tpu.memory_space<vmem>>, vector<8x32xf32>
    %c0_10 = arith.constant 0 : index
    %c0_11 = arith.constant 0 : index
    %8 = vector.load %arg10[%c0_10, %c0_11] : memref<8x32xf32, #tpu.memory_space<vmem>>, vector<8x32xf32>
    %c0_i32_12 = arith.constant 0 : i32
    %9 = arith.truncf %5 : vector<8x32xf32> to vector<8x32xbf16>
    %cst = arith.constant dense<0.000000e+00> : vector<8x128xf32>
    %10 = tpu.matmul %9, %3, %cst {dimension_numbers = #tpu.dot_dimension_numbers<[1], [0], [0], [1], [0, 0, 1, 1], [], []>} : vector<8x32xbf16>, vector<32x128xbf16>, vector<8x128xf32> -> vector<8x128xf32>
    %11 = arith.truncf %7 : vector<8x32xf32> to vector<8x32xbf16>
    %cst_13 = arith.constant dense<0.000000e+00> : vector<8x128xf32>
    %12 = tpu.matmul %11, %4, %cst_13 {dimension_numbers = #tpu.dot_dimension_numbers<[1], [0], [0], [1], [0, 0, 1, 1], [], []>} : vector<8x32xbf16>, vector<32x128xbf16>, vector<8x128xf32> -> vector<8x128xf32>
    %13 = arith.index_cast %c0_i32_12 : i32 to index
    %c0_14 = arith.constant 0 : index
    %c0_15 = arith.constant 0 : index
    %14 = vector.load %arg1[%13, %c0_14, %c0_15] : memref<8x8x128xbf16, #tpu.memory_space<vmem>>, vector<1x8x128xbf16>
    %15 = vector.shape_cast %14 : vector<1x8x128xbf16> to vector<8x128xbf16>
    %16 = arith.extf %15 : vector<8x128xbf16> to vector<8x128xf32>
    %17 = arith.addf %16, %10 : vector<8x128xf32>
    %c7_i32 = arith.constant 7 : i32
    %18 = arith.subi %c7_i32, %c0_i32_12 : i32
    %19 = arith.index_cast %18 : i32 to index
    %c0_16 = arith.constant 0 : index
    %c0_17 = arith.constant 0 : index
    %20 = vector.load %arg2[%19, %c0_16, %c0_17] : memref<8x8x128xbf16, #tpu.memory_space<vmem>>, vector<1x8x128xbf16>
    %21 = vector.shape_cast %20 : vector<1x8x128xbf16> to vector<8x128xbf16>
    %22 = arith.extf %21 : vector<8x128xbf16> to vector<8x128xf32>
    %23 = arith.addf %22, %12 : vector<8x128xf32>
    %24 = vector.extract_strided_slice %17 {offsets = [0, 0], sizes = [8, 32], strides = [1, 1]} : vector<8x128xf32> to vector<8x32xf32>
    %25 = arith.negf %24 : vector<8x32xf32>
    %26 = math.exp %25 : vector<8x32xf32>
    %cst_18 = arith.constant 1.000000e+00 : f32
    %27 = vector.broadcast %cst_18 : f32 to vector<8x32xf32>
    %28 = arith.addf %27, %26 : vector<8x32xf32>
    %29 = arith.divf %27, %28 : vector<8x32xf32>
    %30 = vector.extract_strided_slice %17 {offsets = [0, 32], sizes = [8, 32], strides = [1, 1]} : vector<8x128xf32> to vector<8x32xf32>
    %31 = arith.negf %30 : vector<8x32xf32>
    %32 = math.exp %31 : vector<8x32xf32>
    %cst_19 = arith.constant 1.000000e+00 : f32
    %33 = vector.broadcast %cst_19 : f32 to vector<8x32xf32>
    %34 = arith.addf %33, %32 : vector<8x32xf32>
    %35 = arith.divf %33, %34 : vector<8x32xf32>
    %36 = vector.extract_strided_slice %17 {offsets = [0, 64], sizes = [8, 32], strides = [1, 1]} : vector<8x128xf32> to vector<8x32xf32>
    %37 = math.tanh %36 : vector<8x32xf32>
    %38 = vector.extract_strided_slice %17 {offsets = [0, 96], sizes = [8, 32], strides = [1, 1]} : vector<8x128xf32> to vector<8x32xf32>
    %39 = arith.negf %38 : vector<8x32xf32>
    %40 = math.exp %39 : vector<8x32xf32>
    %cst_20 = arith.constant 1.000000e+00 : f32
    %41 = vector.broadcast %cst_20 : f32 to vector<8x32xf32>
    %42 = arith.addf %41, %40 : vector<8x32xf32>
    %43 = arith.divf %41, %42 : vector<8x32xf32>
    %44 = arith.mulf %35, %6 : vector<8x32xf32>
    %45 = arith.mulf %29, %37 : vector<8x32xf32>
    %46 = arith.addf %44, %45 : vector<8x32xf32>
    %47 = math.tanh %46 : vector<8x32xf32>
    %48 = arith.mulf %43, %47 : vector<8x32xf32>
    %49 = vector.extract_strided_slice %23 {offsets = [0, 0], sizes = [8, 32], strides = [1, 1]} : vector<8x128xf32> to vector<8x32xf32>
    %50 = arith.negf %49 : vector<8x32xf32>
    %51 = math.exp %50 : vector<8x32xf32>
    %cst_21 = arith.constant 1.000000e+00 : f32
    %52 = vector.broadcast %cst_21 : f32 to vector<8x32xf32>
    %53 = arith.addf %52, %51 : vector<8x32xf32>
    %54 = arith.divf %52, %53 : vector<8x32xf32>
    %55 = vector.extract_strided_slice %23 {offsets = [0, 32], sizes = [8, 32], strides = [1, 1]} : vector<8x128xf32> to vector<8x32xf32>
    %56 = arith.negf %55 : vector<8x32xf32>
    %57 = math.exp %56 : vector<8x32xf32>
    %cst_22 = arith.constant 1.000000e+00 : f32
    %58 = vector.broadcast %cst_22 : f32 to vector<8x32xf32>
    %59 = arith.addf %58, %57 : vector<8x32xf32>
    %60 = arith.divf %58, %59 : vector<8x32xf32>
    %61 = vector.extract_strided_slice %23 {offsets = [0, 64], sizes = [8, 32], strides = [1, 1]} : vector<8x128xf32> to vector<8x32xf32>
    %62 = math.tanh %61 : vector<8x32xf32>
    %63 = vector.extract_strided_slice %23 {offsets = [0, 96], sizes = [8, 32], strides = [1, 1]} : vector<8x128xf32> to vector<8x32xf32>
    %64 = arith.negf %63 : vector<8x32xf32>
    %65 = math.exp %64 : vector<8x32xf32>
    %cst_23 = arith.constant 1.000000e+00 : f32
    %66 = vector.broadcast %cst_23 : f32 to vector<8x32xf32>
    %67 = arith.addf %66, %65 : vector<8x32xf32>
    %68 = arith.divf %66, %67 : vector<8x32xf32>
    %69 = arith.mulf %60, %8 : vector<8x32xf32>
    %70 = arith.mulf %54, %62 : vector<8x32xf32>
    %71 = arith.addf %69, %70 : vector<8x32xf32>
    %72 = math.tanh %71 : vector<8x32xf32>
    %73 = arith.mulf %68, %72 : vector<8x32xf32>
    %74 = arith.truncf %48 : vector<8x32xf32> to vector<8x32xbf16>
    %75 = arith.index_cast %c0_i32_12 : i32 to index
    %c0_24 = arith.constant 0 : index
    %c0_25 = arith.constant 0 : index
    %76 = vector.load %arg5[%75, %c0_24, %c0_25] : memref<8x8x32xbf16, #tpu.memory_space<vmem>>, vector<1x8x32xbf16>
    %77 = vector.shape_cast %76 : vector<1x8x32xbf16> to vector<8x32xbf16>
    %78 = vector.shape_cast %74 : vector<8x32xbf16> to vector<1x8x32xbf16>
    tpu.vector_store %arg5[%75, %c0_24, %c0_25], %78 {strides = array<i32>} : memref<8x8x32xbf16, #tpu.memory_space<vmem>>, vector<1x8x32xbf16>,
    %79 = arith.truncf %73 : vector<8x32xf32> to vector<8x32xbf16>
    %c7_i32_26 = arith.constant 7 : i32
    %80 = arith.subi %c7_i32_26, %c0_i32_12 : i32
    %81 = arith.index_cast %80 : i32 to index
    %c0_27 = arith.constant 0 : index
    %c0_28 = arith.constant 0 : index
    %82 = vector.load %arg6[%81, %c0_27, %c0_28] : memref<8x8x32xbf16, #tpu.memory_space<vmem>>, vector<1x8x32xbf16>
    %83 = vector.shape_cast %82 : vector<1x8x32xbf16> to vector<8x32xbf16>
    %84 = vector.shape_cast %79 : vector<8x32xbf16> to vector<1x8x32xbf16>
    tpu.vector_store %arg6[%81, %c0_27, %c0_28], %84 {strides = array<i32>} : memref<8x8x32xbf16, #tpu.memory_space<vmem>>, vector<1x8x32xbf16>,
    %c1_i32 = arith.constant 1 : i32
    %85 = arith.truncf %48 : vector<8x32xf32> to vector<8x32xbf16>
    %cst_29 = arith.constant dense<0.000000e+00> : vector<8x128xf32>
    %86 = tpu.matmul %85, %3, %cst_29 {dimension_numbers = #tpu.dot_dimension_numbers<[1], [0], [0], [1], [0, 0, 1, 1], [], []>} : vector<8x32xbf16>, vector<32x128xbf16>, vector<8x128xf32> -> vector<8x128xf32>
    %87 = arith.truncf %73 : vector<8x32xf32> to vector<8x32xbf16>
    %cst_30 = arith.constant dense<0.000000e+00> : vector<8x128xf32>
    %88 = tpu.matmul %87, %4, %cst_30 {dimension_numbers = #tpu.dot_dimension_numbers<[1], [0], [0], [1], [0, 0, 1, 1], [], []>} : vector<8x32xbf16>, vector<32x128xbf16>, vector<8x128xf32> -> vector<8x128xf32>
    %89 = arith.index_cast %c1_i32 : i32 to index
    %c0_31 = arith.constant 0 : index
    %c0_32 = arith.constant 0 : index
    %90 = vector.load %arg1[%89, %c0_31, %c0_32] : memref<8x8x128xbf16, #tpu.memory_space<vmem>>, vector<1x8x128xbf16>
    %91 = vector.shape_cast %90 : vector<1x8x128xbf16> to vector<8x128xbf16>
    %92 = arith.extf %91 : vector<8x128xbf16> to vector<8x128xf32>
    %93 = arith.addf %92, %86 : vector<8x128xf32>
    %c7_i32_33 = arith.constant 7 : i32
    %94 = arith.subi %c7_i32_33, %c1_i32 : i32
    %95 = arith.index_cast %94 : i32 to index
    %c0_34 = arith.constant 0 : index
    %c0_35 = arith.constant 0 : index
    %96 = vector.load %arg2[%95, %c0_34, %c0_35] : memref<8x8x128xbf16, #tpu.memory_space<vmem>>, vector<1x8x128xbf16>
    %97 = vector.shape_cast %96 : vector<1x8x128xbf16> to vector<8x128xbf16>
    %98 = arith.extf %97 : vector<8x128xbf16> to vector<8x128xf32>
    %99 = arith.addf %98, %88 : vector<8x128xf32>
    %100 = vector.extract_strided_slice %93 {offsets = [0, 0], sizes = [8, 32], strides = [1, 1]} : vector<8x128xf32> to vector<8x32xf32>
    %101 = arith.negf %100 : vector<8x32xf32>
    %102 = math.exp %101 : vector<8x32xf32>
    %cst_36 = arith.constant 1.000000e+00 : f32
    %103 = vector.broadcast %cst_36 : f32 to vector<8x32xf32>
    %104 = arith.addf %103, %102 : vector<8x32xf32>
    %105 = arith.divf %103, %104 : vector<8x32xf32>
    %106 = vector.extract_strided_slice %93 {offsets = [0, 32], sizes = [8, 32], strides = [1, 1]} : vector<8x128xf32> to vector<8x32xf32>
    %107 = arith.negf %106 : vector<8x32xf32>
    %108 = math.exp %107 : vector<8x32xf32>
    %cst_37 = arith.constant 1.000000e+00 : f32
    %109 = vector.broadcast %cst_37 : f32 to vector<8x32xf32>
    %110 = arith.addf %109, %108 : vector<8x32xf32>
    %111 = arith.divf %109, %110 : vector<8x32xf32>
    %112 = vector.extract_strided_slice %93 {offsets = [0, 64], sizes = [8, 32], strides = [1, 1]} : vector<8x128xf32> to vector<8x32xf32>
    %113 = math.tanh %112 : vector<8x32xf32>
    %114 = vector.extract_strided_slice %93 {offsets = [0, 96], sizes = [8, 32], strides = [1, 1]} : vector<8x128xf32> to vector<8x32xf32>
    %115 = arith.negf %114 : vector<8x32xf32>
    %116 = math.exp %115 : vector<8x32xf32>
    %cst_38 = arith.constant 1.000000e+00 : f32
    %117 = vector.broadcast %cst_38 : f32 to vector<8x32xf32>
    %118 = arith.addf %117, %116 : vector<8x32xf32>
    %119 = arith.divf %117, %118 : vector<8x32xf32>
    %120 = arith.mulf %111, %46 : vector<8x32xf32>
    %121 = arith.mulf %105, %113 : vector<8x32xf32>
    %122 = arith.addf %120, %121 : vector<8x32xf32>
    %123 = math.tanh %122 : vector<8x32xf32>
    %124 = arith.mulf %119, %123 : vector<8x32xf32>
    %125 = vector.extract_strided_slice %99 {offsets = [0, 0], sizes = [8, 32], strides = [1, 1]} : vector<8x128xf32> to vector<8x32xf32>
    %126 = arith.negf %125 : vector<8x32xf32>
    %127 = math.exp %126 : vector<8x32xf32>
    %cst_39 = arith.constant 1.000000e+00 : f32
    %128 = vector.broadcast %cst_39 : f32 to vector<8x32xf32>
    %129 = arith.addf %128, %127 : vector<8x32xf32>
    %130 = arith.divf %128, %129 : vector<8x32xf32>
    %131 = vector.extract_strided_slice %99 {offsets = [0, 32], sizes = [8, 32], strides = [1, 1]} : vector<8x128xf32> to vector<8x32xf32>
    %132 = arith.negf %131 : vector<8x32xf32>
    %133 = math.exp %132 : vector<8x32xf32>
    %cst_40 = arith.constant 1.000000e+00 : f32
    %134 = vector.broadcast %cst_40 : f32 to vector<8x32xf32>
    %135 = arith.addf %134, %133 : vector<8x32xf32>
    %136 = arith.divf %134, %135 : vector<8x32xf32>
    %137 = vector.extract_strided_slice %99 {offsets = [0, 64], sizes = [8, 32], strides = [1, 1]} : vector<8x128xf32> to vector<8x32xf32>
    %138 = math.tanh %137 : vector<8x32xf32>
    %139 = vector.extract_strided_slice %99 {offsets = [0, 96], sizes = [8, 32], strides = [1, 1]} : vector<8x128xf32> to vector<8x32xf32>
    %140 = arith.negf %139 : vector<8x32xf32>
    %141 = math.exp %140 : vector<8x32xf32>
    %cst_41 = arith.constant 1.000000e+00 : f32
    %142 = vector.broadcast %cst_41 : f32 to vector<8x32xf32>
    %143 = arith.addf %142, %141 : vector<8x32xf32>
    %144 = arith.divf %142, %143 : vector<8x32xf32>
    %145 = arith.mulf %136, %71 : vector<8x32xf32>
    %146 = arith.mulf %130, %138 : vector<8x32xf32>
    %147 = arith.addf %145, %146 : vector<8x32xf32>
    %148 = math.tanh %147 : vector<8x32xf32>
    %149 = arith.mulf %144, %148 : vector<8x32xf32>
    %150 = arith.truncf %124 : vector<8x32xf32> to vector<8x32xbf16>
    %151 = arith.index_cast %c1_i32 : i32 to index
    %c0_42 = arith.constant 0 : index
    %c0_43 = arith.constant 0 : index
    %152 = vector.load %arg5[%151, %c0_42, %c0_43] : memref<8x8x32xbf16, #tpu.memory_space<vmem>>, vector<1x8x32xbf16>
    %153 = vector.shape_cast %152 : vector<1x8x32xbf16> to vector<8x32xbf16>
    %154 = vector.shape_cast %150 : vector<8x32xbf16> to vector<1x8x32xbf16>
    tpu.vector_store %arg5[%151, %c0_42, %c0_43], %154 {strides = array<i32>} : memref<8x8x32xbf16, #tpu.memory_space<vmem>>, vector<1x8x32xbf16>,
    %155 = arith.truncf %149 : vector<8x32xf32> to vector<8x32xbf16>
    %c7_i32_44 = arith.constant 7 : i32
    %156 = arith.subi %c7_i32_44, %c1_i32 : i32
    %157 = arith.index_cast %156 : i32 to index
    %c0_45 = arith.constant 0 : index
    %c0_46 = arith.constant 0 : index
    %158 = vector.load %arg6[%157, %c0_45, %c0_46] : memref<8x8x32xbf16, #tpu.memory_space<vmem>>, vector<1x8x32xbf16>
    %159 = vector.shape_cast %158 : vector<1x8x32xbf16> to vector<8x32xbf16>
    %160 = vector.shape_cast %155 : vector<8x32xbf16> to vector<1x8x32xbf16>
    tpu.vector_store %arg6[%157, %c0_45, %c0_46], %160 {strides = array<i32>} : memref<8x8x32xbf16, #tpu.memory_space<vmem>>, vector<1x8x32xbf16>,
    %c2_i32 = arith.constant 2 : i32
    %161 = arith.truncf %124 : vector<8x32xf32> to vector<8x32xbf16>
    %cst_47 = arith.constant dense<0.000000e+00> : vector<8x128xf32>
    %162 = tpu.matmul %161, %3, %cst_47 {dimension_numbers = #tpu.dot_dimension_numbers<[1], [0], [0], [1], [0, 0, 1, 1], [], []>} : vector<8x32xbf16>, vector<32x128xbf16>, vector<8x128xf32> -> vector<8x128xf32>
    %163 = arith.truncf %149 : vector<8x32xf32> to vector<8x32xbf16>
    %cst_48 = arith.constant dense<0.000000e+00> : vector<8x128xf32>
    %164 = tpu.matmul %163, %4, %cst_48 {dimension_numbers = #tpu.dot_dimension_numbers<[1], [0], [0], [1], [0, 0, 1, 1], [], []>} : vector<8x32xbf16>, vector<32x128xbf16>, vector<8x128xf32> -> vector<8x128xf32>
    %165 = arith.index_cast %c2_i32 : i32 to index
    %c0_49 = arith.constant 0 : index
    %c0_50 = arith.constant 0 : index
    %166 = vector.load %arg1[%165, %c0_49, %c0_50] : memref<8x8x128xbf16, #tpu.memory_space<vmem>>, vector<1x8x128xbf16>
    %167 = vector.shape_cast %166 : vector<1x8x128xbf16> to vector<8x128xbf16>
    %168 = arith.extf %167 : vector<8x128xbf16> to vector<8x128xf32>
    %169 = arith.addf %168, %162 : vector<8x128xf32>
    %c7_i32_51 = arith.constant 7 : i32
    %170 = arith.subi %c7_i32_51, %c2_i32 : i32
    %171 = arith.index_cast %170 : i32 to index
    %c0_52 = arith.constant 0 : index
    %c0_53 = arith.constant 0 : index
    %172 = vector.load %arg2[%171, %c0_52, %c0_53] : memref<8x8x128xbf16, #tpu.memory_space<vmem>>, vector<1x8x128xbf16>
    %173 = vector.shape_cast %172 : vector<1x8x128xbf16> to vector<8x128xbf16>
    %174 = arith.extf %173 : vector<8x128xbf16> to vector<8x128xf32>
    %175 = arith.addf %174, %164 : vector<8x128xf32>
    %176 = vector.extract_strided_slice %169 {offsets = [0, 0], sizes = [8, 32], strides = [1, 1]} : vector<8x128xf32> to vector<8x32xf32>
    %177 = arith.negf %176 : vector<8x32xf32>
    %178 = math.exp %177 : vector<8x32xf32>
    %cst_54 = arith.constant 1.000000e+00 : f32
    %179 = vector.broadcast %cst_54 : f32 to vector<8x32xf32>
    %180 = arith.addf %179, %178 : vector<8x32xf32>
    %181 = arith.divf %179, %180 : vector<8x32xf32>
    %182 = vector.extract_strided_slice %169 {offsets = [0, 32], sizes = [8, 32], strides = [1, 1]} : vector<8x128xf32> to vector<8x32xf32>
    %183 = arith.negf %182 : vector<8x32xf32>
    %184 = math.exp %183 : vector<8x32xf32>
    %cst_55 = arith.constant 1.000000e+00 : f32
    %185 = vector.broadcast %cst_55 : f32 to vector<8x32xf32>
    %186 = arith.addf %185, %184 : vector<8x32xf32>
    %187 = arith.divf %185, %186 : vector<8x32xf32>
    %188 = vector.extract_strided_slice %169 {offsets = [0, 64], sizes = [8, 32], strides = [1, 1]} : vector<8x128xf32> to vector<8x32xf32>
    %189 = math.tanh %188 : vector<8x32xf32>
    %190 = vector.extract_strided_slice %169 {offsets = [0, 96], sizes = [8, 32], strides = [1, 1]} : vector<8x128xf32> to vector<8x32xf32>
    %191 = arith.negf %190 : vector<8x32xf32>
    %192 = math.exp %191 : vector<8x32xf32>
    %cst_56 = arith.constant 1.000000e+00 : f32
    %193 = vector.broadcast %cst_56 : f32 to vector<8x32xf32>
    %194 = arith.addf %193, %192 : vector<8x32xf32>
    %195 = arith.divf %193, %194 : vector<8x32xf32>
    %196 = arith.mulf %187, %122 : vector<8x32xf32>
    %197 = arith.mulf %181, %189 : vector<8x32xf32>
    %198 = arith.addf %196, %197 : vector<8x32xf32>
    %199 = math.tanh %198 : vector<8x32xf32>
    %200 = arith.mulf %195, %199 : vector<8x32xf32>
    %201 = vector.extract_strided_slice %175 {offsets = [0, 0], sizes = [8, 32], strides = [1, 1]} : vector<8x128xf32> to vector<8x32xf32>
    %202 = arith.negf %201 : vector<8x32xf32>
    %203 = math.exp %202 : vector<8x32xf32>
    %cst_57 = arith.constant 1.000000e+00 : f32
    %204 = vector.broadcast %cst_57 : f32 to vector<8x32xf32>
    %205 = arith.addf %204, %203 : vector<8x32xf32>
    %206 = arith.divf %204, %205 : vector<8x32xf32>
    %207 = vector.extract_strided_slice %175 {offsets = [0, 32], sizes = [8, 32], strides = [1, 1]} : vector<8x128xf32> to vector<8x32xf32>
    %208 = arith.negf %207 : vector<8x32xf32>
    %209 = math.exp %208 : vector<8x32xf32>
    %cst_58 = arith.constant 1.000000e+00 : f32
    %210 = vector.broadcast %cst_58 : f32 to vector<8x32xf32>
    %211 = arith.addf %210, %209 : vector<8x32xf32>
    %212 = arith.divf %210, %211 : vector<8x32xf32>
    %213 = vector.extract_strided_slice %175 {offsets = [0, 64], sizes = [8, 32], strides = [1, 1]} : vector<8x128xf32> to vector<8x32xf32>
    %214 = math.tanh %213 : vector<8x32xf32>
    %215 = vector.extract_strided_slice %175 {offsets = [0, 96], sizes = [8, 32], strides = [1, 1]} : vector<8x128xf32> to vector<8x32xf32>
    %216 = arith.negf %215 : vector<8x32xf32>
    %217 = math.exp %216 : vector<8x32xf32>
    %cst_59 = arith.constant 1.000000e+00 : f32
    %218 = vector.broadcast %cst_59 : f32 to vector<8x32xf32>
    %219 = arith.addf %218, %217 : vector<8x32xf32>
    %220 = arith.divf %218, %219 : vector<8x32xf32>
    %221 = arith.mulf %212, %147 : vector<8x32xf32>
    %222 = arith.mulf %206, %214 : vector<8x32xf32>
    %223 = arith.addf %221, %222 : vector<8x32xf32>
    %224 = math.tanh %223 : vector<8x32xf32>
    %225 = arith.mulf %220, %224 : vector<8x32xf32>
    %226 = arith.truncf %200 : vector<8x32xf32> to vector<8x32xbf16>
    %227 = arith.index_cast %c2_i32 : i32 to index
    %c0_60 = arith.constant 0 : index
    %c0_61 = arith.constant 0 : index
    %228 = vector.load %arg5[%227, %c0_60, %c0_61] : memref<8x8x32xbf16, #tpu.memory_space<vmem>>, vector<1x8x32xbf16>
    %229 = vector.shape_cast %228 : vector<1x8x32xbf16> to vector<8x32xbf16>
    %230 = vector.shape_cast %226 : vector<8x32xbf16> to vector<1x8x32xbf16>
    tpu.vector_store %arg5[%227, %c0_60, %c0_61], %230 {strides = array<i32>} : memref<8x8x32xbf16, #tpu.memory_space<vmem>>, vector<1x8x32xbf16>,
    %231 = arith.truncf %225 : vector<8x32xf32> to vector<8x32xbf16>
    %c7_i32_62 = arith.constant 7 : i32
    %232 = arith.subi %c7_i32_62, %c2_i32 : i32
    %233 = arith.index_cast %232 : i32 to index
    %c0_63 = arith.constant 0 : index
    %c0_64 = arith.constant 0 : index
    %234 = vector.load %arg6[%233, %c0_63, %c0_64] : memref<8x8x32xbf16, #tpu.memory_space<vmem>>, vector<1x8x32xbf16>
    %235 = vector.shape_cast %234 : vector<1x8x32xbf16> to vector<8x32xbf16>
    %236 = vector.shape_cast %231 : vector<8x32xbf16> to vector<1x8x32xbf16>
    tpu.vector_store %arg6[%233, %c0_63, %c0_64], %236 {strides = array<i32>} : memref<8x8x32xbf16, #tpu.memory_space<vmem>>, vector<1x8x32xbf16>,
    %c3_i32 = arith.constant 3 : i32
    %237 = arith.truncf %200 : vector<8x32xf32> to vector<8x32xbf16>
    %cst_65 = arith.constant dense<0.000000e+00> : vector<8x128xf32>
    %238 = tpu.matmul %237, %3, %cst_65 {dimension_numbers = #tpu.dot_dimension_numbers<[1], [0], [0], [1], [0, 0, 1, 1], [], []>} : vector<8x32xbf16>, vector<32x128xbf16>, vector<8x128xf32> -> vector<8x128xf32>
    %239 = arith.truncf %225 : vector<8x32xf32> to vector<8x32xbf16>
    %cst_66 = arith.constant dense<0.000000e+00> : vector<8x128xf32>
    %240 = tpu.matmul %239, %4, %cst_66 {dimension_numbers = #tpu.dot_dimension_numbers<[1], [0], [0], [1], [0, 0, 1, 1], [], []>} : vector<8x32xbf16>, vector<32x128xbf16>, vector<8x128xf32> -> vector<8x128xf32>
    %241 = arith.index_cast %c3_i32 : i32 to index
    %c0_67 = arith.constant 0 : index
    %c0_68 = arith.constant 0 : index
    %242 = vector.load %arg1[%241, %c0_67, %c0_68] : memref<8x8x128xbf16, #tpu.memory_space<vmem>>, vector<1x8x128xbf16>
    %243 = vector.shape_cast %242 : vector<1x8x128xbf16> to vector<8x128xbf16>
    %244 = arith.extf %243 : vector<8x128xbf16> to vector<8x128xf32>
    %245 = arith.addf %244, %238 : vector<8x128xf32>
    %c7_i32_69 = arith.constant 7 : i32
    %246 = arith.subi %c7_i32_69, %c3_i32 : i32
    %247 = arith.index_cast %246 : i32 to index
    %c0_70 = arith.constant 0 : index
    %c0_71 = arith.constant 0 : index
    %248 = vector.load %arg2[%247, %c0_70, %c0_71] : memref<8x8x128xbf16, #tpu.memory_space<vmem>>, vector<1x8x128xbf16>
    %249 = vector.shape_cast %248 : vector<1x8x128xbf16> to vector<8x128xbf16>
    %250 = arith.extf %249 : vector<8x128xbf16> to vector<8x128xf32>
    %251 = arith.addf %250, %240 : vector<8x128xf32>
    %252 = vector.extract_strided_slice %245 {offsets = [0, 0], sizes = [8, 32], strides = [1, 1]} : vector<8x128xf32> to vector<8x32xf32>
    %253 = arith.negf %252 : vector<8x32xf32>
    %254 = math.exp %253 : vector<8x32xf32>
    %cst_72 = arith.constant 1.000000e+00 : f32
    %255 = vector.broadcast %cst_72 : f32 to vector<8x32xf32>
    %256 = arith.addf %255, %254 : vector<8x32xf32>
    %257 = arith.divf %255, %256 : vector<8x32xf32>
    %258 = vector.extract_strided_slice %245 {offsets = [0, 32], sizes = [8, 32], strides = [1, 1]} : vector<8x128xf32> to vector<8x32xf32>
    %259 = arith.negf %258 : vector<8x32xf32>
    %260 = math.exp %259 : vector<8x32xf32>
    %cst_73 = arith.constant 1.000000e+00 : f32
    %261 = vector.broadcast %cst_73 : f32 to vector<8x32xf32>
    %262 = arith.addf %261, %260 : vector<8x32xf32>
    %263 = arith.divf %261, %262 : vector<8x32xf32>
    %264 = vector.extract_strided_slice %245 {offsets = [0, 64], sizes = [8, 32], strides = [1, 1]} : vector<8x128xf32> to vector<8x32xf32>
    %265 = math.tanh %264 : vector<8x32xf32>
    %266 = vector.extract_strided_slice %245 {offsets = [0, 96], sizes = [8, 32], strides = [1, 1]} : vector<8x128xf32> to vector<8x32xf32>
    %267 = arith.negf %266 : vector<8x32xf32>
    %268 = math.exp %267 : vector<8x32xf32>
    %cst_74 = arith.constant 1.000000e+00 : f32
    %269 = vector.broadcast %cst_74 : f32 to vector<8x32xf32>
    %270 = arith.addf %269, %268 : vector<8x32xf32>
    %271 = arith.divf %269, %270 : vector<8x32xf32>
    %272 = arith.mulf %263, %198 : vector<8x32xf32>
    %273 = arith.mulf %257, %265 : vector<8x32xf32>
    %274 = arith.addf %272, %273 : vector<8x32xf32>
    %275 = math.tanh %274 : vector<8x32xf32>
    %276 = arith.mulf %271, %275 : vector<8x32xf32>
    %277 = vector.extract_strided_slice %251 {offsets = [0, 0], sizes = [8, 32], strides = [1, 1]} : vector<8x128xf32> to vector<8x32xf32>
    %278 = arith.negf %277 : vector<8x32xf32>
    %279 = math.exp %278 : vector<8x32xf32>
    %cst_75 = arith.constant 1.000000e+00 : f32
    %280 = vector.broadcast %cst_75 : f32 to vector<8x32xf32>
    %281 = arith.addf %280, %279 : vector<8x32xf32>
    %282 = arith.divf %280, %281 : vector<8x32xf32>
    %283 = vector.extract_strided_slice %251 {offsets = [0, 32], sizes = [8, 32], strides = [1, 1]} : vector<8x128xf32> to vector<8x32xf32>
    %284 = arith.negf %283 : vector<8x32xf32>
    %285 = math.exp %284 : vector<8x32xf32>
    %cst_76 = arith.constant 1.000000e+00 : f32
    %286 = vector.broadcast %cst_76 : f32 to vector<8x32xf32>
    %287 = arith.addf %286, %285 : vector<8x32xf32>
    %288 = arith.divf %286, %287 : vector<8x32xf32>
    %289 = vector.extract_strided_slice %251 {offsets = [0, 64], sizes = [8, 32], strides = [1, 1]} : vector<8x128xf32> to vector<8x32xf32>
    %290 = math.tanh %289 : vector<8x32xf32>
    %291 = vector.extract_strided_slice %251 {offsets = [0, 96], sizes = [8, 32], strides = [1, 1]} : vector<8x128xf32> to vector<8x32xf32>
    %292 = arith.negf %291 : vector<8x32xf32>
    %293 = math.exp %292 : vector<8x32xf32>
    %cst_77 = arith.constant 1.000000e+00 : f32
    %294 = vector.broadcast %cst_77 : f32 to vector<8x32xf32>
    %295 = arith.addf %294, %293 : vector<8x32xf32>
    %296 = arith.divf %294, %295 : vector<8x32xf32>
    %297 = arith.mulf %288, %223 : vector<8x32xf32>
    %298 = arith.mulf %282, %290 : vector<8x32xf32>
    %299 = arith.addf %297, %298 : vector<8x32xf32>
    %300 = math.tanh %299 : vector<8x32xf32>
    %301 = arith.mulf %296, %300 : vector<8x32xf32>
    %302 = arith.truncf %276 : vector<8x32xf32> to vector<8x32xbf16>
    %303 = arith.index_cast %c3_i32 : i32 to index
    %c0_78 = arith.constant 0 : index
    %c0_79 = arith.constant 0 : index
    %304 = vector.load %arg5[%303, %c0_78, %c0_79] : memref<8x8x32xbf16, #tpu.memory_space<vmem>>, vector<1x8x32xbf16>
    %305 = vector.shape_cast %304 : vector<1x8x32xbf16> to vector<8x32xbf16>
    %306 = vector.shape_cast %302 : vector<8x32xbf16> to vector<1x8x32xbf16>
    tpu.vector_store %arg5[%303, %c0_78, %c0_79], %306 {strides = array<i32>} : memref<8x8x32xbf16, #tpu.memory_space<vmem>>, vector<1x8x32xbf16>,
    %307 = arith.truncf %301 : vector<8x32xf32> to vector<8x32xbf16>
    %c7_i32_80 = arith.constant 7 : i32
    %308 = arith.subi %c7_i32_80, %c3_i32 : i32
    %309 = arith.index_cast %308 : i32 to index
    %c0_81 = arith.constant 0 : index
    %c0_82 = arith.constant 0 : index
    %310 = vector.load %arg6[%309, %c0_81, %c0_82] : memref<8x8x32xbf16, #tpu.memory_space<vmem>>, vector<1x8x32xbf16>
    %311 = vector.shape_cast %310 : vector<1x8x32xbf16> to vector<8x32xbf16>
    %312 = vector.shape_cast %307 : vector<8x32xbf16> to vector<1x8x32xbf16>
    tpu.vector_store %arg6[%309, %c0_81, %c0_82], %312 {strides = array<i32>} : memref<8x8x32xbf16, #tpu.memory_space<vmem>>, vector<1x8x32xbf16>,
    %c4_i32 = arith.constant 4 : i32
    %313 = arith.truncf %276 : vector<8x32xf32> to vector<8x32xbf16>
    %cst_83 = arith.constant dense<0.000000e+00> : vector<8x128xf32>
    %314 = tpu.matmul %313, %3, %cst_83 {dimension_numbers = #tpu.dot_dimension_numbers<[1], [0], [0], [1], [0, 0, 1, 1], [], []>} : vector<8x32xbf16>, vector<32x128xbf16>, vector<8x128xf32> -> vector<8x128xf32>
    %315 = arith.truncf %301 : vector<8x32xf32> to vector<8x32xbf16>
    %cst_84 = arith.constant dense<0.000000e+00> : vector<8x128xf32>
    %316 = tpu.matmul %315, %4, %cst_84 {dimension_numbers = #tpu.dot_dimension_numbers<[1], [0], [0], [1], [0, 0, 1, 1], [], []>} : vector<8x32xbf16>, vector<32x128xbf16>, vector<8x128xf32> -> vector<8x128xf32>
    %317 = arith.index_cast %c4_i32 : i32 to index
    %c0_85 = arith.constant 0 : index
    %c0_86 = arith.constant 0 : index
    %318 = vector.load %arg1[%317, %c0_85, %c0_86] : memref<8x8x128xbf16, #tpu.memory_space<vmem>>, vector<1x8x128xbf16>
    %319 = vector.shape_cast %318 : vector<1x8x128xbf16> to vector<8x128xbf16>
    %320 = arith.extf %319 : vector<8x128xbf16> to vector<8x128xf32>
    %321 = arith.addf %320, %314 : vector<8x128xf32>
    %c7_i32_87 = arith.constant 7 : i32
    %322 = arith.subi %c7_i32_87, %c4_i32 : i32
    %323 = arith.index_cast %322 : i32 to index
    %c0_88 = arith.constant 0 : index
    %c0_89 = arith.constant 0 : index
    %324 = vector.load %arg2[%323, %c0_88, %c0_89] : memref<8x8x128xbf16, #tpu.memory_space<vmem>>, vector<1x8x128xbf16>
    %325 = vector.shape_cast %324 : vector<1x8x128xbf16> to vector<8x128xbf16>
    %326 = arith.extf %325 : vector<8x128xbf16> to vector<8x128xf32>
    %327 = arith.addf %326, %316 : vector<8x128xf32>
    %328 = vector.extract_strided_slice %321 {offsets = [0, 0], sizes = [8, 32], strides = [1, 1]} : vector<8x128xf32> to vector<8x32xf32>
    %329 = arith.negf %328 : vector<8x32xf32>
    %330 = math.exp %329 : vector<8x32xf32>
    %cst_90 = arith.constant 1.000000e+00 : f32
    %331 = vector.broadcast %cst_90 : f32 to vector<8x32xf32>
    %332 = arith.addf %331, %330 : vector<8x32xf32>
    %333 = arith.divf %331, %332 : vector<8x32xf32>
    %334 = vector.extract_strided_slice %321 {offsets = [0, 32], sizes = [8, 32], strides = [1, 1]} : vector<8x128xf32> to vector<8x32xf32>
    %335 = arith.negf %334 : vector<8x32xf32>
    %336 = math.exp %335 : vector<8x32xf32>
    %cst_91 = arith.constant 1.000000e+00 : f32
    %337 = vector.broadcast %cst_91 : f32 to vector<8x32xf32>
    %338 = arith.addf %337, %336 : vector<8x32xf32>
    %339 = arith.divf %337, %338 : vector<8x32xf32>
    %340 = vector.extract_strided_slice %321 {offsets = [0, 64], sizes = [8, 32], strides = [1, 1]} : vector<8x128xf32> to vector<8x32xf32>
    %341 = math.tanh %340 : vector<8x32xf32>
    %342 = vector.extract_strided_slice %321 {offsets = [0, 96], sizes = [8, 32], strides = [1, 1]} : vector<8x128xf32> to vector<8x32xf32>
    %343 = arith.negf %342 : vector<8x32xf32>
    %344 = math.exp %343 : vector<8x32xf32>
    %cst_92 = arith.constant 1.000000e+00 : f32
    %345 = vector.broadcast %cst_92 : f32 to vector<8x32xf32>
    %346 = arith.addf %345, %344 : vector<8x32xf32>
    %347 = arith.divf %345, %346 : vector<8x32xf32>
    %348 = arith.mulf %339, %274 : vector<8x32xf32>
    %349 = arith.mulf %333, %341 : vector<8x32xf32>
    %350 = arith.addf %348, %349 : vector<8x32xf32>
    %351 = math.tanh %350 : vector<8x32xf32>
    %352 = arith.mulf %347, %351 : vector<8x32xf32>
    %353 = vector.extract_strided_slice %327 {offsets = [0, 0], sizes = [8, 32], strides = [1, 1]} : vector<8x128xf32> to vector<8x32xf32>
    %354 = arith.negf %353 : vector<8x32xf32>
    %355 = math.exp %354 : vector<8x32xf32>
    %cst_93 = arith.constant 1.000000e+00 : f32
    %356 = vector.broadcast %cst_93 : f32 to vector<8x32xf32>
    %357 = arith.addf %356, %355 : vector<8x32xf32>
    %358 = arith.divf %356, %357 : vector<8x32xf32>
    %359 = vector.extract_strided_slice %327 {offsets = [0, 32], sizes = [8, 32], strides = [1, 1]} : vector<8x128xf32> to vector<8x32xf32>
    %360 = arith.negf %359 : vector<8x32xf32>
    %361 = math.exp %360 : vector<8x32xf32>
    %cst_94 = arith.constant 1.000000e+00 : f32
    %362 = vector.broadcast %cst_94 : f32 to vector<8x32xf32>
    %363 = arith.addf %362, %361 : vector<8x32xf32>
    %364 = arith.divf %362, %363 : vector<8x32xf32>
    %365 = vector.extract_strided_slice %327 {offsets = [0, 64], sizes = [8, 32], strides = [1, 1]} : vector<8x128xf32> to vector<8x32xf32>
    %366 = math.tanh %365 : vector<8x32xf32>
    %367 = vector.extract_strided_slice %327 {offsets = [0, 96], sizes = [8, 32], strides = [1, 1]} : vector<8x128xf32> to vector<8x32xf32>
    %368 = arith.negf %367 : vector<8x32xf32>
    %369 = math.exp %368 : vector<8x32xf32>
    %cst_95 = arith.constant 1.000000e+00 : f32
    %370 = vector.broadcast %cst_95 : f32 to vector<8x32xf32>
    %371 = arith.addf %370, %369 : vector<8x32xf32>
    %372 = arith.divf %370, %371 : vector<8x32xf32>
    %373 = arith.mulf %364, %299 : vector<8x32xf32>
    %374 = arith.mulf %358, %366 : vector<8x32xf32>
    %375 = arith.addf %373, %374 : vector<8x32xf32>
    %376 = math.tanh %375 : vector<8x32xf32>
    %377 = arith.mulf %372, %376 : vector<8x32xf32>
    %378 = arith.truncf %352 : vector<8x32xf32> to vector<8x32xbf16>
    %379 = arith.index_cast %c4_i32 : i32 to index
    %c0_96 = arith.constant 0 : index
    %c0_97 = arith.constant 0 : index
    %380 = vector.load %arg5[%379, %c0_96, %c0_97] : memref<8x8x32xbf16, #tpu.memory_space<vmem>>, vector<1x8x32xbf16>
    %381 = vector.shape_cast %380 : vector<1x8x32xbf16> to vector<8x32xbf16>
    %382 = vector.shape_cast %378 : vector<8x32xbf16> to vector<1x8x32xbf16>
    tpu.vector_store %arg5[%379, %c0_96, %c0_97], %382 {strides = array<i32>} : memref<8x8x32xbf16, #tpu.memory_space<vmem>>, vector<1x8x32xbf16>,
    %383 = arith.truncf %377 : vector<8x32xf32> to vector<8x32xbf16>
    %c7_i32_98 = arith.constant 7 : i32
    %384 = arith.subi %c7_i32_98, %c4_i32 : i32
    %385 = arith.index_cast %384 : i32 to index
    %c0_99 = arith.constant 0 : index
    %c0_100 = arith.constant 0 : index
    %386 = vector.load %arg6[%385, %c0_99, %c0_100] : memref<8x8x32xbf16, #tpu.memory_space<vmem>>, vector<1x8x32xbf16>
    %387 = vector.shape_cast %386 : vector<1x8x32xbf16> to vector<8x32xbf16>
    %388 = vector.shape_cast %383 : vector<8x32xbf16> to vector<1x8x32xbf16>
    tpu.vector_store %arg6[%385, %c0_99, %c0_100], %388 {strides = array<i32>} : memref<8x8x32xbf16, #tpu.memory_space<vmem>>, vector<1x8x32xbf16>,
    %c5_i32 = arith.constant 5 : i32
    %389 = arith.truncf %352 : vector<8x32xf32> to vector<8x32xbf16>
    %cst_101 = arith.constant dense<0.000000e+00> : vector<8x128xf32>
    %390 = tpu.matmul %389, %3, %cst_101 {dimension_numbers = #tpu.dot_dimension_numbers<[1], [0], [0], [1], [0, 0, 1, 1], [], []>} : vector<8x32xbf16>, vector<32x128xbf16>, vector<8x128xf32> -> vector<8x128xf32>
    %391 = arith.truncf %377 : vector<8x32xf32> to vector<8x32xbf16>
    %cst_102 = arith.constant dense<0.000000e+00> : vector<8x128xf32>
    %392 = tpu.matmul %391, %4, %cst_102 {dimension_numbers = #tpu.dot_dimension_numbers<[1], [0], [0], [1], [0, 0, 1, 1], [], []>} : vector<8x32xbf16>, vector<32x128xbf16>, vector<8x128xf32> -> vector<8x128xf32>
    %393 = arith.index_cast %c5_i32 : i32 to index
    %c0_103 = arith.constant 0 : index
    %c0_104 = arith.constant 0 : index
    %394 = vector.load %arg1[%393, %c0_103, %c0_104] : memref<8x8x128xbf16, #tpu.memory_space<vmem>>, vector<1x8x128xbf16>
    %395 = vector.shape_cast %394 : vector<1x8x128xbf16> to vector<8x128xbf16>
    %396 = arith.extf %395 : vector<8x128xbf16> to vector<8x128xf32>
    %397 = arith.addf %396, %390 : vector<8x128xf32>
    %c7_i32_105 = arith.constant 7 : i32
    %398 = arith.subi %c7_i32_105, %c5_i32 : i32
    %399 = arith.index_cast %398 : i32 to index
    %c0_106 = arith.constant 0 : index
    %c0_107 = arith.constant 0 : index
    %400 = vector.load %arg2[%399, %c0_106, %c0_107] : memref<8x8x128xbf16, #tpu.memory_space<vmem>>, vector<1x8x128xbf16>
    %401 = vector.shape_cast %400 : vector<1x8x128xbf16> to vector<8x128xbf16>
    %402 = arith.extf %401 : vector<8x128xbf16> to vector<8x128xf32>
    %403 = arith.addf %402, %392 : vector<8x128xf32>
    %404 = vector.extract_strided_slice %397 {offsets = [0, 0], sizes = [8, 32], strides = [1, 1]} : vector<8x128xf32> to vector<8x32xf32>
    %405 = arith.negf %404 : vector<8x32xf32>
    %406 = math.exp %405 : vector<8x32xf32>
    %cst_108 = arith.constant 1.000000e+00 : f32
    %407 = vector.broadcast %cst_108 : f32 to vector<8x32xf32>
    %408 = arith.addf %407, %406 : vector<8x32xf32>
    %409 = arith.divf %407, %408 : vector<8x32xf32>
    %410 = vector.extract_strided_slice %397 {offsets = [0, 32], sizes = [8, 32], strides = [1, 1]} : vector<8x128xf32> to vector<8x32xf32>
    %411 = arith.negf %410 : vector<8x32xf32>
    %412 = math.exp %411 : vector<8x32xf32>
    %cst_109 = arith.constant 1.000000e+00 : f32
    %413 = vector.broadcast %cst_109 : f32 to vector<8x32xf32>
    %414 = arith.addf %413, %412 : vector<8x32xf32>
    %415 = arith.divf %413, %414 : vector<8x32xf32>
    %416 = vector.extract_strided_slice %397 {offsets = [0, 64], sizes = [8, 32], strides = [1, 1]} : vector<8x128xf32> to vector<8x32xf32>
    %417 = math.tanh %416 : vector<8x32xf32>
    %418 = vector.extract_strided_slice %397 {offsets = [0, 96], sizes = [8, 32], strides = [1, 1]} : vector<8x128xf32> to vector<8x32xf32>
    %419 = arith.negf %418 : vector<8x32xf32>
    %420 = math.exp %419 : vector<8x32xf32>
    %cst_110 = arith.constant 1.000000e+00 : f32
    %421 = vector.broadcast %cst_110 : f32 to vector<8x32xf32>
    %422 = arith.addf %421, %420 : vector<8x32xf32>
    %423 = arith.divf %421, %422 : vector<8x32xf32>
    %424 = arith.mulf %415, %350 : vector<8x32xf32>
    %425 = arith.mulf %409, %417 : vector<8x32xf32>
    %426 = arith.addf %424, %425 : vector<8x32xf32>
    %427 = math.tanh %426 : vector<8x32xf32>
    %428 = arith.mulf %423, %427 : vector<8x32xf32>
    %429 = vector.extract_strided_slice %403 {offsets = [0, 0], sizes = [8, 32], strides = [1, 1]} : vector<8x128xf32> to vector<8x32xf32>
    %430 = arith.negf %429 : vector<8x32xf32>
    %431 = math.exp %430 : vector<8x32xf32>
    %cst_111 = arith.constant 1.000000e+00 : f32
    %432 = vector.broadcast %cst_111 : f32 to vector<8x32xf32>
    %433 = arith.addf %432, %431 : vector<8x32xf32>
    %434 = arith.divf %432, %433 : vector<8x32xf32>
    %435 = vector.extract_strided_slice %403 {offsets = [0, 32], sizes = [8, 32], strides = [1, 1]} : vector<8x128xf32> to vector<8x32xf32>
    %436 = arith.negf %435 : vector<8x32xf32>
    %437 = math.exp %436 : vector<8x32xf32>
    %cst_112 = arith.constant 1.000000e+00 : f32
    %438 = vector.broadcast %cst_112 : f32 to vector<8x32xf32>
    %439 = arith.addf %438, %437 : vector<8x32xf32>
    %440 = arith.divf %438, %439 : vector<8x32xf32>
    %441 = vector.extract_strided_slice %403 {offsets = [0, 64], sizes = [8, 32], strides = [1, 1]} : vector<8x128xf32> to vector<8x32xf32>
    %442 = math.tanh %441 : vector<8x32xf32>
    %443 = vector.extract_strided_slice %403 {offsets = [0, 96], sizes = [8, 32], strides = [1, 1]} : vector<8x128xf32> to vector<8x32xf32>
    %444 = arith.negf %443 : vector<8x32xf32>
    %445 = math.exp %444 : vector<8x32xf32>
    %cst_113 = arith.constant 1.000000e+00 : f32
    %446 = vector.broadcast %cst_113 : f32 to vector<8x32xf32>
    %447 = arith.addf %446, %445 : vector<8x32xf32>
    %448 = arith.divf %446, %447 : vector<8x32xf32>
    %449 = arith.mulf %440, %375 : vector<8x32xf32>
    %450 = arith.mulf %434, %442 : vector<8x32xf32>
    %451 = arith.addf %449, %450 : vector<8x32xf32>
    %452 = math.tanh %451 : vector<8x32xf32>
    %453 = arith.mulf %448, %452 : vector<8x32xf32>
    %454 = arith.truncf %428 : vector<8x32xf32> to vector<8x32xbf16>
    %455 = arith.index_cast %c5_i32 : i32 to index
    %c0_114 = arith.constant 0 : index
    %c0_115 = arith.constant 0 : index
    %456 = vector.load %arg5[%455, %c0_114, %c0_115] : memref<8x8x32xbf16, #tpu.memory_space<vmem>>, vector<1x8x32xbf16>
    %457 = vector.shape_cast %456 : vector<1x8x32xbf16> to vector<8x32xbf16>
    %458 = vector.shape_cast %454 : vector<8x32xbf16> to vector<1x8x32xbf16>
    tpu.vector_store %arg5[%455, %c0_114, %c0_115], %458 {strides = array<i32>} : memref<8x8x32xbf16, #tpu.memory_space<vmem>>, vector<1x8x32xbf16>,
    %459 = arith.truncf %453 : vector<8x32xf32> to vector<8x32xbf16>
    %c7_i32_116 = arith.constant 7 : i32
    %460 = arith.subi %c7_i32_116, %c5_i32 : i32
    %461 = arith.index_cast %460 : i32 to index
    %c0_117 = arith.constant 0 : index
    %c0_118 = arith.constant 0 : index
    %462 = vector.load %arg6[%461, %c0_117, %c0_118] : memref<8x8x32xbf16, #tpu.memory_space<vmem>>, vector<1x8x32xbf16>
    %463 = vector.shape_cast %462 : vector<1x8x32xbf16> to vector<8x32xbf16>
    %464 = vector.shape_cast %459 : vector<8x32xbf16> to vector<1x8x32xbf16>
    tpu.vector_store %arg6[%461, %c0_117, %c0_118], %464 {strides = array<i32>} : memref<8x8x32xbf16, #tpu.memory_space<vmem>>, vector<1x8x32xbf16>,
    %c6_i32 = arith.constant 6 : i32
    %465 = arith.truncf %428 : vector<8x32xf32> to vector<8x32xbf16>
    %cst_119 = arith.constant dense<0.000000e+00> : vector<8x128xf32>
    %466 = tpu.matmul %465, %3, %cst_119 {dimension_numbers = #tpu.dot_dimension_numbers<[1], [0], [0], [1], [0, 0, 1, 1], [], []>} : vector<8x32xbf16>, vector<32x128xbf16>, vector<8x128xf32> -> vector<8x128xf32>
    %467 = arith.truncf %453 : vector<8x32xf32> to vector<8x32xbf16>
    %cst_120 = arith.constant dense<0.000000e+00> : vector<8x128xf32>
    %468 = tpu.matmul %467, %4, %cst_120 {dimension_numbers = #tpu.dot_dimension_numbers<[1], [0], [0], [1], [0, 0, 1, 1], [], []>} : vector<8x32xbf16>, vector<32x128xbf16>, vector<8x128xf32> -> vector<8x128xf32>
    %469 = arith.index_cast %c6_i32 : i32 to index
    %c0_121 = arith.constant 0 : index
    %c0_122 = arith.constant 0 : index
    %470 = vector.load %arg1[%469, %c0_121, %c0_122] : memref<8x8x128xbf16, #tpu.memory_space<vmem>>, vector<1x8x128xbf16>
    %471 = vector.shape_cast %470 : vector<1x8x128xbf16> to vector<8x128xbf16>
    %472 = arith.extf %471 : vector<8x128xbf16> to vector<8x128xf32>
    %473 = arith.addf %472, %466 : vector<8x128xf32>
    %c7_i32_123 = arith.constant 7 : i32
    %474 = arith.subi %c7_i32_123, %c6_i32 : i32
    %475 = arith.index_cast %474 : i32 to index
    %c0_124 = arith.constant 0 : index
    %c0_125 = arith.constant 0 : index
    %476 = vector.load %arg2[%475, %c0_124, %c0_125] : memref<8x8x128xbf16, #tpu.memory_space<vmem>>, vector<1x8x128xbf16>
    %477 = vector.shape_cast %476 : vector<1x8x128xbf16> to vector<8x128xbf16>
    %478 = arith.extf %477 : vector<8x128xbf16> to vector<8x128xf32>
    %479 = arith.addf %478, %468 : vector<8x128xf32>
    %480 = vector.extract_strided_slice %473 {offsets = [0, 0], sizes = [8, 32], strides = [1, 1]} : vector<8x128xf32> to vector<8x32xf32>
    %481 = arith.negf %480 : vector<8x32xf32>
    %482 = math.exp %481 : vector<8x32xf32>
    %cst_126 = arith.constant 1.000000e+00 : f32
    %483 = vector.broadcast %cst_126 : f32 to vector<8x32xf32>
    %484 = arith.addf %483, %482 : vector<8x32xf32>
    %485 = arith.divf %483, %484 : vector<8x32xf32>
    %486 = vector.extract_strided_slice %473 {offsets = [0, 32], sizes = [8, 32], strides = [1, 1]} : vector<8x128xf32> to vector<8x32xf32>
    %487 = arith.negf %486 : vector<8x32xf32>
    %488 = math.exp %487 : vector<8x32xf32>
    %cst_127 = arith.constant 1.000000e+00 : f32
    %489 = vector.broadcast %cst_127 : f32 to vector<8x32xf32>
    %490 = arith.addf %489, %488 : vector<8x32xf32>
    %491 = arith.divf %489, %490 : vector<8x32xf32>
    %492 = vector.extract_strided_slice %473 {offsets = [0, 64], sizes = [8, 32], strides = [1, 1]} : vector<8x128xf32> to vector<8x32xf32>
    %493 = math.tanh %492 : vector<8x32xf32>
    %494 = vector.extract_strided_slice %473 {offsets = [0, 96], sizes = [8, 32], strides = [1, 1]} : vector<8x128xf32> to vector<8x32xf32>
    %495 = arith.negf %494 : vector<8x32xf32>
    %496 = math.exp %495 : vector<8x32xf32>
    %cst_128 = arith.constant 1.000000e+00 : f32
    %497 = vector.broadcast %cst_128 : f32 to vector<8x32xf32>
    %498 = arith.addf %497, %496 : vector<8x32xf32>
    %499 = arith.divf %497, %498 : vector<8x32xf32>
    %500 = arith.mulf %491, %426 : vector<8x32xf32>
    %501 = arith.mulf %485, %493 : vector<8x32xf32>
    %502 = arith.addf %500, %501 : vector<8x32xf32>
    %503 = math.tanh %502 : vector<8x32xf32>
    %504 = arith.mulf %499, %503 : vector<8x32xf32>
    %505 = vector.extract_strided_slice %479 {offsets = [0, 0], sizes = [8, 32], strides = [1, 1]} : vector<8x128xf32> to vector<8x32xf32>
    %506 = arith.negf %505 : vector<8x32xf32>
    %507 = math.exp %506 : vector<8x32xf32>
    %cst_129 = arith.constant 1.000000e+00 : f32
    %508 = vector.broadcast %cst_129 : f32 to vector<8x32xf32>
    %509 = arith.addf %508, %507 : vector<8x32xf32>
    %510 = arith.divf %508, %509 : vector<8x32xf32>
    %511 = vector.extract_strided_slice %479 {offsets = [0, 32], sizes = [8, 32], strides = [1, 1]} : vector<8x128xf32> to vector<8x32xf32>
    %512 = arith.negf %511 : vector<8x32xf32>
    %513 = math.exp %512 : vector<8x32xf32>
    %cst_130 = arith.constant 1.000000e+00 : f32
    %514 = vector.broadcast %cst_130 : f32 to vector<8x32xf32>
    %515 = arith.addf %514, %513 : vector<8x32xf32>
    %516 = arith.divf %514, %515 : vector<8x32xf32>
    %517 = vector.extract_strided_slice %479 {offsets = [0, 64], sizes = [8, 32], strides = [1, 1]} : vector<8x128xf32> to vector<8x32xf32>
    %518 = math.tanh %517 : vector<8x32xf32>
    %519 = vector.extract_strided_slice %479 {offsets = [0, 96], sizes = [8, 32], strides = [1, 1]} : vector<8x128xf32> to vector<8x32xf32>
    %520 = arith.negf %519 : vector<8x32xf32>
    %521 = math.exp %520 : vector<8x32xf32>
    %cst_131 = arith.constant 1.000000e+00 : f32
    %522 = vector.broadcast %cst_131 : f32 to vector<8x32xf32>
    %523 = arith.addf %522, %521 : vector<8x32xf32>
    %524 = arith.divf %522, %523 : vector<8x32xf32>
    %525 = arith.mulf %516, %451 : vector<8x32xf32>
    %526 = arith.mulf %510, %518 : vector<8x32xf32>
    %527 = arith.addf %525, %526 : vector<8x32xf32>
    %528 = math.tanh %527 : vector<8x32xf32>
    %529 = arith.mulf %524, %528 : vector<8x32xf32>
    %530 = arith.truncf %504 : vector<8x32xf32> to vector<8x32xbf16>
    %531 = arith.index_cast %c6_i32 : i32 to index
    %c0_132 = arith.constant 0 : index
    %c0_133 = arith.constant 0 : index
    %532 = vector.load %arg5[%531, %c0_132, %c0_133] : memref<8x8x32xbf16, #tpu.memory_space<vmem>>, vector<1x8x32xbf16>
    %533 = vector.shape_cast %532 : vector<1x8x32xbf16> to vector<8x32xbf16>
    %534 = vector.shape_cast %530 : vector<8x32xbf16> to vector<1x8x32xbf16>
    tpu.vector_store %arg5[%531, %c0_132, %c0_133], %534 {strides = array<i32>} : memref<8x8x32xbf16, #tpu.memory_space<vmem>>, vector<1x8x32xbf16>,
    %535 = arith.truncf %529 : vector<8x32xf32> to vector<8x32xbf16>
    %c7_i32_134 = arith.constant 7 : i32
    %536 = arith.subi %c7_i32_134, %c6_i32 : i32
    %537 = arith.index_cast %536 : i32 to index
    %c0_135 = arith.constant 0 : index
    %c0_136 = arith.constant 0 : index
    %538 = vector.load %arg6[%537, %c0_135, %c0_136] : memref<8x8x32xbf16, #tpu.memory_space<vmem>>, vector<1x8x32xbf16>
    %539 = vector.shape_cast %538 : vector<1x8x32xbf16> to vector<8x32xbf16>
    %540 = vector.shape_cast %535 : vector<8x32xbf16> to vector<1x8x32xbf16>
    tpu.vector_store %arg6[%537, %c0_135, %c0_136], %540 {strides = array<i32>} : memref<8x8x32xbf16, #tpu.memory_space<vmem>>, vector<1x8x32xbf16>,
    %c7_i32_137 = arith.constant 7 : i32
    %541 = arith.truncf %504 : vector<8x32xf32> to vector<8x32xbf16>
    %cst_138 = arith.constant dense<0.000000e+00> : vector<8x128xf32>
    %542 = tpu.matmul %541, %3, %cst_138 {dimension_numbers = #tpu.dot_dimension_numbers<[1], [0], [0], [1], [0, 0, 1, 1], [], []>} : vector<8x32xbf16>, vector<32x128xbf16>, vector<8x128xf32> -> vector<8x128xf32>
    %543 = arith.truncf %529 : vector<8x32xf32> to vector<8x32xbf16>
    %cst_139 = arith.constant dense<0.000000e+00> : vector<8x128xf32>
    %544 = tpu.matmul %543, %4, %cst_139 {dimension_numbers = #tpu.dot_dimension_numbers<[1], [0], [0], [1], [0, 0, 1, 1], [], []>} : vector<8x32xbf16>, vector<32x128xbf16>, vector<8x128xf32> -> vector<8x128xf32>
    %545 = arith.index_cast %c7_i32_137 : i32 to index
    %c0_140 = arith.constant 0 : index
    %c0_141 = arith.constant 0 : index
    %546 = vector.load %arg1[%545, %c0_140, %c0_141] : memref<8x8x128xbf16, #tpu.memory_space<vmem>>, vector<1x8x128xbf16>
    %547 = vector.shape_cast %546 : vector<1x8x128xbf16> to vector<8x128xbf16>
    %548 = arith.extf %547 : vector<8x128xbf16> to vector<8x128xf32>
    %549 = arith.addf %548, %542 : vector<8x128xf32>
    %c7_i32_142 = arith.constant 7 : i32
    %550 = arith.subi %c7_i32_142, %c7_i32_137 : i32
    %551 = arith.index_cast %550 : i32 to index
    %c0_143 = arith.constant 0 : index
    %c0_144 = arith.constant 0 : index
    %552 = vector.load %arg2[%551, %c0_143, %c0_144] : memref<8x8x128xbf16, #tpu.memory_space<vmem>>, vector<1x8x128xbf16>
    %553 = vector.shape_cast %552 : vector<1x8x128xbf16> to vector<8x128xbf16>
    %554 = arith.extf %553 : vector<8x128xbf16> to vector<8x128xf32>
    %555 = arith.addf %554, %544 : vector<8x128xf32>
    %556 = vector.extract_strided_slice %549 {offsets = [0, 0], sizes = [8, 32], strides = [1, 1]} : vector<8x128xf32> to vector<8x32xf32>
    %557 = arith.negf %556 : vector<8x32xf32>
    %558 = math.exp %557 : vector<8x32xf32>
    %cst_145 = arith.constant 1.000000e+00 : f32
    %559 = vector.broadcast %cst_145 : f32 to vector<8x32xf32>
    %560 = arith.addf %559, %558 : vector<8x32xf32>
    %561 = arith.divf %559, %560 : vector<8x32xf32>
    %562 = vector.extract_strided_slice %549 {offsets = [0, 32], sizes = [8, 32], strides = [1, 1]} : vector<8x128xf32> to vector<8x32xf32>
    %563 = arith.negf %562 : vector<8x32xf32>
    %564 = math.exp %563 : vector<8x32xf32>
    %cst_146 = arith.constant 1.000000e+00 : f32
    %565 = vector.broadcast %cst_146 : f32 to vector<8x32xf32>
    %566 = arith.addf %565, %564 : vector<8x32xf32>
    %567 = arith.divf %565, %566 : vector<8x32xf32>
    %568 = vector.extract_strided_slice %549 {offsets = [0, 64], sizes = [8, 32], strides = [1, 1]} : vector<8x128xf32> to vector<8x32xf32>
    %569 = math.tanh %568 : vector<8x32xf32>
    %570 = vector.extract_strided_slice %549 {offsets = [0, 96], sizes = [8, 32], strides = [1, 1]} : vector<8x128xf32> to vector<8x32xf32>
    %571 = arith.negf %570 : vector<8x32xf32>
    %572 = math.exp %571 : vector<8x32xf32>
    %cst_147 = arith.constant 1.000000e+00 : f32
    %573 = vector.broadcast %cst_147 : f32 to vector<8x32xf32>
    %574 = arith.addf %573, %572 : vector<8x32xf32>
    %575 = arith.divf %573, %574 : vector<8x32xf32>
    %576 = arith.mulf %567, %502 : vector<8x32xf32>
    %577 = arith.mulf %561, %569 : vector<8x32xf32>
    %578 = arith.addf %576, %577 : vector<8x32xf32>
    %579 = math.tanh %578 : vector<8x32xf32>
    %580 = arith.mulf %575, %579 : vector<8x32xf32>
    %581 = vector.extract_strided_slice %555 {offsets = [0, 0], sizes = [8, 32], strides = [1, 1]} : vector<8x128xf32> to vector<8x32xf32>
    %582 = arith.negf %581 : vector<8x32xf32>
    %583 = math.exp %582 : vector<8x32xf32>
    %cst_148 = arith.constant 1.000000e+00 : f32
    %584 = vector.broadcast %cst_148 : f32 to vector<8x32xf32>
    %585 = arith.addf %584, %583 : vector<8x32xf32>
    %586 = arith.divf %584, %585 : vector<8x32xf32>
    %587 = vector.extract_strided_slice %555 {offsets = [0, 32], sizes = [8, 32], strides = [1, 1]} : vector<8x128xf32> to vector<8x32xf32>
    %588 = arith.negf %587 : vector<8x32xf32>
    %589 = math.exp %588 : vector<8x32xf32>
    %cst_149 = arith.constant 1.000000e+00 : f32
    %590 = vector.broadcast %cst_149 : f32 to vector<8x32xf32>
    %591 = arith.addf %590, %589 : vector<8x32xf32>
    %592 = arith.divf %590, %591 : vector<8x32xf32>
    %593 = vector.extract_strided_slice %555 {offsets = [0, 64], sizes = [8, 32], strides = [1, 1]} : vector<8x128xf32> to vector<8x32xf32>
    %594 = math.tanh %593 : vector<8x32xf32>
    %595 = vector.extract_strided_slice %555 {offsets = [0, 96], sizes = [8, 32], strides = [1, 1]} : vector<8x128xf32> to vector<8x32xf32>
    %596 = arith.negf %595 : vector<8x32xf32>
    %597 = math.exp %596 : vector<8x32xf32>
    %cst_150 = arith.constant 1.000000e+00 : f32
    %598 = vector.broadcast %cst_150 : f32 to vector<8x32xf32>
    %599 = arith.addf %598, %597 : vector<8x32xf32>
    %600 = arith.divf %598, %599 : vector<8x32xf32>
    %601 = arith.mulf %592, %527 : vector<8x32xf32>
    %602 = arith.mulf %586, %594 : vector<8x32xf32>
    %603 = arith.addf %601, %602 : vector<8x32xf32>
    %604 = math.tanh %603 : vector<8x32xf32>
    %605 = arith.mulf %600, %604 : vector<8x32xf32>
    %606 = arith.truncf %580 : vector<8x32xf32> to vector<8x32xbf16>
    %607 = arith.index_cast %c7_i32_137 : i32 to index
    %c0_151 = arith.constant 0 : index
    %c0_152 = arith.constant 0 : index
    %608 = vector.load %arg5[%607, %c0_151, %c0_152] : memref<8x8x32xbf16, #tpu.memory_space<vmem>>, vector<1x8x32xbf16>
    %609 = vector.shape_cast %608 : vector<1x8x32xbf16> to vector<8x32xbf16>
    %610 = vector.shape_cast %606 : vector<8x32xbf16> to vector<1x8x32xbf16>
    tpu.vector_store %arg5[%607, %c0_151, %c0_152], %610 {strides = array<i32>} : memref<8x8x32xbf16, #tpu.memory_space<vmem>>, vector<1x8x32xbf16>,
    %611 = arith.truncf %605 : vector<8x32xf32> to vector<8x32xbf16>
    %c7_i32_153 = arith.constant 7 : i32
    %612 = arith.subi %c7_i32_153, %c7_i32_137 : i32
    %613 = arith.index_cast %612 : i32 to index
    %c0_154 = arith.constant 0 : index
    %c0_155 = arith.constant 0 : index
    %614 = vector.load %arg6[%613, %c0_154, %c0_155] : memref<8x8x32xbf16, #tpu.memory_space<vmem>>, vector<1x8x32xbf16>
    %615 = vector.shape_cast %614 : vector<1x8x32xbf16> to vector<8x32xbf16>
    %616 = vector.shape_cast %611 : vector<8x32xbf16> to vector<1x8x32xbf16>
    tpu.vector_store %arg6[%613, %c0_154, %c0_155], %616 {strides = array<i32>} : memref<8x8x32xbf16, #tpu.memory_space<vmem>>, vector<1x8x32xbf16>,
    %c8_i32 = arith.constant 8 : i32
    %c0_156 = arith.constant 0 : index
    %c0_157 = arith.constant 0 : index
    %617 = vector.load %arg7[%c0_156, %c0_157] : memref<8x32xf32, #tpu.memory_space<vmem>>, vector<8x32xf32>
    tpu.vector_store %arg7[%c0_156, %c0_157], %580 {strides = array<i32>} : memref<8x32xf32, #tpu.memory_space<vmem>>, vector<8x32xf32>,
    %c0_158 = arith.constant 0 : index
    %c0_159 = arith.constant 0 : index
    %618 = vector.load %arg8[%c0_158, %c0_159] : memref<8x32xf32, #tpu.memory_space<vmem>>, vector<8x32xf32>
    tpu.vector_store %arg8[%c0_158, %c0_159], %578 {strides = array<i32>} : memref<8x32xf32, #tpu.memory_space<vmem>>, vector<8x32xf32>,
    %c0_160 = arith.constant 0 : index
    %c0_161 = arith.constant 0 : index
    %619 = vector.load %arg9[%c0_160, %c0_161] : memref<8x32xf32, #tpu.memory_space<vmem>>, vector<8x32xf32>
    tpu.vector_store %arg9[%c0_160, %c0_161], %605 {strides = array<i32>} : memref<8x32xf32, #tpu.memory_space<vmem>>, vector<8x32xf32>,
    %c0_162 = arith.constant 0 : index
    %c0_163 = arith.constant 0 : index
    %620 = vector.load %arg10[%c0_162, %c0_163] : memref<8x32xf32, #tpu.memory_space<vmem>>, vector<8x32xf32>
    tpu.vector_store %arg10[%c0_162, %c0_163], %603 {strides = array<i32>} : memref<8x32xf32, #tpu.memory_space<vmem>>, vector<8x32xf32>,
    return
  }
  func.func @transform_0(%arg0: i32) -> (i32, i32, i32) {
    %c0_i32 = arith.constant 0 : i32
    %c0_i32_0 = arith.constant 0 : i32
    %c0_i32_1 = arith.constant 0 : i32
    return %arg0, %c0_i32, %c0_i32_0 : i32, i32, i32
  }
  func.func @transform_1(%arg0: i32) -> (i32, i32, i32) {
    %c2_i32 = arith.constant 2 : i32
    %0 = arith.subi %c2_i32, %arg0 : i32
    %c0_i32 = arith.constant 0 : i32
    %c0_i32_0 = arith.constant 0 : i32
    %c0_i32_1 = arith.constant 0 : i32
    return %0, %c0_i32, %c0_i32_0 : i32, i32, i32
  }
  func.func @transform_2(%arg0: i32) -> (i32, i32) {
    %c0_i32 = arith.constant 0 : i32
    %c0_i32_0 = arith.constant 0 : i32
    %c0_i32_1 = arith.constant 0 : i32
    return %c0_i32, %c0_i32_0 : i32, i32
  }
  func.func @transform_3(%arg0: i32) -> (i32, i32) {
    %c0_i32 = arith.constant 0 : i32
    %c0_i32_0 = arith.constant 0 : i32
    %c0_i32_1 = arith.constant 0 : i32
    return %c0_i32, %c0_i32_0 : i32, i32
  }
  func.func @transform_4(%arg0: i32) -> (i32, i32, i32) {
    %c0_i32 = arith.constant 0 : i32
    %c0_i32_0 = arith.constant 0 : i32
    %c0_i32_1 = arith.constant 0 : i32
    return %arg0, %c0_i32, %c0_i32_0 : i32, i32, i32
  }
  func.func @transform_5(%arg0: i32) -> (i32, i32, i32) {
    %c2_i32 = arith.constant 2 : i32
    %0 = arith.subi %c2_i32, %arg0 : i32
    %c0_i32 = arith.constant 0 : i32
    %c0_i32_0 = arith.constant 0 : i32
    %c0_i32_1 = arith.constant 0 : i32
    return %0, %c0_i32, %c0_i32_0 : i32, i32, i32
  }
}

module attributes {stable_mosaic.version = 11 : i64} {
  func.func @_proj_kernel(%arg0: i32, %arg1: memref<80x32xbf16, #tpu.memory_space<vmem>>, %arg2: memref<80x32xbf16, #tpu.memory_space<vmem>>, %arg3: memref<32x128xbf16, #tpu.memory_space<vmem>>, %arg4: memref<32x128xbf16, #tpu.memory_space<vmem>>, %arg5: memref<1x128xf32, #tpu.memory_space<vmem>>, %arg6: memref<80x128xbf16, #tpu.memory_space<vmem>>) attributes {dimension_semantics = [#tpu.dimension_semantics<parallel>], iteration_bounds = array<i64: 2>, scalar_prefetch = 0 : i64, scratch_operands = 0 : i64, tpu.core_type = #tpu.core_type<tc>, window_params = [{transform_indices = @transform_0, window_bounds = array<i64: 80, 32>}, {transform_indices = @transform_1, window_bounds = array<i64: 80, 32>}, {pipeline_mode = #tpu.pipeline_mode<synchronous>, transform_indices = @transform_2, window_bounds = array<i64: 32, 128>}, {pipeline_mode = #tpu.pipeline_mode<synchronous>, transform_indices = @transform_3, window_bounds = array<i64: 32, 128>}, {pipeline_mode = #tpu.pipeline_mode<synchronous>, transform_indices = @transform_4, window_bounds = array<i64: 1, 128>}, {transform_indices = @transform_5, window_bounds = array<i64: 80, 128>}]} {
    %c0 = arith.constant 0 : index
    %c0_0 = arith.constant 0 : index
    %0 = vector.load %arg1[%c0, %c0_0] : memref<80x32xbf16, #tpu.memory_space<vmem>>, vector<80x32xbf16>
    %c0_1 = arith.constant 0 : index
    %c0_2 = arith.constant 0 : index
    %1 = vector.load %arg3[%c0_1, %c0_2] : memref<32x128xbf16, #tpu.memory_space<vmem>>, vector<32x128xbf16>
    %cst = arith.constant dense<0.000000e+00> : vector<80x128xf32>
    %2 = tpu.matmul %0, %1, %cst {dimension_numbers = #tpu.dot_dimension_numbers<[1], [0], [0], [1], [0, 0, 1, 1], [], []>} : vector<80x32xbf16>, vector<32x128xbf16>, vector<80x128xf32> -> vector<80x128xf32>
    %c0_3 = arith.constant 0 : index
    %c0_4 = arith.constant 0 : index
    %3 = vector.load %arg2[%c0_3, %c0_4] : memref<80x32xbf16, #tpu.memory_space<vmem>>, vector<80x32xbf16>
    %c0_5 = arith.constant 0 : index
    %c0_6 = arith.constant 0 : index
    %4 = vector.load %arg4[%c0_5, %c0_6] : memref<32x128xbf16, #tpu.memory_space<vmem>>, vector<32x128xbf16>
    %cst_7 = arith.constant dense<0.000000e+00> : vector<80x128xf32>
    %5 = tpu.matmul %3, %4, %cst_7 {dimension_numbers = #tpu.dot_dimension_numbers<[1], [0], [0], [1], [0, 0, 1, 1], [], []>} : vector<80x32xbf16>, vector<32x128xbf16>, vector<80x128xf32> -> vector<80x128xf32>
    %6 = arith.addf %2, %5 : vector<80x128xf32>
    %c0_8 = arith.constant 0 : index
    %c0_9 = arith.constant 0 : index
    %7 = vector.load %arg5[%c0_8, %c0_9] : memref<1x128xf32, #tpu.memory_space<vmem>>, vector<1x128xf32>
    %8 = vector.broadcast %7 : vector<1x128xf32> to vector<80x128xf32>
    %9 = arith.addf %6, %8 : vector<80x128xf32>
    %10 = arith.truncf %9 : vector<80x128xf32> to vector<80x128xbf16>
    %c0_10 = arith.constant 0 : index
    %c0_11 = arith.constant 0 : index
    %11 = vector.load %arg6[%c0_10, %c0_11] : memref<80x128xbf16, #tpu.memory_space<vmem>>, vector<80x128xbf16>
    tpu.vector_store %arg6[%c0_10, %c0_11], %10 {strides = array<i32>} : memref<80x128xbf16, #tpu.memory_space<vmem>>, vector<80x128xbf16>,
    return
  }
  func.func @transform_0(%arg0: i32) -> (i32, i32) {
    %c0_i32 = arith.constant 0 : i32
    %c0_i32_0 = arith.constant 0 : i32
    return %arg0, %c0_i32 : i32, i32
  }
  func.func @transform_1(%arg0: i32) -> (i32, i32) {
    %c0_i32 = arith.constant 0 : i32
    %c0_i32_0 = arith.constant 0 : i32
    return %arg0, %c0_i32 : i32, i32
  }
  func.func @transform_2(%arg0: i32) -> (i32, i32) {
    %c0_i32 = arith.constant 0 : i32
    %c0_i32_0 = arith.constant 0 : i32
    %c0_i32_1 = arith.constant 0 : i32
    return %c0_i32, %c0_i32_0 : i32, i32
  }
  func.func @transform_3(%arg0: i32) -> (i32, i32) {
    %c0_i32 = arith.constant 0 : i32
    %c0_i32_0 = arith.constant 0 : i32
    %c0_i32_1 = arith.constant 0 : i32
    return %c0_i32, %c0_i32_0 : i32, i32
  }
  func.func @transform_4(%arg0: i32) -> (i32, i32) {
    %c0_i32 = arith.constant 0 : i32
    %c0_i32_0 = arith.constant 0 : i32
    %c0_i32_1 = arith.constant 0 : i32
    return %c0_i32, %c0_i32_0 : i32, i32
  }
  func.func @transform_5(%arg0: i32) -> (i32, i32) {
    %c0_i32 = arith.constant 0 : i32
    %c0_i32_0 = arith.constant 0 : i32
    return %arg0, %c0_i32 : i32, i32
  }
}

module attributes {stable_mosaic.version = 11 : i64} {
  func.func @_head_lse_kernel(%arg0: i32, %arg1: i32, %arg2: memref<80x32xbf16, #tpu.memory_space<vmem>>, %arg3: memref<80x32xbf16, #tpu.memory_space<vmem>>, %arg4: memref<32x128xbf16, #tpu.memory_space<vmem>>, %arg5: memref<32x128xbf16, #tpu.memory_space<vmem>>, %arg6: memref<1x128xf32, #tpu.memory_space<vmem>>, %arg7: memref<80x128xf32, #tpu.memory_space<vmem>>, %arg8: memref<80x1xf32, #tpu.memory_space<vmem>>, %arg9: memref<80x1xf32, #tpu.memory_space<vmem>>, %arg10: memref<80x1xf32, #tpu.memory_space<vmem>>) attributes {dimension_semantics = [#tpu.dimension_semantics<parallel>, #tpu.dimension_semantics<arbitrary>], iteration_bounds = array<i64: 2, 3>, scalar_prefetch = 0 : i64, scratch_operands = 2 : i64, tpu.core_type = #tpu.core_type<tc>, window_params = [{transform_indices = @transform_0, window_bounds = array<i64: 80, 32>}, {transform_indices = @transform_1, window_bounds = array<i64: 80, 32>}, {transform_indices = @transform_2, window_bounds = array<i64: 32, 128>}, {transform_indices = @transform_3, window_bounds = array<i64: 32, 128>}, {transform_indices = @transform_4, window_bounds = array<i64: 1, 128>}, {transform_indices = @transform_5, window_bounds = array<i64: 80, 128>}, {transform_indices = @transform_6, window_bounds = array<i64: 80, 1>}]} {
    %c0_i32 = arith.constant 0 : i32
    %0 = arith.cmpi eq, %arg1, %c0_i32 : i32
    %1 = arith.extui %0 : i1 to i32
    %c0_i32_0 = arith.constant 0 : i32
    %2 = arith.cmpi ne, %1, %c0_i32_0 : i32
    scf.if %2 {
      %cst_24 = arith.constant 0xFF800000 : f32
      %33 = vector.broadcast %cst_24 : f32 to vector<80x1xf32>
      %c0_25 = arith.constant 0 : index
      %c0_26 = arith.constant 0 : index
      %34 = vector.load %arg9[%c0_25, %c0_26] : memref<80x1xf32, #tpu.memory_space<vmem>>, vector<80x1xf32>
      tpu.vector_store %arg9[%c0_25, %c0_26], %33 {strides = array<i32>} : memref<80x1xf32, #tpu.memory_space<vmem>>, vector<80x1xf32>,
      %cst_27 = arith.constant 0.000000e+00 : f32
      %35 = vector.broadcast %cst_27 : f32 to vector<80x1xf32>
      %c0_28 = arith.constant 0 : index
      %c0_29 = arith.constant 0 : index
      %36 = vector.load %arg10[%c0_28, %c0_29] : memref<80x1xf32, #tpu.memory_space<vmem>>, vector<80x1xf32>
      tpu.vector_store %arg10[%c0_28, %c0_29], %35 {strides = array<i32>} : memref<80x1xf32, #tpu.memory_space<vmem>>, vector<80x1xf32>,
    } else {
    }
    %c0 = arith.constant 0 : index
    %c0_1 = arith.constant 0 : index
    %3 = vector.load %arg2[%c0, %c0_1] : memref<80x32xbf16, #tpu.memory_space<vmem>>, vector<80x32xbf16>
    %c0_2 = arith.constant 0 : index
    %c0_3 = arith.constant 0 : index
    %4 = vector.load %arg4[%c0_2, %c0_3] : memref<32x128xbf16, #tpu.memory_space<vmem>>, vector<32x128xbf16>
    %cst = arith.constant dense<0.000000e+00> : vector<80x128xf32>
    %5 = tpu.matmul %3, %4, %cst {dimension_numbers = #tpu.dot_dimension_numbers<[1], [0], [0], [1], [0, 0, 1, 1], [], []>} : vector<80x32xbf16>, vector<32x128xbf16>, vector<80x128xf32> -> vector<80x128xf32>
    %c0_4 = arith.constant 0 : index
    %c0_5 = arith.constant 0 : index
    %6 = vector.load %arg3[%c0_4, %c0_5] : memref<80x32xbf16, #tpu.memory_space<vmem>>, vector<80x32xbf16>
    %c0_6 = arith.constant 0 : index
    %c0_7 = arith.constant 0 : index
    %7 = vector.load %arg5[%c0_6, %c0_7] : memref<32x128xbf16, #tpu.memory_space<vmem>>, vector<32x128xbf16>
    %cst_8 = arith.constant dense<0.000000e+00> : vector<80x128xf32>
    %8 = tpu.matmul %6, %7, %cst_8 {dimension_numbers = #tpu.dot_dimension_numbers<[1], [0], [0], [1], [0, 0, 1, 1], [], []>} : vector<80x32xbf16>, vector<32x128xbf16>, vector<80x128xf32> -> vector<80x128xf32>
    %9 = arith.addf %5, %8 : vector<80x128xf32>
    %c0_9 = arith.constant 0 : index
    %c0_10 = arith.constant 0 : index
    %10 = vector.load %arg6[%c0_9, %c0_10] : memref<1x128xf32, #tpu.memory_space<vmem>>, vector<1x128xf32>
    %11 = vector.broadcast %10 : vector<1x128xf32> to vector<80x128xf32>
    %12 = arith.addf %9, %11 : vector<80x128xf32>
    %c0_11 = arith.constant 0 : index
    %c0_12 = arith.constant 0 : index
    %13 = vector.load %arg7[%c0_11, %c0_12] : memref<80x128xf32, #tpu.memory_space<vmem>>, vector<80x128xf32>
    tpu.vector_store %arg7[%c0_11, %c0_12], %12 {strides = array<i32>} : memref<80x128xf32, #tpu.memory_space<vmem>>, vector<80x128xf32>,
    %c0_13 = arith.constant 0 : index
    %c0_14 = arith.constant 0 : index
    %14 = vector.load %arg9[%c0_13, %c0_14] : memref<80x1xf32, #tpu.memory_space<vmem>>, vector<80x1xf32>
    %cst_15 = arith.constant dense<0xFF800000> : vector<80xf32>
    %15 = vector.multi_reduction <maximumf>, %12, %cst_15 [1] : vector<80x128xf32> to vector<80xf32>
    %16 = vector.shape_cast %15 : vector<80xf32> to vector<80x1xf32>
    %17 = arith.maximumf %14, %16 : vector<80x1xf32>
    %18 = arith.subf %14, %17 : vector<80x1xf32>
    %19 = math.exp %18 : vector<80x1xf32>
    %c0_16 = arith.constant 0 : index
    %c0_17 = arith.constant 0 : index
    %20 = vector.load %arg10[%c0_16, %c0_17] : memref<80x1xf32, #tpu.memory_space<vmem>>, vector<80x1xf32>
    %21 = arith.mulf %19, %20 : vector<80x1xf32>
    %22 = vector.broadcast %17 : vector<80x1xf32> to vector<80x128xf32>
    %23 = arith.subf %12, %22 : vector<80x128xf32>
    %24 = math.exp %23 : vector<80x128xf32>
    %cst_18 = arith.constant dense<0.000000e+00> : vector<80xf32>
    %25 = vector.multi_reduction <add>, %24, %cst_18 [1] : vector<80x128xf32> to vector<80xf32>
    %26 = vector.shape_cast %25 : vector<80xf32> to vector<80x1xf32>
    %27 = arith.addf %21, %26 : vector<80x1xf32>
    %c0_19 = arith.constant 0 : index
    %c0_20 = arith.constant 0 : index
    %28 = vector.load %arg10[%c0_19, %c0_20] : memref<80x1xf32, #tpu.memory_space<vmem>>, vector<80x1xf32>
    tpu.vector_store %arg10[%c0_19, %c0_20], %27 {strides = array<i32>} : memref<80x1xf32, #tpu.memory_space<vmem>>, vector<80x1xf32>,
    %c0_21 = arith.constant 0 : index
    %c0_22 = arith.constant 0 : index
    %29 = vector.load %arg9[%c0_21, %c0_22] : memref<80x1xf32, #tpu.memory_space<vmem>>, vector<80x1xf32>
    tpu.vector_store %arg9[%c0_21, %c0_22], %17 {strides = array<i32>} : memref<80x1xf32, #tpu.memory_space<vmem>>, vector<80x1xf32>,
    %c2_i32 = arith.constant 2 : i32
    %30 = arith.cmpi eq, %arg1, %c2_i32 : i32
    %31 = arith.extui %30 : i1 to i32
    %c0_i32_23 = arith.constant 0 : i32
    %32 = arith.cmpi ne, %31, %c0_i32_23 : i32
    scf.if %32 {
      %c0_24 = arith.constant 0 : index
      %c0_25 = arith.constant 0 : index
      %33 = vector.load %arg9[%c0_24, %c0_25] : memref<80x1xf32, #tpu.memory_space<vmem>>, vector<80x1xf32>
      %c0_26 = arith.constant 0 : index
      %c0_27 = arith.constant 0 : index
      %34 = vector.load %arg10[%c0_26, %c0_27] : memref<80x1xf32, #tpu.memory_space<vmem>>, vector<80x1xf32>
      %35 = math.log %34 : vector<80x1xf32>
      %36 = arith.addf %33, %35 : vector<80x1xf32>
      %c0_28 = arith.constant 0 : index
      %c0_29 = arith.constant 0 : index
      %37 = vector.load %arg8[%c0_28, %c0_29] : memref<80x1xf32, #tpu.memory_space<vmem>>, vector<80x1xf32>
      tpu.vector_store %arg8[%c0_28, %c0_29], %36 {strides = array<i32>} : memref<80x1xf32, #tpu.memory_space<vmem>>, vector<80x1xf32>,
    } else {
    }
    return
  }
  func.func @transform_0(%arg0: i32, %arg1: i32) -> (i32, i32) {
    %c0_i32 = arith.constant 0 : i32
    %c0_i32_0 = arith.constant 0 : i32
    return %arg0, %c0_i32 : i32, i32
  }
  func.func @transform_1(%arg0: i32, %arg1: i32) -> (i32, i32) {
    %c0_i32 = arith.constant 0 : i32
    %c0_i32_0 = arith.constant 0 : i32
    return %arg0, %c0_i32 : i32, i32
  }
  func.func @transform_2(%arg0: i32, %arg1: i32) -> (i32, i32) {
    %c0_i32 = arith.constant 0 : i32
    %c0_i32_0 = arith.constant 0 : i32
    return %c0_i32, %arg1 : i32, i32
  }
  func.func @transform_3(%arg0: i32, %arg1: i32) -> (i32, i32) {
    %c0_i32 = arith.constant 0 : i32
    %c0_i32_0 = arith.constant 0 : i32
    return %c0_i32, %arg1 : i32, i32
  }
  func.func @transform_4(%arg0: i32, %arg1: i32) -> (i32, i32) {
    %c0_i32 = arith.constant 0 : i32
    %c0_i32_0 = arith.constant 0 : i32
    return %c0_i32, %arg1 : i32, i32
  }
  func.func @transform_5(%arg0: i32, %arg1: i32) -> (i32, i32) {
    %c0_i32 = arith.constant 0 : i32
    return %arg0, %arg1 : i32, i32
  }
  func.func @transform_6(%arg0: i32, %arg1: i32) -> (i32, i32) {
    %c0_i32 = arith.constant 0 : i32
    %c0_i32_0 = arith.constant 0 : i32
    return %arg0, %c0_i32 : i32, i32
  }
}

module attributes {stable_mosaic.version = 11 : i64} {
  func.func @_head_norm_kernel(%arg0: i32, %arg1: i32, %arg2: memref<80x128xf32, #tpu.memory_space<vmem>>, %arg3: memref<80x1xf32, #tpu.memory_space<vmem>>, %arg4: memref<80x128xf32, #tpu.memory_space<vmem>>) attributes {dimension_semantics = [#tpu.dimension_semantics<parallel>, #tpu.dimension_semantics<parallel>], iteration_bounds = array<i64: 2, 3>, scalar_prefetch = 0 : i64, scratch_operands = 0 : i64, tpu.core_type = #tpu.core_type<tc>, window_params = [{transform_indices = @transform_0, window_bounds = array<i64: 80, 128>}, {transform_indices = @transform_1, window_bounds = array<i64: 80, 1>}, {transform_indices = @transform_2, window_bounds = array<i64: 80, 128>}]} {
    %c0 = arith.constant 0 : index
    %c0_0 = arith.constant 0 : index
    %0 = vector.load %arg2[%c0, %c0_0] : memref<80x128xf32, #tpu.memory_space<vmem>>, vector<80x128xf32>
    %c0_1 = arith.constant 0 : index
    %c0_2 = arith.constant 0 : index
    %1 = vector.load %arg3[%c0_1, %c0_2] : memref<80x1xf32, #tpu.memory_space<vmem>>, vector<80x1xf32>
    %2 = vector.broadcast %1 : vector<80x1xf32> to vector<80x128xf32>
    %3 = arith.subf %0, %2 : vector<80x128xf32>
    %c0_3 = arith.constant 0 : index
    %c0_4 = arith.constant 0 : index
    %4 = vector.load %arg4[%c0_3, %c0_4] : memref<80x128xf32, #tpu.memory_space<vmem>>, vector<80x128xf32>
    tpu.vector_store %arg4[%c0_3, %c0_4], %3 {strides = array<i32>} : memref<80x128xf32, #tpu.memory_space<vmem>>, vector<80x128xf32>,
    return
  }
  func.func @transform_0(%arg0: i32, %arg1: i32) -> (i32, i32) {
    %c0_i32 = arith.constant 0 : i32
    return %arg0, %arg1 : i32, i32
  }
  func.func @transform_1(%arg0: i32, %arg1: i32) -> (i32, i32) {
    %c0_i32 = arith.constant 0 : i32
    %c0_i32_0 = arith.constant 0 : i32
    return %arg0, %c0_i32 : i32, i32
  }
  func.func @transform_2(%arg0: i32, %arg1: i32) -> (i32, i32) {
    %c0_i32 = arith.constant 0 : i32
    return %arg0, %arg1 : i32, i32
  }
}

</mosaic_0001>

<bundles_post_ra>
// kernel: language_model_forward.9
= control target key start
LH: loop header
LB: loop body
LE: loop exit
PB: predicated region body
PF: predicated region fallthrough
CT: control target
= control target key end

     0   :  { %s581_s12 = smov 0   ;;  %s619_s0 = inlined_call_operand.vmem [shape: bf16[160,32], index: 0, kind: input, shape index: {}]   ;;  %s620_s1 = inlined_call_operand.vmem [shape: bf16[32,128], index: 1, kind: input, shape index: {}]   ;;  %s621_s2 = inlined_call_operand.vmem [shape: f32[1,128], index: 2, kind: input, shape index: {}]   ;;  %s622_s3 = inlined_call_operand.vmem [shape: bf16[160,128], index: 3, kind: output, shape index: {}]  }
   0x1 LB: > { %s428_s13 = sadd.s32 4294967295, %s557_s12   ;;  %p432_p0 = scmp.ge.s32.totalorder %s557_s12, 1  ;;  %s557_s12 = sphi %s581_s12, %s13_s12  }
   0x2   : > { %p138_p1 = scmp.lt.s32.totalorder %s557_s12, 3 }
   0x4   : > { %p139_p2 = pnand %p432_p0, %p138_p1 }
   0x5   : > { %s162_s18 = smul.u32 (!%p139_p2), 10, %s428_s13 }
   0x6   : > { %142 = sbr.rel (%p139_p2) target bundleno = 238 (0xee), region = 32 }
   0x7   : > { %p163_p3 = scmp.lt.s32.totalorder (!%p139_p2), %s162_s18, 19 }
   0xb   : > { %v544_v0 = vld [vmem:[%s620_s1 + $0x8] sm:$0xff]   ;;  %v559_v1 = vmov 0.0   ;;  %v545_v2 = vld [vmem:[%s620_s1] sm:$0xff]   ;;  %vm560_vm0 = vmmov 0   ;;  %s624_s18 = smov (!%p163_p3, %s162_s18), 19  ;;  %vm233_vm1 = vcmask 261120  }
   0xc   : > { %506 = vmatprep.subr.bf16.mxu0 %v559_v1  ;;  %530 = vmatprep.subr.bf16.mxu1 %v559_v1  ;;  %s433_s19 = sshll.u32 %s624_s18, 2  ;;  %v435_v10 = vld [vmem:[%s621_s2] ss:$0 sm:$0xff] }
   0xd   : > { %507 = vmatpush3.bf16.msra.mxu0 %v544_v0  ;;  %532 = vmatpush3.bf16.msra.mxu1 %v544_v0  ;;  %s166_s22 = scalar_lea.vmem %s619_s0, %s433_s19  ;;  %s609_s27 = scalar_lea.vmem %s622_s3, %s433_s19 }
   0xe   : > { %508 = vmatprep.subr.bf16.mxu0 %v559_v1  ;;  %531 = vmatprep.subr.bf16.mxu1 %v559_v1  ;;  %v546_v3 = vld [vmem:[%s166_s22] sm:$0xff]   ;;  %v547_v4 = vld [vmem:[%s166_s22 + $0x18] sm:$0xff]   ;;  %v548_v5 = vld [vmem:[%s166_s22 + $0x8] sm:$0xff]  }
   0xf   : > { %510 = vmatprep.mubr.msk.bf16.mxu0 %vm560_vm0, %v559_v1  ;;  %522 = vmatprep.mubr.msk.bf16.mxu1 %vm560_vm0, %v559_v1  ;;  %v549_v6 = vld [vmem:[%s166_s22 + $0x20] sm:$0xff]   ;;  %v550_v7 = vld [vmem:[%s166_s22 + $0x10] sm:$0xff]  }
  0x11   : > { %509 = vmatpush3.bf16.msra.mxu0 %v545_v2  ;;  %533 = vmatpush3.bf16.msra.mxu1 %v545_v2 }
  0x14   : > { %511 = vmatmul.mubr.msk.bf16.vlgmr.msra.gmra.mxu0 %vm233_vm1, %v546_v3  ;;  %523 = vmatmul.mubr.msk.bf16.vlgmr.msra.gmra.mxu1 %vm233_vm1, %v547_v4 }
  0x15   : > { %514 = vmatprep.mubr.msk.bf16.mxu0 %vm560_vm0, %v559_v1  ;;  %526 = vmatprep.mubr.msk.bf16.mxu1 %vm560_vm0, %v559_v1 }
  0x1c   : > { %515 = vmatmul.mubr.msk.bf16.gmra.mxu0 %vm233_vm1, %v548_v5  ;;  %527 = vmatmul.mubr.msk.bf16.gmra.mxu1 %vm233_vm1, %v549_v6 }
  0x1d   : > { %518 = vmatprep.mubr.msk.bf16.mxu0 %vm560_vm0, %v559_v1 }
  0x24   : > { %519 = vmatmul.mubr.msk.bf16.gmra.mxu0 %vm233_vm1, %v550_v7 }
  0xd4   : > { %v283_v8 = vpop.f32.mrf.mxu0  ;;  %v307_v9 = vpop.f32.mrf.mxu1 }
  0xd5   : > { %v308_v13 = vadd.f32 %v435_v10, %v307_v9  ;;  %v284_v15 = vadd.f32 %v435_v10, %v283_v8 }
  0xd6   : > { %v512_v11 = vpop.f32.mrf.mxu0  ;;  %v524_v12 = vpop.f32.mrf.mxu1 }
  0xd8   : > { %v286_v14 = vpop.f32.mrf.mxu0  ;;  %v310_v17 = vpop.f32.mrf.mxu1 }
  0xd9   : > { %v287_v16 = vadd.f32 %v435_v10, %v286_v14  ;;  %v311_v19 = vadd.f32 %v435_v10, %v310_v17 }
  0xda   : > { %v513_v18 = vpop.f32.mrf.mxu0  ;;  %v525_v21 = vpop.f32.mrf.mxu1 }
  0xdb   : > { %v473_v20 = vpack.c.bf16 %v287_v16, %v284_v15  ;;  %v488_v22 = vpack.c.bf16 %v311_v19, %v308_v13 }
  0xdc   : > { %v291_v23 = vpop.f32.mrf.mxu0  ;;  %v315_v24 = vpop.f32.mrf.mxu1 }
  0xdd   : > { %474 = vst [vmem:[%s609_s27] sm:$0xff] %v473_v20   ;;  %497 = vst [vmem:[%s609_s27 + $0x18] sm:$0xff] %v488_v22   ;;  %v316_v27 = vadd.f32 %v435_v10, %v315_v24  ;;  %v292_v29 = vadd.f32 %v435_v10, %v291_v23 }
  0xde   : > { %v516_v25 = vpop.f32.mrf.mxu0  ;;  %v528_v26 = vpop.f32.mrf.mxu1 }
  0xe0   : > { %v294_v28 = vpop.f32.mrf.mxu0  ;;  %v318_v31 = vpop.f32.mrf.mxu1 }
  0xe1   : > { %v295_v30 = vadd.f32 %v435_v10, %v294_v28  ;;  %v319_v33 = vadd.f32 %v435_v10, %v318_v31 }
  0xe2   : > { %v517_v32 = vpop.f32.mrf.mxu0  ;;  %v529_v35 = vpop.f32.mrf.mxu1 }
  0xe3   : > { %v478_v34 = vpack.c.bf16 %v295_v30, %v292_v29  ;;  %v493_v36 = vpack.c.bf16 %v319_v33, %v316_v27 }
  0xe4   : > { %v299_v37 = vpop.f32.mrf.mxu0 }
  0xe5   : > { %495 = vst [vmem:[%s609_s27 + $0x8] sm:$0xff] %v478_v34   ;;  %498 = vst [vmem:[%s609_s27 + $0x20] sm:$0xff] %v493_v36   ;;  %v300_v40 = vadd.f32 %v435_v10, %v299_v37 }
  0xe6   : > { %v520_v38 = vpop.f32.mrf.mxu0 }
  0xe8   : > { %v302_v39 = vpop.f32.mrf.mxu0 }
  0xe9   : > { %v303_v41 = vadd.f32 %v435_v10, %v302_v39 }
  0xea   : > { %v521_v42 = vpop.f32.mrf.mxu0 }
  0xeb   : > { %v483_v43 = vpack.c.bf16 %v303_v41, %v300_v40 }
  0xed   : > { %496 = vst [vmem:[%s609_s27 + $0x10] sm:$0xff] %v483_v43  }
  0xee PF: > { %s13_s12 = sadd.s32 1, %s557_s12  }
  0xef   : > { %p10_p4 = scmp.ge.s32.totalorder %s13_s12, 4  }
  0xf1   :  { %12 = sbr.rel (!%p10_p4) target bundleno = 1 (0x1), region = 62 }

// kernel: language_model_forward.12
= control target key start
LH: loop header
LB: loop body
LE: loop exit
PB: predicated region body
PF: predicated region fallthrough
CT: control target
= control target key end

     0   :  { %s875_s18 = smov 0   ;;  %s954_s0 = inlined_call_operand.vmem [shape: bf16[160,32], index: 0, kind: input, shape index: {}]   ;;  %s955_s1 = inlined_call_operand.vmem [shape: bf16[160,32], index: 1, kind: input, shape index: {}]   ;;  %s956_s2 = inlined_call_operand.vmem [shape: bf16[32,128], index: 2, kind: input, shape index: {}]   ;;  %s957_s3 = inlined_call_operand.vmem [shape: bf16[32,128], index: 3, kind: input, shape index: {}]   ;;  %s958_s4 = inlined_call_operand.vmem [shape: f32[1,128], index: 4, kind: input, shape index: {}]   ;;  %s959_s5 = inlined_call_operand.vmem [shape: bf16[160,128], index: 5, kind: output, shape index: {}]  }
   0x1 LB: > { %s665_s19 = sadd.s32 4294967295, %s841_s18   ;;  %p669_p0 = scmp.ge.s32.totalorder %s841_s18, 1  ;;  %s841_s18 = sphi %s875_s18, %s15_s18  }
   0x2   : > { %p199_p1 = scmp.lt.s32.totalorder %s841_s18, 3 }
   0x4   : > { %p200_p2 = pnand %p669_p0, %p199_p1 }
   0x5   : > { %s232_s26 = smul.u32 (!%p200_p2), 10, %s665_s19 }
   0x6   : > { %203 = sbr.rel (%p200_p2) target bundleno = 257 (0x101), region = 40 }
   0x7   : > { %p233_p3 = scmp.lt.s32.totalorder (!%p200_p2), %s232_s26, 19 }
   0xb   : > { %v821_v0 = vld [vmem:[%s957_s3 + $0x8] sm:$0xff]   ;;  %v843_v1 = vmov 0.0   ;;  %v823_v3 = vld [vmem:[%s957_s3] sm:$0xff]   ;;  %vm844_vm0 = vmmov 0   ;;  %s961_s26 = smov (!%p233_p3, %s232_s26), 19  ;;  %vm316_vm1 = vcmask 261120  }
   0xc   : > { %763 = vmatprep.subr.bf16.mxu0 %v843_v1  ;;  %787 = vmatprep.subr.bf16.mxu1 %v843_v1  ;;  %v822_v2 = vld [vmem:[%s956_s2 + $0x8] sm:$0xff]   ;;  %v824_v4 = vld [vmem:[%s956_s2] sm:$0xff]   ;;  %s897_s29 = sshll.u32 %s961_s26, 2 }
   0xd   : > { %764 = vmatpush3.bf16.msra.mxu0 %v821_v0  ;;  %767 = vmatprep.mubr.msk.bf16.mxu0 %vm844_vm0, %v843_v1  ;;  %s242_s7 = scalar_lea.vmem %s955_s1, %s897_s29  ;;  %s236_s10 = scalar_lea.vmem %s954_s0, %s897_s29  ;;  %v928_v21 = vld [vmem:[%s958_s4] ss:$0 sm:$0xff] }
   0xe   : > { %788 = vmatpush3.bf16.msra.mxu1 %v822_v2  ;;  %765 = vmatprep.subr.bf16.mxu0 %v843_v1  ;;  %v825_v5 = vld [vmem:[%s242_s7] sm:$0xff]   ;;  %v827_v7 = vld [vmem:[%s242_s7 + $0x8] sm:$0xff]   ;;  %v829_v9 = vld [vmem:[%s242_s7 + $0x10] sm:$0xff]   ;;  %s936_s15 = scalar_lea.vmem %s959_s5, %s897_s29 }
   0xf   : > { %789 = vmatprep.subr.bf16.mxu1 %v843_v1  ;;  %791 = vmatprep.mubr.msk.bf16.mxu1 %vm844_vm0, %v843_v1  ;;  %v826_v6 = vld [vmem:[%s236_s10] sm:$0xff]   ;;  %v828_v8 = vld [vmem:[%s236_s10 + $0x8] sm:$0xff]   ;;  %v830_v10 = vld [vmem:[%s236_s10 + $0x10] sm:$0xff]  }
  0x10   : > { %v831_v11 = vld [vmem:[%s242_s7 + $0x18] sm:$0xff]   ;;  %v833_v13 = vld [vmem:[%s242_s7 + $0x20] sm:$0xff]  }
  0x11   : > { %766 = vmatpush3.bf16.msra.mxu0 %v823_v3  ;;  %v832_v12 = vld [vmem:[%s236_s10 + $0x18] sm:$0xff]   ;;  %v834_v14 = vld [vmem:[%s236_s10 + $0x20] sm:$0xff]  }
  0x12   : > { %790 = vmatpush3.bf16.msra.mxu1 %v824_v4 }
  0x14   : > { %768 = vmatmul.mubr.msk.bf16.vlgmr.msra.gmra.mxu0 %vm316_vm1, %v825_v5 }
  0x15   : > { %792 = vmatmul.mubr.msk.bf16.vlgmr.msra.gmra.mxu1 %vm316_vm1, %v826_v6  ;;  %771 = vmatprep.mubr.msk.bf16.mxu0 %vm844_vm0, %v843_v1 }
  0x16   : > { %795 = vmatprep.mubr.msk.bf16.mxu1 %vm844_vm0, %v843_v1 }
  0x1c   : > { %772 = vmatmul.mubr.msk.bf16.gmra.mxu0 %vm316_vm1, %v827_v7 }
  0x1d   : > { %796 = vmatmul.mubr.msk.bf16.gmra.mxu1 %vm316_vm1, %v828_v8  ;;  %775 = vmatprep.mubr.msk.bf16.mxu0 %vm844_vm0, %v843_v1 }
  0x1e   : > { %799 = vmatprep.mubr.msk.bf16.mxu1 %vm844_vm0, %v843_v1 }
  0x24   : > { %776 = vmatmul.mubr.msk.bf16.gmra.mxu0 %vm316_vm1, %v829_v9 }
  0x25   : > { %800 = vmatmul.mubr.msk.bf16.gmra.mxu1 %vm316_vm1, %v830_v10  ;;  %779 = vmatprep.mubr.msk.bf16.mxu0 %vm844_vm0, %v843_v1 }
  0x26   : > { %803 = vmatprep.mubr.msk.bf16.mxu1 %vm844_vm0, %v843_v1 }
  0x2c   : > { %780 = vmatmul.mubr.msk.bf16.gmra.mxu0 %vm316_vm1, %v831_v11 }
  0x2d   : > { %804 = vmatmul.mubr.msk.bf16.gmra.mxu1 %vm316_vm1, %v832_v12  ;;  %783 = vmatprep.mubr.msk.bf16.mxu0 %vm844_vm0, %v843_v1 }
  0x2e   : > { %807 = vmatprep.mubr.msk.bf16.mxu1 %vm844_vm0, %v843_v1 }
  0x34   : > { %784 = vmatmul.mubr.msk.bf16.gmra.mxu0 %vm316_vm1, %v833_v13 }
  0x35   : > { %808 = vmatmul.mubr.msk.bf16.gmra.mxu1 %vm316_vm1, %v834_v14 }
  0xd4   : > { %v366_v15 = vpop.f32.mrf.mxu0 }
  0xd5   : > { %v491_v16 = vpop.f32.mrf.mxu1 }
  0xd6   : > { %v769_v17 = vpop.f32.mrf.mxu0  ;;  %v492_v19 = vadd.f32 %v491_v16, %v366_v15 }
  0xd7   : > { %v793_v18 = vpop.f32.mrf.mxu1 }
  0xd8   : > { %v369_v20 = vpop.f32.mrf.mxu0  ;;  %v537_v26 = vadd.f32 %v928_v21, %v492_v19 }
  0xd9   : > { %v494_v22 = vpop.f32.mrf.mxu1 }
  0xda   : > { %v495_v23 = vadd.f32 %v494_v22, %v369_v20  ;;  %v770_v24 = vpop.f32.mrf.mxu0 }
  0xdb   : > { %v794_v25 = vpop.f32.mrf.mxu1 }
  0xdc   : > { %v538_v27 = vadd.f32 %v928_v21, %v495_v23  ;;  %v374_v28 = vpop.f32.mrf.mxu0 }
  0xdd   : > { %v499_v29 = vpop.f32.mrf.mxu1 }
  0xde   : > { %v723_v30 = vpack.c.bf16 %v538_v27, %v537_v26  ;;  %v773_v31 = vpop.f32.mrf.mxu0  ;;  %v500_v33 = vadd.f32 %v499_v29, %v374_v28 }
  0xdf   : > { %v797_v32 = vpop.f32.mrf.mxu1 }
  0xe0   : > { %724 = vst [vmem:[%s936_s15] sm:$0xff] %v723_v30   ;;  %v377_v34 = vpop.f32.mrf.mxu0  ;;  %v539_v39 = vadd.f32 %v928_v21, %v500_v33 }
  0xe1   : > { %v502_v35 = vpop.f32.mrf.mxu1 }
  0xe2   : > { %v503_v36 = vadd.f32 %v502_v35, %v377_v34  ;;  %v774_v37 = vpop.f32.mrf.mxu0 }
  0xe3   : > { %v798_v38 = vpop.f32.mrf.mxu1 }
  0xe4   : > { %v540_v40 = vadd.f32 %v928_v21, %v503_v36  ;;  %v382_v41 = vpop.f32.mrf.mxu0 }
  0xe5   : > { %v507_v42 = vpop.f32.mrf.mxu1 }
  0xe6   : > { %v728_v43 = vpack.c.bf16 %v540_v40, %v539_v39  ;;  %v777_v44 = vpop.f32.mrf.mxu0  ;;  %v508_v46 = vadd.f32 %v507_v42, %v382_v41 }
  0xe7   : > { %v801_v45 = vpop.f32.mrf.mxu1 }
  0xe8   : > { %745 = vst [vmem:[%s936_s15 + $0x8] sm:$0xff] %v728_v43   ;;  %v385_v47 = vpop.f32.mrf.mxu0  ;;  %v541_v52 = vadd.f32 %v928_v21, %v508_v46 }
  0xe9   : > { %v510_v48 = vpop.f32.mrf.mxu1 }
  0xea   : > { %v511_v49 = vadd.f32 %v510_v48, %v385_v47  ;;  %v778_v50 = vpop.f32.mrf.mxu0 }
  0xeb   : > { %v802_v51 = vpop.f32.mrf.mxu1 }
  0xec   : > { %v542_v53 = vadd.f32 %v928_v21, %v511_v49  ;;  %v390_v54 = vpop.f32.mrf.mxu0 }
  0xed   : > { %v515_v55 = vpop.f32.mrf.mxu1 }
  0xee   : > { %v733_v56 = vpack.c.bf16 %v542_v53, %v541_v52  ;;  %v781_v57 = vpop.f32.mrf.mxu0  ;;  %v516_v59 = vadd.f32 %v515_v55, %v390_v54 }
  0xef   : > { %v805_v58 = vpop.f32.mrf.mxu1 }
  0xf0   : > { %746 = vst [vmem:[%s936_s15 + $0x10] sm:$0xff] %v733_v56   ;;  %v393_v60 = vpop.f32.mrf.mxu0  ;;  %v543_v1 = vadd.f32 %v928_v21, %v516_v59 }
  0xf1   : > { %v518_v61 = vpop.f32.mrf.mxu1 }
  0xf2   : > { %v519_v62 = vadd.f32 %v518_v61, %v393_v60  ;;  %v782_v63 = vpop.f32.mrf.mxu0 }
  0xf3   : > { %v806_v0 = vpop.f32.mrf.mxu1 }
  0xf4   : > { %v544_v2 = vadd.f32 %v928_v21, %v519_v62  ;;  %v398_v3 = vpop.f32.mrf.mxu0 }
  0xf5   : > { %v523_v4 = vpop.f32.mrf.mxu1 }
  0xf6   : > { %v738_v5 = vpack.c.bf16 %v544_v2, %v543_v1  ;;  %v785_v6 = vpop.f32.mrf.mxu0  ;;  %v524_v8 = vadd.f32 %v523_v4, %v398_v3 }
  0xf7   : > { %v809_v7 = vpop.f32.mrf.mxu1 }
  0xf8   : > { %747 = vst [vmem:[%s936_s15 + $0x18] sm:$0xff] %v738_v5   ;;  %v401_v9 = vpop.f32.mrf.mxu0  ;;  %v545_v14 = vadd.f32 %v928_v21, %v524_v8 }
  0xf9   : > { %v526_v10 = vpop.f32.mrf.mxu1 }
  0xfa   : > { %v527_v11 = vadd.f32 %v526_v10, %v401_v9  ;;  %v786_v12 = vpop.f32.mrf.mxu0 }
  0xfb   : > { %v810_v13 = vpop.f32.mrf.mxu1 }
  0xfc   : > { %v546_v15 = vadd.f32 %v928_v21, %v527_v11 }
  0xfe   : > { %v743_v16 = vpack.c.bf16 %v546_v15, %v545_v14 }
 0x100   : > { %748 = vst [vmem:[%s936_s15 + $0x20] sm:$0xff] %v743_v16  }
 0x101 PF: > { %s15_s18 = sadd.s32 1, %s841_s18  }
 0x102   : > { %p12_p4 = scmp.ge.s32.totalorder %s15_s18, 4  }
 0x104   :  { %14 = sbr.rel (!%p12_p4) target bundleno = 1 (0x1), region = 73 }

// kernel: language_model_forward.14
= control target key start
LH: loop header
LB: loop body
LE: loop exit
PB: predicated region body
PF: predicated region fallthrough
CT: control target
= control target key end

     0   :  { %s2158_s0 = inlined_call_operand.vmem [shape: bf16[160,32], index: 0, kind: input, shape index: {}]   ;;  %s2159_s1 = inlined_call_operand.vmem [shape: bf16[160,32], index: 1, kind: input, shape index: {}]   ;;  %s2160_s2 = inlined_call_operand.vmem [shape: bf16[32,384], index: 2, kind: input, shape index: {}]   ;;  %s2161_s3 = inlined_call_operand.vmem [shape: bf16[32,384], index: 3, kind: input, shape index: {}]   ;;  %s2162_s4 = inlined_call_operand.vmem [shape: f32[1,384], index: 4, kind: input, shape index: {}]   ;;  %s2163_s5 = inlined_call_operand.vmem [shape: f32[160,384], index: 5, kind: output, shape index: {0}]   ;;  %s2164_s6 = inlined_call_operand.vmem [shape: f32[160,1], index: 6, kind: output, shape index: {1}]  }
   0x1   :  { %2169 = sst [smem:[#allocation12_spill]] %s2160_s2 }
   0x2   :  { %2170 = sst [smem:[#allocation13_spill]] %s2161_s3 }
   0x3   :  { %s1690_s21 = smov 0   ;;  %s1692_s22 = smov 0  }
   0x4   :  { %s1694_s23 = smov 0   ;;  %s1696_s24 = smov 0  }
   0x5   :  { %s1698_s25 = smov 0   ;;  %s1700_s26 = smov 0  }
   0x6   :  { %s1702_s27 = smov 0   ;;  %s1704_s28 = smov 0  }
   0x7   :  { %s1706_s29 = smov 0  }
   0x8 LB: > { %2171 = sst [smem:[#allocation7_spill]] %s1640_s27  ;;  %s1316_s30 = sadd.s32 4294967295, %s1648_s29   ;;  %s1648_s29 = sphi %s1706_s29, %s17_s29   ;;  %s1644_s28 = sphi %s1704_s28, %s2184_s28   ;;  %s1640_s27 = sphi %s1702_s27, %s2183_s27   ;;  %s1636_s26 = sphi %s1700_s26, %s2190_s26   ;;  %s1632_s25 = sphi %s1698_s25, %s2189_s25   ;;  %s1628_s24 = sphi %s1696_s24, %s2188_s24   ;;  %s1624_s23 = sphi %s1694_s23, %s2187_s23   ;;  %s1620_s22 = sphi %s1692_s22, %s2186_s22   ;;  %s1616_s21 = sphi %s1690_s21, %s2185_s21  }
   0x9   : > { %2172 = sst [smem:[#allocation8_spill]] %s1644_s28  ;;  %s26_s7 = sadd.s32 1, %s1640_s27 }
   0xa   : > { %p27_p0 = scmp.ge.s32.totalorder %s26_s7, 3  ;;  %s29_s8 = sadd.s32 1, %s1644_s28 }
   0xb   : > { %s88_s9 = sadd.s32 1, %s1628_s24  ;;  %p95_p1 = scmp.ne.s32.totalorder %s1628_s24, %s1624_s23 }
   0xc   : > { %s2192_s7 = smov (%p27_p0, %s26_s7), 0  ;;  %s2194_s8 = smov (!%p27_p0, %s29_s8), %s1644_s28 }
   0xd   : > { %2173 = sst [smem:[#allocation9_spill]] %s2192_s7  ;;  %s85_s10 = ssub.s32 %s1640_s27, %s2192_s7 }
   0xe   : > { %p96_p2 = scmp.eq.s32.totalorder %s1648_s29, 0  ;;  %p31_p3 = scmp.ge.s32.totalorder %s2194_s8, 2 }
   0xf   : > { %p86_p4 = scmp.eq.s32.totalorder %s85_s10, 0  ;;  %s168_s12 = sadd.s32 1, %s1620_s22 }
  0x10   : > { %p1747_p5 = por %p96_p2, %p95_p1  ;;  %s2196_s8 = smov (%p31_p3, %s2194_s8), 0 }
  0x11   : > { %2175 = sst [smem:[#allocation10_spill]] %s2196_s8  ;;  %s163_s14 = ssub.s32 %s1644_s28, %s2196_s8 }
  0x12   : > { %s1755_s13 = scalar_select %p86_p4, %s1628_s24, %s88_s9  }
  0x13   : > { %p178_p6 = scmp.ne.s32.totalorder %s1620_s22, %s1616_s21  ;;  %s165_s15 = sor.u32 %s163_s14, %s85_s10 }
  0x14   : > { %2176 = sst [smem:[#allocation11_spill]] %s1755_s13  ;;  %p179_p7 = scmp.eq.s32.totalorder %s1316_s30, 5 }
  0x15   : > { %p166_p8 = scmp.eq.s32.totalorder %s165_s15, 0  ;;  %p1319_p10 = scmp.ge.s32.totalorder %s1648_s29, 6 }
  0x16   : > { %p1761_p9 = por %p179_p7, %p178_p6 }
  0x17   : > { %s1766_s17 = scalar_select %p166_p8, %s1620_s22, %s168_s12  }
  0x18   : > { %227 = sbr.rel (%p1319_p10) target bundleno = 53 (0x35), region = 16 }
  0x1d   : > { %248 = sbr.rel (!%p1747_p5) target bundleno = 41 (0x29), region = 28  ;;  %s250_s18 = sand.u32 (%p1747_p5), 1, %s1628_s24  }
  0x1e   : > { %s1321_s19 = sshll.u32 (%p1747_p5), %s1640_s27, 2  ;;  %s1320_s20 = sshll.u32 (%p1747_p5), %s250_s18, 4 }
  0x1f   : > { %s2178_s2 = sld [smem:[#allocation12_spill]] (%p1747_p5)  ;;  %s252_s14 = scalar_lea.vmem (%p1747_p5), [#allocation4], %s1320_s20 }
  0x25   : > { %s254_s10 = scalar_lea.vmem %s2178_s2, %s1321_s19 }
  0x26   : > { %v271_v0 = vld [vmem:[%s254_s10] sm:$0xf]  ;;  %v273_v1 = vld [vmem:[%s254_s10 + $0xc] sm:$0xf]  ;;  %v275_v2 = vld [vmem:[%s254_s10 + $0x18] sm:$0xf] }
  0x27   : > { %272 = vst [vmem:[%s252_s14] sm:$0xf] %v271_v0  ;;  %274 = vst [vmem:[%s252_s14 + $0x4] sm:$0xf] %v273_v1  ;;  %v277_v3 = vld [vmem:[%s254_s10 + $0x24] sm:$0xf] }
  0x28   : > { %276 = vst [vmem:[%s252_s14 + $0x8] sm:$0xf] %v275_v2  ;;  %278 = vst [vmem:[%s252_s14 + $0xc] sm:$0xf] %v277_v3 }
  0x29 PF: > { %310 = sbr.rel (!%p1747_p5) target bundleno = 53 (0x35), region = 69  ;;  %s312_s12 = sand.u32 (%p1747_p5), 1, %s1628_s24  }
  0x2a   : > { %s1323_s15 = sshll.u32 (%p1747_p5), %s1640_s27, 2  ;;  %s1322_s18 = sshll.u32 (%p1747_p5), %s312_s12, 4 }
  0x2b   : > { %s2179_s3 = sld [smem:[#allocation13_spill]] (%p1747_p5)  ;;  %s314_s20 = scalar_lea.vmem (%p1747_p5), [#allocation5], %s1322_s18 }
  0x31   : > { %s316_s30 = scalar_lea.vmem %s2179_s3, %s1323_s15 }
  0x32   : > { %v333_v4 = vld [vmem:[%s316_s30] sm:$0xf]  ;;  %v335_v5 = vld [vmem:[%s316_s30 + $0xc] sm:$0xf]  ;;  %v337_v6 = vld [vmem:[%s316_s30 + $0x18] sm:$0xf] }
  0x33   : > { %334 = vst [vmem:[%s314_s20] sm:$0xf] %v333_v4  ;;  %336 = vst [vmem:[%s314_s20 + $0x4] sm:$0xf] %v335_v5  ;;  %v339_v7 = vld [vmem:[%s316_s30 + $0x24] sm:$0xf] }
  0x34   : > { %338 = vst [vmem:[%s314_s20 + $0x8] sm:$0xf] %v337_v6  ;;  %340 = vst [vmem:[%s314_s20 + $0xc] sm:$0xf] %v339_v7 }
  0x35 PF: > { %p1324_p11 = scmp.ge.s32.totalorder %s1648_s29, 1  ;;  %p377_p12 = scmp.lt.s32.totalorder %s1648_s29, 7 }
  0x37   : > { %p378_p13 = pnand %p1324_p11, %p377_p12 }
  0x38   : > { %s384_s11 = sand.u32 (!%p378_p13), 1, %s1624_s23   ;;  %s431_s10 = sand.u32 (!%p378_p13), 1, %s1616_s21  }
  0x39   : > { %381 = sbr.rel (%p378_p13) target bundleno = 785 (0x311), region = 114  ;;  %s1787_s14 = sshll.u32 (!%p378_p13), %s384_s11, 4 }
  0x3a   : > { %s1422_s12 = smul.u32 (!%p378_p13), 80, %s431_s10  ;;  %p453_p0 = scmp.lt.s32.totalorder (!%p378_p13), %s1632_s25, 2 }
  0x3b   : > { %s441_s15 = smul.u32 (!%p378_p13), 10, %s1636_s26  ;;  %s386_s13 = scalar_lea.vmem (!%p378_p13), [#allocation4], %s1787_s14 }
  0x3c   : > { %s393_s9 = scalar_lea.vmem (!%p378_p13), [#allocation5], %s1787_s14  ;;  %s1815_s19 = scalar_lea.vmem (!%p378_p13), [#allocation6], %s1422_s12 }
  0x3d   : > { %p442_p1 = scmp.lt.s32.totalorder (!%p378_p13), %s441_s15, 19  ;;  %p1330_p2 = scmp.ne.s32.totalorder (!%p378_p13), %s1632_s25, 0 }
  0x3e   : > { %s1792_s18 = scalar_select %p453_p0, %s1632_s25, 2 }
  0x3f   : > { %s2198_s15 = smov (!%p442_p1, %s441_s15), 19  ;;  %467 = sbr.rel (%p1330_p2) target bundleno = 79 (0x4f), region = 126 }
  0x40   : > { %s455_s30 = scalar_lea.vmem %s2162_s4, %s1792_s18  ;;  %s1327_s20 = sshll.u32 %s2198_s15, 2 }
  0x41   : > { %s1329_s2 = sshll.u32 %s2198_s15, 3  ;;  %s1801_s11 = scalar_lea.vmem %s2158_s0, %s1327_s20 }
  0x42   : > { %s1806_s8 = scalar_lea.vmem %s2159_s1, %s1327_s20  ;;  %s1811_s27 = scalar_lea.vmem %s2164_s6, %s1329_s2 }
  0x44   : > { %vm468_vm0 = vcmask 7168   ;;  %v1650_v8 = vmov -inf   ;;  %v1651_v9 = vmov 0.0  }
  0x45   : > { %469 = vst.msk [vmem:[#allocation2] sm:$0xff] %vm468_vm0, %v1650_v8  ;;  %470 = vst.msk [vmem:[#allocation2 + $0x8] sm:$0xff] %vm468_vm0, %v1650_v8 }
  0x46   : > { %471 = vst.msk [vmem:[#allocation2 + $0x10] sm:$0xff] %vm468_vm0, %v1650_v8  ;;  %472 = vst.msk [vmem:[#allocation2 + $0x18] sm:$0xff] %vm468_vm0, %v1650_v8 }
  0x47   : > { %473 = vst.msk [vmem:[#allocation2 + $0x20] sm:$0xff] %vm468_vm0, %v1650_v8  ;;  %474 = vst.msk [vmem:[#allocation2 + $0x28] sm:$0xff] %vm468_vm0, %v1650_v8 }
  0x48   : > { %475 = vst.msk [vmem:[#allocation2 + $0x30] sm:$0xff] %vm468_vm0, %v1650_v8  ;;  %476 = vst.msk [vmem:[#allocation2 + $0x38] sm:$0xff] %vm468_vm0, %v1650_v8 }
  0x49   : > { %477 = vst.msk [vmem:[#allocation2 + $0x40] sm:$0xff] %vm468_vm0, %v1650_v8  ;;  %478 = vst.msk [vmem:[#allocation2 + $0x48] sm:$0xff] %vm468_vm0, %v1650_v8 }
  0x4a   : > { %479 = vst.msk [vmem:[#allocation3] sm:$0xff] %vm468_vm0, %v1651_v9  ;;  %480 = vst.msk [vmem:[#allocation3 + $0x8] sm:$0xff] %vm468_vm0, %v1651_v9 }
  0x4b   : > { %481 = vst.msk [vmem:[#allocation3 + $0x10] sm:$0xff] %vm468_vm0, %v1651_v9  ;;  %482 = vst.msk [vmem:[#allocation3 + $0x18] sm:$0xff] %vm468_vm0, %v1651_v9 }
  0x4c   : > { %483 = vst.msk [vmem:[#allocation3 + $0x20] sm:$0xff] %vm468_vm0, %v1651_v9  ;;  %484 = vst.msk [vmem:[#allocation3 + $0x28] sm:$0xff] %vm468_vm0, %v1651_v9 }
  0x4d   : > { %485 = vst.msk [vmem:[#allocation3 + $0x30] sm:$0xff] %vm468_vm0, %v1651_v9  ;;  %486 = vst.msk [vmem:[#allocation3 + $0x38] sm:$0xff] %vm468_vm0, %v1651_v9 }
  0x4e   : > { %487 = vst.msk [vmem:[#allocation3 + $0x40] sm:$0xff] %vm468_vm0, %v1651_v9  ;;  %488 = vst.msk [vmem:[#allocation3 + $0x48] sm:$0xff] %vm468_vm0, %v1651_v9 }
  0x4f PF: > { %v1504_v10 = vld [vmem:[%s393_s9 + $0x8] sm:$0xff]   ;;  %v1652_v11 = vmov 0.0   ;;  %v1506_v13 = vld [vmem:[%s393_s9] sm:$0xff]   ;;  %vm1653_vm1 = vmmov 0   ;;  %vm554_vm2 = vcmask 261120   ;;  %v1654_v52 = vmov 0  }
  0x50   : > { %1374 = vmatprep.subr.bf16.mxu0 %v1652_v11  ;;  %1398 = vmatprep.subr.bf16.mxu1 %v1652_v11  ;;  %v1505_v12 = vld [vmem:[%s386_s13 + $0x8] sm:$0xff]   ;;  %v1507_v14 = vld [vmem:[%s386_s13] sm:$0xff]   ;;  %vm995_vm3 = vcmask 7168   ;;  %p1356_p3 = scmp.ne.s32.totalorder %s1632_s25, 2 }
  0x51   : > { %1375 = vmatpush3.bf16.msra.mxu0 %v1504_v10  ;;  %1378 = vmatprep.mubr.msk.bf16.mxu0 %vm1653_vm1, %v1652_v11  ;;  %v1508_v15 = vld [vmem:[%s1806_s8] sm:$0xff]   ;;  %v1510_v17 = vld [vmem:[%s1806_s8 + $0x8] sm:$0xff]   ;;  %v1512_v19 = vld [vmem:[%s1806_s8 + $0x10] sm:$0xff]  }
  0x52   : > { %1399 = vmatpush3.bf16.msra.mxu1 %v1505_v12  ;;  %1376 = vmatprep.subr.bf16.mxu0 %v1652_v11  ;;  %v1509_v16 = vld [vmem:[%s1801_s11] sm:$0xff]   ;;  %v1511_v18 = vld [vmem:[%s1801_s11 + $0x8] sm:$0xff]   ;;  %v1513_v20 = vld [vmem:[%s1801_s11 + $0x10] sm:$0xff]  }
  0x53   : > { %1400 = vmatprep.subr.bf16.mxu1 %v1652_v11  ;;  %1402 = vmatprep.mubr.msk.bf16.mxu1 %vm1653_vm1, %v1652_v11  ;;  %v1514_v21 = vld [vmem:[%s1806_s8 + $0x18] sm:$0xff]   ;;  %v1516_v23 = vld [vmem:[%s1806_s8 + $0x20] sm:$0xff]  }
  0x54   : > { %v1515_v22 = vld [vmem:[%s1801_s11 + $0x18] sm:$0xff]   ;;  %v1517_v24 = vld [vmem:[%s1801_s11 + $0x20] sm:$0xff]   ;;  %1502 = vset.pattern.permute.xlu0 %v1654_v52  ;;  %1503 = vset.pattern.permute.xlu1 %v1654_v52 }
  0x55   : > { %1377 = vmatpush3.bf16.msra.mxu0 %v1506_v13  ;;  %v1881_v27 = vld [vmem:[%s455_s30] ss:$0 sm:$0xff] }
  0x56   : > { %1401 = vmatpush3.bf16.msra.mxu1 %v1507_v14 }
  0x58   : > { %1379 = vmatmul.mubr.msk.bf16.vlgmr.msra.gmra.mxu0 %vm554_vm2, %v1508_v15 }
  0x59   : > { %1403 = vmatmul.mubr.msk.bf16.vlgmr.msra.gmra.mxu1 %vm554_vm2, %v1509_v16  ;;  %1382 = vmatprep.mubr.msk.bf16.mxu0 %vm1653_vm1, %v1652_v11 }
  0x5a   : > { %1406 = vmatprep.mubr.msk.bf16.mxu1 %vm1653_vm1, %v1652_v11 }
  0x60   : > { %1383 = vmatmul.mubr.msk.bf16.gmra.mxu0 %vm554_vm2, %v1510_v17 }
  0x61   : > { %1407 = vmatmul.mubr.msk.bf16.gmra.mxu1 %vm554_vm2, %v1511_v18  ;;  %1386 = vmatprep.mubr.msk.bf16.mxu0 %vm1653_vm1, %v1652_v11 }
  0x62   : > { %1410 = vmatprep.mubr.msk.bf16.mxu1 %vm1653_vm1, %v1652_v11 }
  0x68   : > { %1387 = vmatmul.mubr.msk.bf16.gmra.mxu0 %vm554_vm2, %v1512_v19 }
  0x69   : > { %1411 = vmatmul.mubr.msk.bf16.gmra.mxu1 %vm554_vm2, %v1513_v20  ;;  %1390 = vmatprep.mubr.msk.bf16.mxu0 %vm1653_vm1, %v1652_v11 }
  0x6a   : > { %1414 = vmatprep.mubr.msk.bf16.mxu1 %vm1653_vm1, %v1652_v11 }
  0x70   : > { %1391 = vmatmul.mubr.msk.bf16.gmra.mxu0 %vm554_vm2, %v1514_v21 }
  0x71   : > { %1415 = vmatmul.mubr.msk.bf16.gmra.mxu1 %vm554_vm2, %v1515_v22  ;;  %1394 = vmatprep.mubr.msk.bf16.mxu0 %vm1653_vm1, %v1652_v11 }
  0x72   : > { %1418 = vmatprep.mubr.msk.bf16.mxu1 %vm1653_vm1, %v1652_v11 }
  0x78   : > { %1395 = vmatmul.mubr.msk.bf16.gmra.mxu0 %vm554_vm2, %v1516_v23  ;;  %v1943_v23 = vld [vmem:[#allocation2] sm:$0xff] }
  0x79   : > { %1419 = vmatmul.mubr.msk.bf16.gmra.mxu1 %vm554_vm2, %v1517_v24 }
 0x118   : > { %v604_v25 = vpop.f32.mrf.mxu0 }
 0x119   : > { %v729_v26 = vpop.f32.mrf.mxu1 }
 0x11a   : > { %v730_v28 = vadd.f32 %v729_v26, %v604_v25  ;;  %v1380_v29 = vpop.f32.mrf.mxu0  ;;  %v1948_v26 = vld [vmem:[#allocation2 + $0x8] sm:$0xff] }
 0x11b   : > { %v1404_v30 = vpop.f32.mrf.mxu1 }
 0x11c   : > { %v1884_v31 = vadd.f32 %v1881_v27, %v730_v28  ;;  %v607_v32 = vpop.f32.mrf.mxu0  ;;  %v1958_v30 = vld [vmem:[#allocation2 + $0x10] sm:$0xff] }
 0x11d   : > { %v732_v33 = vpop.f32.mrf.mxu1 }
 0x11e   : > { %785 = vst [vmem:[%s1815_s19] sm:$0xff] %v1884_v31  ;;  %v733_v34 = vadd.f32 %v732_v33, %v607_v32  ;;  %805 = vmax.xlane.f32.xlu0 %v1884_v31  ;;  %v1381_v35 = vpop.f32.mrf.mxu0 }
 0x11f   : > { %v1405_v36 = vpop.f32.mrf.mxu1  ;;  %v1968_v35 = vld [vmem:[#allocation2 + $0x18] sm:$0xff] }
 0x120   : > { %v1890_v37 = vadd.f32 %v1881_v27, %v733_v34  ;;  %v612_v38 = vpop.f32.mrf.mxu0 }
 0x121   : > { %v737_v39 = vpop.f32.mrf.mxu1 }
 0x122   : > { %786 = vst [vmem:[%s1815_s19 + $0x8] sm:$0xff] %v1890_v37  ;;  %v738_v40 = vadd.f32 %v737_v39, %v612_v38  ;;  %807 = vmax.xlane.f32.xlu0 %v1890_v37  ;;  %v1384_v41 = vpop.f32.mrf.mxu0 }
 0x123   : > { %v1408_v42 = vpop.f32.mrf.mxu1 }
 0x124   : > { %v1896_v43 = vadd.f32 %v1881_v27, %v738_v40  ;;  %v615_v44 = vpop.f32.mrf.mxu0  ;;  %v1978_v40 = vld [vmem:[#allocation2 + $0x20] sm:$0xff] }
 0x125   : > { %v740_v45 = vpop.f32.mrf.mxu1 }
 0x126   : > { %787 = vst [vmem:[%s1815_s19 + $0x10] sm:$0xff] %v1896_v43  ;;  %v741_v46 = vadd.f32 %v740_v45, %v615_v44  ;;  %809 = vmax.xlane.f32.xlu1 %v1896_v43  ;;  %v1385_v47 = vpop.f32.mrf.mxu0  ;;  %v1988_v45 = vld [vmem:[#allocation2 + $0x28] sm:$0xff] }
 0x127   : > { %v1409_v48 = vpop.f32.mrf.mxu1 }
 0x128   : > { %v1902_v49 = vadd.f32 %v1881_v27, %v741_v46  ;;  %v620_v50 = vpop.f32.mrf.mxu0 }
 0x129   : > { %v745_v51 = vpop.f32.mrf.mxu1 }
 0x12a   : > { %788 = vst [vmem:[%s1815_s19 + $0x18] sm:$0xff] %v1902_v49  ;;  %v746_v53 = vadd.f32 %v745_v51, %v620_v50  ;;  %811 = vmax.xlane.f32.xlu1 %v1902_v49  ;;  %v1388_v54 = vpop.f32.mrf.mxu0  ;;  %v1998_v50 = vld [vmem:[#allocation2 + $0x30] sm:$0xff] }
 0x12b   : > { %v1412_v55 = vpop.f32.mrf.mxu1  ;;  %v2008_v54 = vld [vmem:[#allocation2 + $0x38] sm:$0xff] }
 0x12c   : > { %v1908_v56 = vadd.f32 %v1881_v27, %v746_v53  ;;  %v623_v57 = vpop.f32.mrf.mxu0 }
 0x12d   : > { %v748_v58 = vpop.f32.mrf.mxu1 }
 0x12e   : > { %789 = vst [vmem:[%s1815_s19 + $0x20] sm:$0xff] %v1908_v56  ;;  %v749_v59 = vadd.f32 %v748_v58, %v623_v57  ;;  %813 = vmax.xlane.f32.xlu0 %v1908_v56  ;;  %v1389_v60 = vpop.f32.mrf.mxu0 }
 0x12f   : > { %v1413_v61 = vpop.f32.mrf.mxu1 }
 0x130   : > { %v1914_v62 = vadd.f32 %v1881_v27, %v749_v59  ;;  %v628_v63 = vpop.f32.mrf.mxu0  ;;  %v2018_v59 = vld [vmem:[#allocation2 + $0x40] sm:$0xff] }
 0x131   : > { %v753_v0 = vpop.f32.mrf.mxu1 }
 0x132   : > { %790 = vst [vmem:[%s1815_s19 + $0x28] sm:$0xff] %v1914_v62  ;;  %v754_v1 = vadd.f32 %v753_v0, %v628_v63  ;;  %815 = vmax.xlane.f32.xlu1 %v1914_v62  ;;  %v1392_v2 = vpop.f32.mrf.mxu0  ;;  %v2028_v0 = vld [vmem:[#allocation2 + $0x48] sm:$0xff] }
 0x133   : > { %v1416_v3 = vpop.f32.mrf.mxu1 }
 0x134   : > { %v1920_v4 = vadd.f32 %v1881_v27, %v754_v1  ;;  %v631_v5 = vpop.f32.mrf.mxu0 }
 0x135   : > { %v756_v6 = vpop.f32.mrf.mxu1 }
 0x136   : > { %791 = vst [vmem:[%s1815_s19 + $0x30] sm:$0xff] %v1920_v4  ;;  %v757_v7 = vadd.f32 %v756_v6, %v631_v5  ;;  %817 = vmax.xlane.f32.xlu0 %v1920_v4  ;;  %v1393_v8 = vpop.f32.mrf.mxu0 }
 0x137   : > { %v1417_v9 = vpop.f32.mrf.mxu1 }
 0x138   : > { %v1926_v10 = vadd.f32 %v1881_v27, %v757_v7  ;;  %v636_v11 = vpop.f32.mrf.mxu0 }
 0x139   : > { %v761_v12 = vpop.f32.mrf.mxu1 }
 0x13a   : > { %792 = vst [vmem:[%s1815_s19 + $0x38] sm:$0xff] %v1926_v10  ;;  %v762_v13 = vadd.f32 %v761_v12, %v636_v11  ;;  %819 = vmax.xlane.f32.xlu1 %v1926_v10  ;;  %v1396_v14 = vpop.f32.mrf.mxu0 }
 0x13b   : > { %v1420_v15 = vpop.f32.mrf.mxu1 }
 0x13c   : > { %v1932_v16 = vadd.f32 %v1881_v27, %v762_v13  ;;  %v639_v17 = vpop.f32.mrf.mxu0 }
 0x13d   : > { %v764_v18 = vpop.f32.mrf.mxu1 }
 0x13e   : > { %793 = vst [vmem:[%s1815_s19 + $0x40] sm:$0xff] %v1932_v16  ;;  %v765_v19 = vadd.f32 %v764_v18, %v639_v17  ;;  %821 = vmax.xlane.f32.xlu0 %v1932_v16  ;;  %v1397_v20 = vpop.f32.mrf.mxu0 }
 0x13f   : > { %v1421_v21 = vpop.f32.mrf.mxu1 }
 0x140   : > { %v1938_v22 = vadd.f32 %v1881_v27, %v765_v19 }
 0x142   : > { %794 = vst [vmem:[%s1815_s19 + $0x48] sm:$0xff] %v1938_v22  ;;  %823 = vmax.xlane.f32.xlu1 %v1938_v22 }
 0x1a7   : > { %v806_v24 = vpop.xlane.xlu0 %805 }
 0x1a8   : > { %v1946_v25 = vmax.f32 %v1943_v23, %v806_v24 }
 0x1aa   : > { %v835_v28 = vsub.f32 %v1943_v23, %v1946_v25  ;;  %1006 = vst.msk [vmem:[#allocation2] sm:$0xff] %vm995_vm3, %v1946_v25  ;;  %887 = vperm.xlu0 %1502, %v1946_v25  }
 0x1ab   : > { %v808_v27 = vpop.xlane.xlu0 %807 }
 0x1ac   : > { %v1956_v29 = vmax.f32 %v1948_v26, %v808_v27 }
 0x1ae   : > { %v836_v32 = vsub.f32 %v1948_v26, %v1956_v29  ;;  %1007 = vst.msk [vmem:[#allocation2 + $0x8] sm:$0xff] %vm995_vm3, %v1956_v29  ;;  %892 = vperm.xlu1 %1503, %v1956_v29  }
 0x1af   : > { %v810_v33 = vpop.xlane.xlu1 %809 }
 0x1b0   : > { %v1966_v34 = vmax.f32 %v1958_v30, %v810_v33 }
 0x1b2   : > { %v837_v36 = vsub.f32 %v1958_v30, %v1966_v34  ;;  %1008 = vst.msk [vmem:[#allocation2 + $0x10] sm:$0xff] %vm995_vm3, %v1966_v34  ;;  %897 = vperm.xlu1 %1503, %v1966_v34   ;;  %v866_v34 = vld [vmem:[#allocation3 + $0x8] sm:$0xff] }
 0x1b3   : > { %v812_v38 = vpop.xlane.xlu1 %811 }
 0x1b4   : > { %v1976_v39 = vmax.f32 %v1968_v35, %v812_v38 }
 0x1b6   : > { %v838_v41 = vsub.f32 %v1968_v35, %v1976_v39  ;;  %1009 = vst.msk [vmem:[#allocation2 + $0x18] sm:$0xff] %vm995_vm3, %v1976_v39  ;;  %902 = vperm.xlu1 %1503, %v1976_v39  }
 0x1b7   : > { %v814_v42 = vpop.xlane.xlu0 %813 }
 0x1b8   : > { %v1986_v44 = vmax.f32 %v1978_v40, %v814_v42 }
 0x1ba   : > { %v839_v46 = vsub.f32 %v1978_v40, %v1986_v44  ;;  %1010 = vst.msk [vmem:[#allocation2 + $0x20] sm:$0xff] %vm995_vm3, %v1986_v44  ;;  %907 = vperm.xlu1 %1503, %v1986_v44   ;;  %v867_v44 = vld [vmem:[#allocation3 + $0x10] sm:$0xff] }
 0x1bb   : > { %v816_v47 = vpop.xlane.xlu1 %815 }
 0x1bc   : > { %v1996_v48 = vmax.f32 %v1988_v45, %v816_v47  ;;  %v853_v23 = vmul.f32 1.442695, %v839_v46 }
 0x1be   : > { %v840_v51 = vsub.f32 %v1988_v45, %v1996_v48  ;;  %1011 = vst.msk [vmem:[#allocation2 + $0x28] sm:$0xff] %vm995_vm3, %v1996_v48  ;;  %912 = vperm.xlu1 %1503, %v1996_v48  }
 0x1bf   : > { %v818_v52 = vpop.xlane.xlu0 %817 }
 0x1c0   : > { %v2006_v53 = vmax.f32 %v1998_v50, %v818_v52  ;;  %v855_v26 = vmul.f32 1.442695, %v840_v51 }
 0x1c2   : > { %v841_v55 = vsub.f32 %v1998_v50, %v2006_v53  ;;  %1012 = vst.msk [vmem:[#allocation2 + $0x30] sm:$0xff] %vm995_vm3, %v2006_v53  ;;  %917 = vperm.xlu1 %1503, %v2006_v53  }
 0x1c3   : > { %v820_v57 = vpop.xlane.xlu1 %819 }
 0x1c4   : > { %v2016_v58 = vmax.f32 %v2008_v54, %v820_v57  ;;  %v857_v35 = vmul.f32 1.442695, %v841_v55 }
 0x1c6   : > { %v842_v60 = vsub.f32 %v2008_v54, %v2016_v58  ;;  %1013 = vst.msk [vmem:[#allocation2 + $0x38] sm:$0xff] %vm995_vm3, %v2016_v58  ;;  %922 = vperm.xlu1 %1503, %v2016_v58  }
 0x1c7   : > { %v822_v61 = vpop.xlane.xlu0 %821 }
 0x1c8   : > { %v2026_v63 = vmax.f32 %v2018_v59, %v822_v61  ;;  %v859_v45 = vmul.f32 1.442695, %v842_v60 }
 0x1ca   : > { %v843_v1 = vsub.f32 %v2018_v59, %v2026_v63  ;;  %1014 = vst.msk [vmem:[#allocation2 + $0x40] sm:$0xff] %vm995_vm3, %v2026_v63  ;;  %927 = vperm.xlu1 %1503, %v2026_v63  }
 0x1cb   : > { %v824_v2 = vpop.xlane.xlu1 %823 }
 0x1cc   : > { %v2036_v3 = vmax.f32 %v2028_v0, %v824_v2  ;;  %v861_v53 = vmul.f32 1.442695, %v843_v1 }
 0x1ce   : > { %v844_v5 = vsub.f32 %v2028_v0, %v2036_v3  ;;  %1015 = vst.msk [vmem:[#allocation2 + $0x48] sm:$0xff] %vm995_vm3, %v2036_v3  ;;  %932 = vperm.xlu0 %1502, %v2036_v3  }
 0x1d0   : > { %v863_v58 = vmul.f32 1.442695, %v844_v5  ;;  %v872_v5 = vld [vmem:[#allocation3 + $0x38] sm:$0xff] }
 0x225   : > { %v888_v6 = vpop.permute.xlu0 %887 }
 0x226   : > { %v935_v7 = vsub.f32 %v1884_v31, %v888_v6 }
 0x228   : > { %v945_v8 = vmul.f32 1.442695, %v935_v7 }
 0x229   : > { %v893_v9 = vpop.permute.xlu1 %892 }
 0x22a   : > { %1518 = vpow2.f32 %v945_v8  ;;  %v936_v11 = vsub.f32 %v1890_v37, %v893_v9 }
 0x22c   : > { %v947_v12 = vmul.f32 1.442695, %v936_v11 }
 0x22d   : > { %v898_v13 = vpop.permute.xlu1 %897 }
 0x22e   : > { %1520 = vpow2.f32 %v947_v12  ;;  %v937_v14 = vsub.f32 %v1896_v43, %v898_v13 }
 0x230   : > { %v949_v15 = vmul.f32 1.442695, %v937_v14 }
 0x231   : > { %v903_v17 = vpop.permute.xlu1 %902 }
 0x232   : > { %1522 = vpow2.f32 %v949_v15  ;;  %v938_v18 = vsub.f32 %v1902_v49, %v903_v17  ;;  %v849_v15 = vmul.f32 1.442695, %v837_v36  ;;  %v851_v17 = vmul.f32 1.442695, %v838_v41 }
 0x234   : > { %v951_v19 = vmul.f32 1.442695, %v938_v18 }
 0x235   : > { %v908_v20 = vpop.permute.xlu1 %907 }
 0x236   : > { %1524 = vpow2.f32 %v951_v19  ;;  %v939_v31 = vsub.f32 %v1908_v56, %v908_v20  ;;  %v868_v19 = vld [vmem:[#allocation3 + $0x18] sm:$0xff] }
 0x237   : > { %v1519_v21 = vpop.eup %1518 }
 0x238   : > { %v953_v24 = vmul.f32 1.442695, %v939_v31  ;;  %965 = vadd.xlane.f32.xlu1 %v1519_v21  ;;  %v869_v21 = vld [vmem:[#allocation3 + $0x20] sm:$0xff] }
 0x239   : > { %v913_v27 = vpop.permute.xlu1 %912 }
 0x23a   : > { %1526 = vpow2.f32 %v953_v24  ;;  %v940_v37 = vsub.f32 %v1914_v62, %v913_v27 }
 0x23b   : > { %v1521_v33 = vpop.eup %1520 }
 0x23c   : > { %v955_v38 = vmul.f32 1.442695, %v940_v37  ;;  %967 = vadd.xlane.f32.xlu0 %v1521_v33  ;;  %v870_v37 = vld [vmem:[#allocation3 + $0x28] sm:$0xff] }
 0x23d   : > { %v918_v43 = vpop.permute.xlu1 %917 }
 0x23e   : > { %1528 = vpow2.f32 %v955_v38  ;;  %v941_v42 = vsub.f32 %v1920_v4, %v918_v43  ;;  %v871_v38 = vld [vmem:[#allocation3 + $0x30] sm:$0xff] }
 0x23f   : > { %v1523_v49 = vpop.eup %1522 }
 0x240   : > { %v957_v47 = vmul.f32 1.442695, %v941_v42  ;;  %969 = vadd.xlane.f32.xlu0 %v1523_v49 }
 0x241   : > { %v923_v52 = vpop.permute.xlu1 %922 }
 0x242   : > { %1530 = vpow2.f32 %v957_v47  ;;  %v942_v56 = vsub.f32 %v1926_v10, %v923_v52 }
 0x243   : > { %v1525_v57 = vpop.eup %1524 }
 0x244   : > { %v959_v61 = vmul.f32 1.442695, %v942_v56  ;;  %971 = vadd.xlane.f32.xlu1 %v1525_v57  ;;  %v873_v57 = vld [vmem:[#allocation3 + $0x40] sm:$0xff] }
 0x245   : > { %v928_v2 = vpop.permute.xlu1 %927 }
 0x246   : > { %1532 = vpow2.f32 %v959_v61  ;;  %v943_v62 = vsub.f32 %v1932_v16, %v928_v2  ;;  %v845_v16 = vmul.f32 1.442695, %v835_v28  ;;  %v865_v28 = vld [vmem:[#allocation3] sm:$0xff] }
 0x247   : > { %v1527_v6 = vpop.eup %1526 }
 0x248   : > { %v961_v7 = vmul.f32 1.442695, %v943_v62  ;;  %973 = vadd.xlane.f32.xlu0 %v1527_v6 }
 0x249   : > { %v933_v8 = vpop.permute.xlu0 %932 }
 0x24a   : > { %1534 = vpow2.f32 %v961_v7  ;;  %v944_v4 = vsub.f32 %v1938_v22, %v933_v8  ;;  %v847_v22 = vmul.f32 1.442695, %v836_v32  ;;  %v874_v7 = vld [vmem:[#allocation3 + $0x48] sm:$0xff] }
 0x24b   : > { %v1529_v9 = vpop.eup %1528 }
 0x24c   : > { %v963_v11 = vmul.f32 1.442695, %v944_v4  ;;  %975 = vadd.xlane.f32.xlu1 %v1529_v9 }
 0x24e   : > { %1536 = vpow2.f32 %v963_v11 }
 0x24f   : > { %v1531_v12 = vpop.eup %1530  ;;  %1538 = vpow2.f32 %v845_v16 }
 0x250   : > { %977 = vadd.xlane.f32.xlu0 %v1531_v12  ;;  %1540 = vpow2.f32 %v847_v22 }
 0x251   : > { %1542 = vpow2.f32 %v849_v15 }
 0x252   : > { %1544 = vpow2.f32 %v851_v17 }
 0x253   : > { %v1533_v10 = vpop.eup %1532  ;;  %1546 = vpow2.f32 %v853_v23 }
 0x254   : > { %979 = vadd.xlane.f32.xlu1 %v1533_v10  ;;  %1548 = vpow2.f32 %v855_v26 }
 0x255   : > { %1550 = vpow2.f32 %v857_v35 }
 0x256   : > { %1552 = vpow2.f32 %v859_v45 }
 0x257   : > { %v1535_v13 = vpop.eup %1534  ;;  %1554 = vpow2.f32 %v861_v53 }
 0x258   : > { %981 = vadd.xlane.f32.xlu0 %v1535_v13  ;;  %1556 = vpow2.f32 %v863_v58 }
 0x25b   : > { %v1537_v14 = vpop.eup %1536 }
 0x25c   : > { %983 = vadd.xlane.f32.xlu1 %v1537_v14  ;;  %v1539_v25 = vpop.eup %1538 }
 0x25d   : > { %v875_v29 = vmul.f32 %v1539_v25, %v865_v28  ;;  %v1541_v30 = vpop.eup %1540 }
 0x25e   : > { %v876_v39 = vmul.f32 %v1541_v30, %v866_v34  ;;  %v1543_v40 = vpop.eup %1542 }
 0x25f   : > { %v877_v48 = vmul.f32 %v1543_v40, %v867_v44  ;;  %v1545_v51 = vpop.eup %1544 }
 0x260   : > { %v878_v55 = vmul.f32 %v1545_v51, %v868_v19  ;;  %v1547_v20 = vpop.eup %1546 }
 0x261   : > { %v879_v60 = vmul.f32 %v1547_v20, %v869_v21  ;;  %v1549_v24 = vpop.eup %1548 }
 0x262   : > { %v880_v63 = vmul.f32 %v1549_v24, %v870_v37  ;;  %v1551_v1 = vpop.eup %1550 }
 0x263   : > { %v881_v42 = vmul.f32 %v1551_v1, %v871_v38  ;;  %v1553_v0 = vpop.eup %1552 }
 0x264   : > { %v882_v47 = vmul.f32 %v1553_v0, %v872_v5  ;;  %v1555_v52 = vpop.eup %1554 }
 0x265   : > { %v883_v2 = vmul.f32 %v1555_v52, %v873_v57  ;;  %v1557_v62 = vpop.eup %1556 }
 0x266   : > { %v884_v4 = vmul.f32 %v1557_v62, %v874_v7 }
 0x2c1   : > { %v966_v32 = vpop.xlane.xlu1 %965 }
 0x2c2   : > { %v985_v36 = vadd.f32 %v966_v32, %v875_v29 }
 0x2c4   : > { %996 = vst.msk [vmem:[#allocation3] sm:$0xff] %vm995_vm3, %v985_v36 }
 0x2c5   : > { %v968_v41 = vpop.xlane.xlu0 %967 }
 0x2c6   : > { %v986_v46 = vadd.f32 %v968_v41, %v876_v39 }
 0x2c8   : > { %997 = vst.msk [vmem:[#allocation3 + $0x8] sm:$0xff] %vm995_vm3, %v986_v46 }
 0x2c9   : > { %v970_v18 = vpop.xlane.xlu0 %969 }
 0x2ca   : > { %v987_v50 = vadd.f32 %v970_v18, %v877_v48 }
 0x2cc   : > { %998 = vst.msk [vmem:[#allocation3 + $0x10] sm:$0xff] %vm995_vm3, %v987_v50 }
 0x2cd   : > { %v972_v31 = vpop.xlane.xlu1 %971 }
 0x2ce   : > { %v988_v54 = vadd.f32 %v972_v31, %v878_v55 }
 0x2d0   : > { %999 = vst.msk [vmem:[#allocation3 + $0x18] sm:$0xff] %vm995_vm3, %v988_v54 }
 0x2d1   : > { %v974_v27 = vpop.xlane.xlu0 %973 }
 0x2d2   : > { %v989_v59 = vadd.f32 %v974_v27, %v879_v60 }
 0x2d4   : > { %1000 = vst.msk [vmem:[#allocation3 + $0x20] sm:$0xff] %vm995_vm3, %v989_v59 }
 0x2d5   : > { %v976_v33 = vpop.xlane.xlu1 %975 }
 0x2d6   : > { %v990_v43 = vadd.f32 %v976_v33, %v880_v63 }
 0x2d8   : > { %1001 = vst.msk [vmem:[#allocation3 + $0x28] sm:$0xff] %vm995_vm3, %v990_v43 }
 0x2d9   : > { %v978_v3 = vpop.xlane.xlu0 %977 }
 0x2da   : > { %v991_v49 = vadd.f32 %v978_v3, %v881_v42 }
 0x2dc   : > { %1002 = vst.msk [vmem:[#allocation3 + $0x30] sm:$0xff] %vm995_vm3, %v991_v49 }
 0x2dd   : > { %v980_v56 = vpop.xlane.xlu1 %979 }
 0x2de   : > { %v992_v61 = vadd.f32 %v980_v56, %v882_v47 }
 0x2e0   : > { %1003 = vst.msk [vmem:[#allocation3 + $0x38] sm:$0xff] %vm995_vm3, %v992_v61 }
 0x2e1   : > { %v982_v6 = vpop.xlane.xlu0 %981 }
 0x2e2   : > { %v993_v8 = vadd.f32 %v982_v6, %v883_v2 }
 0x2e4   : > { %1004 = vst.msk [vmem:[#allocation3 + $0x40] sm:$0xff] %vm995_vm3, %v993_v8  ;;  %1019 = sbr.rel (%p1356_p3) target bundleno = 774 (0x306), region = 130 }
 0x2e5   : > { %v984_v9 = vpop.xlane.xlu1 %983 }
 0x2e6   : > { %v994_v11 = vadd.f32 %v984_v9, %v884_v4 }
 0x2e8   : > { %1005 = vst.msk [vmem:[#allocation3 + $0x48] sm:$0xff] %vm995_vm3, %v994_v11 }
 0x2e9   : > { %v1030_v12 = vld [vmem:[#allocation3] sm:$0xff]  ;;  %v1031_v10 = vld [vmem:[#allocation3 + $0x8] sm:$0xff]  ;;  %v1032_v13 = vld [vmem:[#allocation3 + $0x10] sm:$0xff] }
 0x2ea   : > { %1558 = vlog2.f32 %v1030_v12  ;;  %v1033_v14 = vld [vmem:[#allocation3 + $0x18] sm:$0xff]  ;;  %v1034_v16 = vld [vmem:[#allocation3 + $0x20] sm:$0xff]  ;;  %v1035_v22 = vld [vmem:[#allocation3 + $0x28] sm:$0xff] }
 0x2eb   : > { %1560 = vlog2.f32 %v1031_v10  ;;  %v1036_v15 = vld [vmem:[#allocation3 + $0x30] sm:$0xff]  ;;  %v1037_v17 = vld [vmem:[#allocation3 + $0x38] sm:$0xff]  ;;  %v1038_v23 = vld [vmem:[#allocation3 + $0x40] sm:$0xff] }
 0x2ec   : > { %1562 = vlog2.f32 %v1032_v13  ;;  %v1020_v26 = vld [vmem:[#allocation2] sm:$0xff]  ;;  %v1021_v32 = vld [vmem:[#allocation2 + $0x8] sm:$0xff]  ;;  %v1022_v35 = vld [vmem:[#allocation2 + $0x10] sm:$0xff] }
 0x2ed   : > { %1564 = vlog2.f32 %v1033_v14  ;;  %v1023_v44 = vld [vmem:[#allocation2 + $0x18] sm:$0xff]  ;;  %v1024_v51 = vld [vmem:[#allocation2 + $0x20] sm:$0xff]  ;;  %v1025_v53 = vld [vmem:[#allocation2 + $0x28] sm:$0xff] }
 0x2ee   : > { %1566 = vlog2.f32 %v1034_v16  ;;  %v1026_v21 = vld [vmem:[#allocation2 + $0x30] sm:$0xff]  ;;  %v1027_v24 = vld [vmem:[#allocation2 + $0x38] sm:$0xff]  ;;  %v1028_v63 = vld [vmem:[#allocation2 + $0x40] sm:$0xff] }
 0x2ef   : > { %1568 = vlog2.f32 %v1035_v22  ;;  %v1039_v25 = vld [vmem:[#allocation3 + $0x48] sm:$0xff]  ;;  %v1029_v43 = vld [vmem:[#allocation2 + $0x48] sm:$0xff] }
 0x2f0   : > { %1570 = vlog2.f32 %v1036_v15 }
 0x2f1   : > { %1572 = vlog2.f32 %v1037_v17 }
 0x2f2   : > { %1574 = vlog2.f32 %v1038_v23 }
 0x2f3   : > { %1576 = vlog2.f32 %v1039_v25 }
 0x2f7   : > { %v1559_v28 = vpop.eup %1558 }
 0x2f8   : > { %v1561_v29 = vpop.eup %1560  ;;  %v1041_v30 = vmul.f32 0.6931472, %v1559_v28 }
 0x2f9   : > { %v1563_v34 = vpop.eup %1562  ;;  %v1043_v36 = vmul.f32 0.6931472, %v1561_v29 }
 0x2fa   : > { %v1565_v39 = vpop.eup %1564  ;;  %v1060_v40 = vadd.f32 %v1041_v30, %v1020_v26  ;;  %v1045_v41 = vmul.f32 0.6931472, %v1563_v34 }
 0x2fb   : > { %v1567_v46 = vpop.eup %1566  ;;  %v1061_v45 = vadd.f32 %v1043_v36, %v1021_v32  ;;  %v1047_v48 = vmul.f32 0.6931472, %v1565_v39 }
 0x2fc   : > { %v1569_v18 = vpop.eup %1568  ;;  %1070 = vst.msk [vmem:[%s1811_s27] sm:$0xff] %vm995_vm3, %v1060_v40  ;;  %v1062_v19 = vadd.f32 %v1045_v41, %v1022_v35  ;;  %v1049_v50 = vmul.f32 0.6931472, %v1567_v46 }
 0x2fd   : > { %v1571_v55 = vpop.eup %1570  ;;  %1071 = vst.msk [vmem:[%s1811_s27 + $0x8] sm:$0xff] %vm995_vm3, %v1061_v45  ;;  %v1063_v20 = vadd.f32 %v1047_v48, %v1023_v44  ;;  %v1051_v31 = vmul.f32 0.6931472, %v1569_v18 }
 0x2fe   : > { %v1573_v54 = vpop.eup %1572  ;;  %1072 = vst.msk [vmem:[%s1811_s27 + $0x10] sm:$0xff] %vm995_vm3, %v1062_v19  ;;  %v1064_v58 = vadd.f32 %v1049_v50, %v1024_v51  ;;  %v1053_v60 = vmul.f32 0.6931472, %v1571_v55 }
 0x2ff   : > { %v1575_v27 = vpop.eup %1574  ;;  %1073 = vst.msk [vmem:[%s1811_s27 + $0x18] sm:$0xff] %vm995_vm3, %v1063_v20  ;;  %v1065_v37 = vadd.f32 %v1051_v31, %v1025_v53  ;;  %v1055_v59 = vmul.f32 0.6931472, %v1573_v54 }
 0x300   : > { %v1577_v1 = vpop.eup %1576  ;;  %1074 = vst.msk [vmem:[%s1811_s27 + $0x20] sm:$0xff] %vm995_vm3, %v1064_v58  ;;  %v1066_v33 = vadd.f32 %v1053_v60, %v1026_v21  ;;  %v1057_v38 = vmul.f32 0.6931472, %v1575_v27 }
 0x301   : > { %1075 = vst.msk [vmem:[%s1811_s27 + $0x28] sm:$0xff] %vm995_vm3, %v1065_v37  ;;  %v1067_v42 = vadd.f32 %v1055_v59, %v1027_v24  ;;  %v1059_v0 = vmul.f32 0.6931472, %v1577_v1 }
 0x302   : > { %1076 = vst.msk [vmem:[%s1811_s27 + $0x30] sm:$0xff] %vm995_vm3, %v1066_v33  ;;  %v1068_v3 = vadd.f32 %v1057_v38, %v1028_v63 }
 0x303   : > { %1077 = vst.msk [vmem:[%s1811_s27 + $0x38] sm:$0xff] %vm995_vm3, %v1067_v42  ;;  %v1069_v5 = vadd.f32 %v1059_v0, %v1029_v43 }
 0x304   : > { %1078 = vst.msk [vmem:[%s1811_s27 + $0x40] sm:$0xff] %vm995_vm3, %v1068_v3 }
 0x305   : > { %1079 = vst.msk [vmem:[%s1811_s27 + $0x48] sm:$0xff] %vm995_vm3, %v1069_v5 }
 0x306 PF: > { %1091 = sbr.rel (!%p1761_p9) target bundleno = 785 (0x311), region = 134  ;;  %v1143_v49 = vld [vmem:[%s1815_s19] sm:$0xff] (%p1761_p9)  ;;  %v1145_v47 = vld [vmem:[%s1815_s19 + $0x8] sm:$0xff] (%p1761_p9)  ;;  %v1147_v52 = vld [vmem:[%s1815_s19 + $0x10] sm:$0xff] (%p1761_p9) }
 0x307   : > { %s1424_s28 = smul.u32 (%p1761_p9), 30, %s1636_s26  ;;  %v1149_v56 = vld [vmem:[%s1815_s19 + $0x18] sm:$0xff] (%p1761_p9)  ;;  %v1151_v57 = vld [vmem:[%s1815_s19 + $0x20] sm:$0xff] (%p1761_p9)  ;;  %v1153_v61 = vld [vmem:[%s1815_s19 + $0x28] sm:$0xff] (%p1761_p9) }
 0x308   : > { %v1155_v2 = vld [vmem:[%s1815_s19 + $0x30] sm:$0xff] (%p1761_p9)  ;;  %v1157_v62 = vld [vmem:[%s1815_s19 + $0x38] sm:$0xff] (%p1761_p9)  ;;  %v1159_v6 = vld [vmem:[%s1815_s19 + $0x40] sm:$0xff] (%p1761_p9) }
 0x309   : > { %s1094_s27 = sadd.s32 (%p1761_p9), %s1632_s25, %s1424_s28  ;;  %v1161_v7 = vld [vmem:[%s1815_s19 + $0x48] sm:$0xff] (%p1761_p9) }
 0x30a   : > { %s1357_s7 = sshll.u32 (%p1761_p9), %s1094_s27, 3 }
 0x30b   : > { %s1096_s16 = scalar_lea.vmem %s2163_s5, %s1357_s7 }
 0x30c   : > { %1144 = vst [vmem:[%s1096_s16] sm:$0xff] %v1143_v49  ;;  %1146 = vst [vmem:[%s1096_s16 + $0x18] sm:$0xff] %v1145_v47 }
 0x30d   : > { %1148 = vst [vmem:[%s1096_s16 + $0x30] sm:$0xff] %v1147_v52  ;;  %1150 = vst [vmem:[%s1096_s16 + $0x48] sm:$0xff] %v1149_v56 }
 0x30e   : > { %1152 = vst [vmem:[%s1096_s16 + $0x60] sm:$0xff] %v1151_v57  ;;  %1154 = vst [vmem:[%s1096_s16 + $0x78] sm:$0xff] %v1153_v61 }
 0x30f   : > { %1156 = vst [vmem:[%s1096_s16 + $0x90] sm:$0xff] %v1155_v2  ;;  %1158 = vst [vmem:[%s1096_s16 + $0xa8] sm:$0xff] %v1157_v62 }
 0x310   : > { %1160 = vst [vmem:[%s1096_s16 + $0xc0] sm:$0xff] %v1159_v6  ;;  %1162 = vst [vmem:[%s1096_s16 + $0xd8] sm:$0xff] %v1161_v7 }
 0x311 PF: > { %s17_s29 = sadd.s32 1, %s1648_s29   ;;  %s2180_s25 = sld [smem:[#allocation11_spill]] }
 0x312   : > { %p14_p4 = scmp.ge.s32.totalorder %s17_s29, 8   ;;  %s2181_s26 = sld [smem:[#allocation7_spill]] }
 0x313   : > { %s2182_s14 = sld [smem:[#allocation8_spill]]  ;;  %s2185_s21 = smov %s1620_s22 }
 0x314   : > { %s2183_s27 = sld [smem:[#allocation9_spill]]  ;;  %s2186_s22 = smov %s1766_s17 }
 0x315   : > { %s2184_s28 = sld [smem:[#allocation10_spill]]  ;;  %s2187_s23 = smov %s1628_s24 }
 0x316   :  { %16 = sbr.rel (!%p14_p4) target bundleno = 8 (0x8), region = 232 }
 0x317   : > { %s2188_s24 = smov %s2180_s25 }
 0x318   : > { %s2189_s25 = smov %s2181_s26 }
 0x319   : > { %s2190_s26 = smov %s2182_s14 }

// kernel: language_model_forward.15
= control target key start
LH: loop header
LB: loop body
LE: loop exit
PB: predicated region body
PF: predicated region fallthrough
CT: control target
= control target key end

     0   :  { %7 = vsyncpa [#allocation4], 0  ;;  %s843_s0 = inlined_call_operand.vmem [shape: f32[160,384], index: 0, kind: input, shape index: {}]   ;;  %s844_s1 = inlined_call_operand.vmem [shape: f32[160,1], index: 1, kind: input, shape index: {}]   ;;  %s845_s2 = inlined_call_operand.hbm [shape: f32[160,384], index: 2, kind: output, shape index: {}]  }
   0x1   :  { %9 = vsyncpa [#allocation4 + $0x1], 0  ;;  %s664_s9 = smov 0   ;;  %s666_s10 = smov 0  }
   0x2   :  { %s668_s11 = smov 0   ;;  %s670_s12 = smov 0  }
   0x3   :  { %s672_s13 = smov 0   ;;  %s674_s14 = smov 0  }
   0x4   :  { %s676_s15 = smov 0   ;;  %s678_s16 = smov 0  }
   0x5 LB: > { %s457_s17 = sadd.s32 4294967295, %s642_s16   ;;  %s458_s18 = sadd.s32 4294967294, %s642_s16   ;;  %s642_s16 = sphi %s678_s16, %s15_s16   ;;  %s638_s15 = sphi %s676_s15, %s855_s15   ;;  %s634_s14 = sphi %s674_s14, %s854_s14   ;;  %s630_s13 = sphi %s672_s13, %s853_s13   ;;  %s626_s12 = sphi %s670_s12, %s852_s12   ;;  %s622_s11 = sphi %s668_s11, %s851_s11   ;;  %s618_s10 = sphi %s666_s10, %s850_s10   ;;  %s614_s9 = sphi %s664_s9, %s849_s9  }
   0x6   : > { %s24_s19 = sadd.s32 1, %s634_s14  ;;  %s27_s20 = sadd.s32 1, %s638_s15 }
   0x7   : > { %p25_p0 = scmp.ge.s32.totalorder %s24_s19, 3  ;;  %p43_p1 = scmp.ne.s32.totalorder %s622_s11, %s618_s10 }
   0x8   : > { %p44_p2 = scmp.eq.s32.totalorder %s642_s16, 0  ;;  %p101_p5 = scmp.eq.s32.totalorder %s457_s17, 5 }
   0x9   : > { %s857_s19 = smov (%p25_p0, %s24_s19), 0  ;;  %s859_s20 = smov (!%p25_p0, %s27_s20), %s638_s15 }
   0xa   : > { %s32_s21 = ssub.s32 %s634_s14, %s857_s19  ;;  %p716_p3 = por %p44_p2, %p43_p1 }
   0xb   : > { %p29_p4 = scmp.ge.s32.totalorder %s859_s20, 2  ;;  %p106_p6 = scmp.ne.s32.totalorder %s618_s10, %s614_s9 }
   0xc   : > { %p107_p7 = scmp.eq.s32.totalorder %s458_s18, 5  ;;  %p724_p8 = por %p101_p5, %p43_p1 }
   0xd   : > { %s861_s20 = smov (%p29_p4, %s859_s20), 0  ;;  %s36_s27 = sadd.s32 1, %s622_s11 }
   0xe   : > { %p728_p9 = por %p107_p7, %p106_p6  ;;  %s31_s25 = ssub.s32 %s638_s15, %s861_s20 }
   0xf   : > { %s33_s26 = sor.u32 %s32_s21, %s31_s25  ;;  %p460_p11 = scmp.ge.s32.totalorder %s642_s16, 6 }
  0x10   : > { %p34_p10 = scmp.eq.s32.totalorder %s33_s26, 0 }
  0x11   : > { %123 = sbr.rel (%p460_p11) target bundleno = 35 (0x23), region = 16 }
  0x12   : > { %s736_s28 = scalar_select %p34_p10, %s622_s11, %s36_s27  }
  0x16   : > { %126 = sbr.rel (!%p716_p3) target bundleno = 35 (0x23), region = 20  ;;  %s128_s29 = sand.u32 (%p716_p3), 1, %s622_s11  }
  0x17   : > { %s467_s30 = smul.u32 (%p716_p3), 80, %s128_s29 }
  0x18   : > { %s477_s3 = smul.u32 (%p716_p3), 30, %s638_s15 }
  0x19   : > { %s130_s17 = scalar_lea.vmem (%p716_p3), [#allocation2], %s467_s30 }
  0x1a   : > { %s133_s4 = sadd.s32 (%p716_p3), %s634_s14, %s477_s3 }
  0x1b   : > { %s461_s5 = sshll.u32 %s133_s4, 3 }
  0x1c   : > { %s135_s8 = scalar_lea.vmem %s843_s0, %s461_s5 }
  0x1d   : > { %v182_v0 = vld [vmem:[%s135_s8] sm:$0xff]  ;;  %v184_v1 = vld [vmem:[%s135_s8 + $0x18] sm:$0xff]  ;;  %v186_v2 = vld [vmem:[%s135_s8 + $0x30] sm:$0xff] }
  0x1e   : > { %183 = vst [vmem:[%s130_s17] sm:$0xff] %v182_v0  ;;  %185 = vst [vmem:[%s130_s17 + $0x8] sm:$0xff] %v184_v1  ;;  %v188_v3 = vld [vmem:[%s135_s8 + $0x48] sm:$0xff]  ;;  %v190_v4 = vld [vmem:[%s135_s8 + $0x60] sm:$0xff] }
  0x1f   : > { %187 = vst [vmem:[%s130_s17 + $0x10] sm:$0xff] %v186_v2  ;;  %v192_v5 = vld [vmem:[%s135_s8 + $0x78] sm:$0xff]  ;;  %189 = vst [vmem:[%s130_s17 + $0x18] sm:$0xff] %v188_v3  ;;  %v194_v6 = vld [vmem:[%s135_s8 + $0x90] sm:$0xff] }
  0x20   : > { %191 = vst [vmem:[%s130_s17 + $0x20] sm:$0xff] %v190_v4  ;;  %193 = vst [vmem:[%s130_s17 + $0x28] sm:$0xff] %v192_v5  ;;  %v196_v7 = vld [vmem:[%s135_s8 + $0xa8] sm:$0xff]  ;;  %v198_v8 = vld [vmem:[%s135_s8 + $0xc0] sm:$0xff] }
  0x21   : > { %195 = vst [vmem:[%s130_s17 + $0x30] sm:$0xff] %v194_v6  ;;  %197 = vst [vmem:[%s130_s17 + $0x38] sm:$0xff] %v196_v7  ;;  %v200_v9 = vld [vmem:[%s135_s8 + $0xd8] sm:$0xff] }
  0x22   : > { %199 = vst [vmem:[%s130_s17 + $0x40] sm:$0xff] %v198_v8  ;;  %201 = vst [vmem:[%s130_s17 + $0x48] sm:$0xff] %v200_v9 }
  0x23 PF: > { %p462_p12 = scmp.ge.s32.totalorder %s642_s16, 1  ;;  %p215_p13 = scmp.lt.s32.totalorder %s642_s16, 7 }
  0x25   : > { %p216_p0 = pnand %p462_p12, %p215_p13 }
  0x26   : > { %s249_s18 = smul.u32 (!%p216_p0), 10, %s630_s13  ;;  %s222_s27 = sand.u32 (!%p216_p0), 1, %s618_s10  }
  0x27   : > { %219 = sbr.rel (%p216_p0) target bundleno = 205 (0xcd), region = 62  ;;  %s792_s17 = scalar_lea.sflag (!%p216_p0), [#allocation4], %s222_s27 }
  0x28   : > { %p250_p1 = scmp.lt.s32.totalorder (!%p216_p0), %s249_s18, 19  ;;  %s469_s29 = smul.u32 (!%p216_p0), 80, %s222_s27 }
  0x29   : > { %s478_s4 = smul.u32 (!%p216_p0), 30, %s630_s13 }
  0x2a   : > { %s756_s30 = scalar_lea.vmem (!%p216_p0), [#allocation2], %s469_s29  ;;  %s762_s3 = scalar_lea.vmem (!%p216_p0), [#allocation3], %s469_s29 }
  0x2b   : > { %s359_s5 = sadd.s32 (!%p216_p0), %s626_s12, %s478_s4  ;;  %s362_s6 = sshll.u32 (!%p216_p0), %s762_s3, 4  ;;  %s779_s6 = int_to_ptr.vmem [resolvable:$true] %s362_s6 }
  0x2c   : > { %v644_v10 = vmov 0   ;;  %s863_s18 = smov (!%p250_p1, %s249_s18), 19  ;;  %v258_v21 = vld [vmem:[%s756_s30 + $0x10] sm:$0xff]  ;;  %v256_v22 = vld [vmem:[%s756_s30] sm:$0xff]  ;;  %v259_v27 = vld [vmem:[%s756_s30 + $0x18] sm:$0xff]  ;;  %s464_s13 = sshll.u32 %s359_s5, 7 }
  0x2d   : > { %549 = vset.pattern.permute.xlu1 %v644_v10  ;;  %548 = vset.pattern.permute.xlu0 %v644_v10  ;;  %s463_s21 = sshll.u32 %s863_s18, 3  ;;  %v257_v28 = vld [vmem:[%s756_s30 + $0x8] sm:$0xff]  ;;  %v260_v34 = vld [vmem:[%s756_s30 + $0x20] sm:$0xff]  ;;  %v263_v39 = vld [vmem:[%s756_s30 + $0x38] sm:$0xff]  ;;  %s786_s8 = scalar_lea.hbm %s845_s2, %s464_s13 }
  0x2e   : > { %s253_s26 = scalar_lea.vmem %s844_s1, %s463_s21  ;;  %v261_v33 = vld [vmem:[%s756_s30 + $0x28] sm:$0xff]  ;;  %v262_v40 = vld [vmem:[%s756_s30 + $0x30] sm:$0xff]  ;;  %v264_v46 = vld [vmem:[%s756_s30 + $0x40] sm:$0xff]  ;;  %s550_s18 = scalar_lea.vmem %s779_s6, 1280 }
  0x2f   : > { %v268_v11 = vld [vmem:[%s253_s26 + $0x10] sm:$0xff]  ;;  %v266_v12 = vld [vmem:[%s253_s26] sm:$0xff]  ;;  %v269_v13 = vld [vmem:[%s253_s26 + $0x18] sm:$0xff]  ;;  %p551_p2 = scmp.ne.s32.totalorder %s779_s6, %s550_s18  ;;  %s645_s21 = smov [#allocation3]  }
  0x30   : > { %288 = vperm.xlu1 %549, %v268_v11   ;;  %278 = vperm.xlu0 %548, %v266_v12   ;;  %v267_v14 = vld [vmem:[%s253_s26 + $0x8] sm:$0xff]  ;;  %v270_v16 = vld [vmem:[%s253_s26 + $0x20] sm:$0xff]  ;;  %v273_v17 = vld [vmem:[%s253_s26 + $0x38] sm:$0xff]  ;;  %s554_s22 = sshll.u32 %s645_s21, 4  ;;  %s555_s22 = int_to_ptr.vmem [resolvable:$false] %s554_s22 }
  0x31   : > { %v271_v15 = vld [vmem:[%s253_s26 + $0x28] sm:$0xff]  ;;  %v272_v18 = vld [vmem:[%s253_s26 + $0x30] sm:$0xff]  ;;  %v274_v20 = vld [vmem:[%s253_s26 + $0x40] sm:$0xff]  ;;  %p552_p3 = pnand %p551_p2, %p724_p8  ;;  %s556_s25 = scalar_lea.vmem %s555_s22, 2560 }
  0x32   : > { %v275_v19 = vld [vmem:[%s253_s26 + $0x48] sm:$0xff]  ;;  %p557_p5 = scmp.lt.s32.totalorder %s779_s6, %s555_s22  ;;  %p558_p6 = scmp.lt.s32.totalorder %s556_s25, %s550_s18 }
  0x33   : > { %v265_v45 = vld [vmem:[%s756_s30 + $0x48] sm:$0xff]  ;;  %p553_p4 = pneg %p552_p3 }
  0x34   : > { %293 = vperm.xlu1 %549, %v269_v13   ;;  %283 = vperm.xlu0 %548, %v267_v14   ;;  %p559_p7 = por %p558_p6, %p557_p5 }
  0x36   : > { %p560_p10 = pnand %p559_p7, %p553_p4 }
  0x38   : > { %303 = vperm.xlu1 %549, %v271_v15   ;;  %298 = vperm.xlu0 %548, %v270_v16  }
  0x3c   : > { %313 = vperm.xlu1 %549, %v273_v17   ;;  %308 = vperm.xlu0 %548, %v272_v18  }
  0x40   : > { %323 = vperm.xlu1 %549, %v275_v19   ;;  %318 = vperm.xlu0 %548, %v274_v20  }
  0xab   : > { %v289_v23 = vpop.permute.xlu1 %288  ;;  %v279_v24 = vpop.permute.xlu0 %278 }
  0xac   : > { %v328_v25 = vsub.f32 %v258_v21, %v289_v23  ;;  %v326_v26 = vsub.f32 %v256_v22, %v279_v24 }
  0xae   : > { %338 = vst [vmem:[%s762_s3 + $0x10] sm:$0xff] %v328_v25  ;;  %336 = vst [vmem:[%s762_s3] sm:$0xff] %v326_v26 }
  0xaf   : > { %v294_v29 = vpop.permute.xlu1 %293  ;;  %v284_v30 = vpop.permute.xlu0 %283 }
  0xb0   : > { %v329_v31 = vsub.f32 %v259_v27, %v294_v29  ;;  %v327_v32 = vsub.f32 %v257_v28, %v284_v30 }
  0xb2   : > { %339 = vst [vmem:[%s762_s3 + $0x18] sm:$0xff] %v329_v31  ;;  %337 = vst [vmem:[%s762_s3 + $0x8] sm:$0xff] %v327_v32 }
  0xb3   : > { %v304_v35 = vpop.permute.xlu1 %303  ;;  %v299_v36 = vpop.permute.xlu0 %298 }
  0xb4   : > { %v331_v37 = vsub.f32 %v261_v33, %v304_v35  ;;  %v330_v38 = vsub.f32 %v260_v34, %v299_v36 }
  0xb6   : > { %341 = vst [vmem:[%s762_s3 + $0x28] sm:$0xff] %v331_v37  ;;  %340 = vst [vmem:[%s762_s3 + $0x20] sm:$0xff] %v330_v38 }
  0xb7   : > { %v314_v41 = vpop.permute.xlu1 %313  ;;  %v309_v42 = vpop.permute.xlu0 %308 }
  0xb8   : > { %v333_v43 = vsub.f32 %v263_v39, %v314_v41  ;;  %v332_v44 = vsub.f32 %v262_v40, %v309_v42 }
  0xba   : > { %343 = vst [vmem:[%s762_s3 + $0x38] sm:$0xff] %v333_v43  ;;  %342 = vst [vmem:[%s762_s3 + $0x30] sm:$0xff] %v332_v44 }
  0xbb   : > { %v324_v47 = vpop.permute.xlu1 %323  ;;  %v319_v48 = vpop.permute.xlu0 %318 }
  0xbc   : > { %v335_v49 = vsub.f32 %v265_v45, %v324_v47  ;;  %v334_v50 = vsub.f32 %v264_v46, %v319_v48 }
  0xbe   : > { %345 = vst [vmem:[%s762_s3 + $0x48] sm:$0xff] %v335_v49  ;;  %344 = vst [vmem:[%s762_s3 + $0x40] sm:$0xff] %v334_v50 }
  0xbf   : > { %563 = shalt.err (!%p560_p10)
}
  0xc0   : > { %s564_s26 = scalar_lea.hbm %s786_s8, 1280  ;;  %s568_s30 = scalar_lea.hbm %s845_s2, 7680 }
  0xc1   : > { %p565_p11 = scmp.ne.s32.totalorder %s786_s8, %s564_s26  ;;  %p569_p0 = scmp.lt.s32.totalorder %s786_s8, %s845_s2 }
  0xc2   : > { %p570_p1 = scmp.lt.s32.totalorder %s568_s30, %s564_s26 }
  0xc3   : > { %p566_p12 = pnand %p565_p11, %p724_p8 }
  0xc4   : > { %p571_p2 = por %p570_p1, %p569_p0 }
  0xc5   : > { %p567_p13 = pneg %p566_p12 }
  0xc7   : > { %p572_p3 = pnand %p571_p2, %p567_p13 }
  0xc9   : > { %575 = shalt.err (!%p572_p3)
}
  0xca   : > { %s646_s5 = smov 128   ;;  %s647_s13 = smov 384  }
  0xcb   : > { %s648_s12 = smov 8  }
  0xcc   : > { %471 = dma.vmem_to_hbm [thread:$0]  (%p724_p8), %s779_s6, 1280, %s786_s8, %s792_s17, %s646_s5, %s647_s13, %s648_s12  }
  0xcd PF: > { %p479_p4 = scmp.ge.s32.totalorder %s642_s16, 2  ;;  %s377_s7 = sand.u32 1, %s614_s9  }
  0xce   : > { %s378_s18 = scalar_lea.sflag [#allocation4], %s377_s7 }
  0xcf   : > { %p474_p5 = pnand %p479_p4, %p728_p9 }
  0xd1   : > { %p475_p6 = pneg %p474_p5 }
  0xd3   : > { %609 = dma.done.wait (%p475_p6), %s378_s18, 1280  }
  0xd4   : > { %611 = vsyncadd (%p475_p6), %s378_s18, 4294966016  ;;  %s15_s16 = sadd.s32 1, %s642_s16   ;;  %s849_s9 = smov %s618_s10 }
  0xd5   : > { %p12_p7 = scmp.ge.s32.totalorder %s15_s16, 8   ;;  %s850_s10 = smov %s622_s11 }
  0xd6   : > { %s851_s11 = smov %s736_s28  ;;  %s852_s12 = smov %s634_s14 }
  0xd7   : > { %s853_s13 = smov %s638_s15  ;;  %s854_s14 = smov %s857_s19 }
  0xd8   : > { %s855_s15 = smov %s861_s20  ;;  %14 = sbr.rel (!%p12_p7) target bundleno = 5 (0x5), region = 109 }
  0xdd   :  { %383 = vsyncpa [#allocation4], 1 }
  0xde   :  { %385 = vsyncpa [#allocation4 + $0x1], 1 }

// kernel: language_model_forward.10
= control target key start
LH: loop header
LB: loop body
LE: loop exit
PB: predicated region body
PF: predicated region fallthrough
CT: control target
= control target key end

     0   :  { %s2241_s18 = smov 0   ;;  %s2666_s0 = inlined_call_operand.vmem [shape: bf16[24,8,128], index: 0, kind: input, shape index: {}]   ;;  %s2667_s1 = inlined_call_operand.vmem [shape: bf16[24,8,128], index: 1, kind: input, shape index: {}]   ;;  %s2668_s2 = inlined_call_operand.vmem [shape: bf16[32,128], index: 2, kind: input, shape index: {}]   ;;  %s2669_s3 = inlined_call_operand.vmem [shape: bf16[32,128], index: 3, kind: input, shape index: {}]   ;;  %s2670_s4 = inlined_call_operand.vmem [shape: bf16[24,8,32], index: 4, kind: output, shape index: {0}]   ;;  %s2671_s5 = inlined_call_operand.vmem [shape: bf16[24,8,32], index: 5, kind: output, shape index: {1}]  }
   0x1 LB: > { %s1763_s19 = sadd.s32 4294967295, %s2203_s18   ;;  %p1767_p0 = scmp.ge.s32.totalorder %s2203_s18, 1  ;;  %s2203_s18 = sphi %s2241_s18, %s16_s18  }
   0x2   : > { %p208_p1 = scmp.lt.s32.totalorder %s2203_s18, 4 }
   0x4   : > { %p209_p2 = pnand %p1767_p0, %p208_p1 }
   0x5   : > { %s1768_s20 = sshll.u32 (!%p209_p2), %s1763_s19, 3  ;;  %s254_s21 = ssub.s32 (!%p209_p2), 2, %s1763_s19 }
   0x6   : > { %212 = sbr.rel (%p209_p2) target bundleno = 5569 (0x15c1), region = 36  ;;  %p249_p3 = scmp.lt.s32.totalorder (!%p209_p2), %s1768_s20, 23 }
   0x7   : > { %s1770_s22 = sshll.u32 (!%p209_p2), %s254_s21, 3  ;;  %p1776_p5 = scmp.ne.s32.totalorder (!%p209_p2), %s1763_s19, 0 }
   0x8   : > { %p256_p4 = scmp.lt.s32.totalorder (!%p209_p2), %s1770_s22, 23 }
   0xb   : > { %s2673_s20 = smov (!%p249_p3, %s1768_s20), 23  ;;  %s2675_s22 = smov (!%p256_p4, %s1770_s22), 23 }
   0xc   : > { %s1769_s23 = sshll.u32 %s2673_s20, 2  ;;  %s1771_s27 = sshll.u32 %s2675_s22, 2 }
   0xd   : > { %s2252_s26 = scalar_lea.vmem %s2666_s0, %s1769_s23  ;;  %s2257_s30 = scalar_lea.vmem %s2667_s1, %s1771_s27 }
   0xe   : > { %s2262_s8 = scalar_lea.vmem %s2670_s4, %s1769_s23  ;;  %s2267_s11 = scalar_lea.vmem %s2671_s5, %s1771_s27 }
   0xf   : > { %280 = sbr.rel (%p1776_p5) target bundleno = 23 (0x17), region = 40 }
  0x14   : > { %vm281_vm0 = vcmask 261120   ;;  %v2205_v0 = vmov 0.0  }
  0x15   : > { %282 = vst.msk [vmem:[#allocation2] sm:$0xff] %vm281_vm0, %v2205_v0  ;;  %283 = vst.msk [vmem:[#allocation3] sm:$0xff] %vm281_vm0, %v2205_v0 }
  0x16   : > { %284 = vst.msk [vmem:[#allocation4] sm:$0xff] %vm281_vm0, %v2205_v0  ;;  %285 = vst.msk [vmem:[#allocation5] sm:$0xff] %vm281_vm0, %v2205_v0 }
  0x17 PF: > { %v2272_v1 = vld [vmem:[%s2668_s2 + $0x8] sm:$0xff]   ;;  %v2206_v2 = vmov 0.0   ;;  %v2285_v4 = vld [vmem:[%s2668_s2] sm:$0xff]   ;;  %vm2207_vm1 = vmmov 0   ;;  %s2208_s21 = smov 32   ;;  %vm311_vm2 = vcmask 261120  }
  0x18   : > { %1923 = vmatprep.subr.bf16.mxu0 %v2206_v2  ;;  %1931 = vmatprep.subr.bf16.mxu1 %v2206_v2  ;;  %v2279_v3 = vld [vmem:[%s2669_s3 + $0x8] sm:$0xff]   ;;  %v2294_v5 = vld [vmem:[%s2669_s3] sm:$0xff]   ;;  %v2323_v13 = vld [vmem:[%s2257_s30 + $0x18] sm:$0xff]   ;;  %s2209_s22 = smov 64   ;;  %s2210_s23 = smov 96   ;;  %vm481_vm3 = vcmask 257024  }
  0x19   : > { %1924 = vmatpush3.bf16.msra.mxu0 %v2272_v1  ;;  %1927 = vmatprep.mubr.msk.bf16.mxu0 %vm2207_vm1, %v2206_v2  ;;  %v2320_v12 = vld [vmem:[%s2252_s26] sm:$0xff]   ;;  %v416_v15 = vunpack.c.h.bf16 %v2323_v13  ;;  %v588_v61 = vunpack.c.l.bf16 %v2323_v13 }
  0x1a   : > { %1932 = vmatpush3.bf16.msra.mxu1 %v2279_v3  ;;  %1925 = vmatprep.subr.bf16.mxu0 %v2206_v2  ;;  %v412_v14 = vunpack.c.l.bf16 %v2320_v12  ;;  %v584_v58 = vunpack.c.h.bf16 %v2320_v12 }
  0x1b   : > { %1933 = vmatprep.subr.bf16.mxu1 %v2206_v2  ;;  %1935 = vmatprep.mubr.msk.bf16.mxu1 %vm2207_vm1, %v2206_v2 }
  0x1c   : > { %v294_v6 = vld [vmem:[#allocation2] sm:$0xff]  ;;  %v295_v8 = vld [vmem:[#allocation3] sm:$0xff] }
  0x1d   : > { %v296_v7 = vld [vmem:[#allocation4] sm:$0xff]  ;;  %v298_v9 = vpack.c.bf16 %v294_v6, %v294_v6  ;;  %426 = vrot.lane.b32.xlu1 %v295_v8, %s2208_s21  ;;  %1926 = vmatpush3.bf16.msra.mxu0 %v2285_v4  ;;  %v297_v11 = vld [vmem:[#allocation5] sm:$0xff] }
  0x1e   : > { %v355_v10 = vpack.c.bf16 %v296_v7, %v296_v7  ;;  %1934 = vmatpush3.bf16.msra.mxu1 %v2294_v5  ;;  %1939 = vmatprep.subr.bf16.mxu0 %v2206_v2 }
  0x1f   : > { %1947 = vmatprep.subr.bf16.mxu1 %v2206_v2 }
  0x20   : > { %1928 = vmatmul.mubr.msk.bf16.vlgmr.msra.gmra.mxu0 %vm311_vm2, %v298_v9 }
  0x21   : > { %454 = vrot.lane.b32.xlu1 %v297_v11, %s2208_s21  ;;  %1936 = vmatmul.mubr.msk.bf16.vlgmr.msra.gmra.mxu1 %vm311_vm2, %v355_v10 }
  0x22   : > { %1940 = vmatpush3.bf16.msra.mxu0 %v2272_v1  ;;  %1948 = vmatpush3.bf16.msra.mxu1 %v2279_v3 }
  0x23   : > { %1941 = vmatprep.subr.bf16.mxu0 %v2206_v2  ;;  %1943 = vmatprep.mubr.msk.bf16.mxu0 %vm2207_vm1, %v2206_v2 }
  0x24   : > { %1949 = vmatprep.subr.bf16.mxu1 %v2206_v2  ;;  %1951 = vmatprep.mubr.msk.bf16.mxu1 %vm2207_vm1, %v2206_v2 }
  0x26   : > { %1942 = vmatpush3.bf16.msra.mxu0 %v2285_v4  ;;  %1950 = vmatpush3.bf16.msra.mxu1 %v2294_v5 }
  0x27   : > { %1955 = vmatprep.subr.bf16.mxu0 %v2206_v2  ;;  %1963 = vmatprep.subr.bf16.mxu1 %v2206_v2 }
  0x8f   : > { %v427_v40 = vpop.permute.xlu1 %426 }
  0x93   : > { %v455_v42 = vpop.permute.xlu1 %454 }
  0xe0   : > { %v349_v16 = vpop.f32.mrf.mxu0 }
  0xe1   : > { %v413_v17 = vadd.f32 %v412_v14, %v349_v16  ;;  %v405_v18 = vpop.f32.mrf.mxu1 }
  0xe2   : > { %v417_v19 = vadd.f32 %v416_v15, %v405_v18  ;;  %v1929_v20 = vpop.f32.mrf.mxu0 }
  0xe3   : > { %2069 = vtanh.f32 %v413_v17  ;;  %v1937_v21 = vpop.f32.mrf.mxu1  ;;  %v1784_v28 = vmul.f32 -1.442695, %v413_v17 }
  0xe4   : > { %v352_v22 = vpop.f32.mrf.mxu0  ;;  %2071 = vtanh.f32 %v417_v19  ;;  %v1785_v29 = vmul.f32 -1.442695, %v417_v19 }
  0xe5   : > { %v408_v23 = vpop.f32.mrf.mxu1  ;;  %2073 = vpow2.f32 %v1784_v28 }
  0xe6   : > { %v1930_v24 = vpop.f32.mrf.mxu0  ;;  %2075 = vpow2.f32 %v1785_v29 }
  0xe7   : > { %v1938_v25 = vpop.f32.mrf.mxu1 }
  0xf0   : > { %v2070_v26 = vpop.eup %2069 }
  0xf1   : > { %431 = vrot.lane.b32.xlu0 %v2070_v26, %s2209_s22  ;;  %v2072_v27 = vpop.eup %2071 }
  0xf2   : > { %v2074_v30 = vpop.eup %2073 }
  0xf3   : > { %v421_v31 = vadd.f32 1.0, %v2074_v30  ;;  %v2076_v32 = vpop.eup %2075 }
  0xf4   : > { %v449_v33 = vadd.f32 1.0, %v2076_v32 }
  0xf5   : > { %459 = vrot.lane.b32.xlu0 %v2072_v27, %s2209_s22  ;;  %2077 = vrcp.f32 %v421_v31 }
  0xf6   : > { %2079 = vrcp.f32 %v449_v33 }
 0x102   : > { %v2078_v34 = vpop.eup %2077 }
 0x103   : > { %v2080_v37 = vpop.eup %2079  ;;  %v429_v41 = vmul.f32 %v2078_v34, %v427_v40 }
 0x104   : > { %v457_v45 = vmul.f32 %v2080_v37, %v455_v42 }
 0x163   : > { %v432_v35 = vpop.permute.xlu0 %431 }
 0x164   : > { %v434_v36 = vmul.f32 %v2078_v34, %v432_v35 }
 0x166   : > { %436 = vrot.lane.b32.xlu0 %v434_v36, %s2208_s21 }
 0x167   : > { %v460_v38 = vpop.permute.xlu0 %459 }
 0x168   : > { %v462_v39 = vmul.f32 %v2080_v37, %v460_v38 }
 0x16a   : > { %464 = vrot.lane.b32.xlu1 %v462_v39, %s2208_s21 }
 0x1d8   : > { %v437_v43 = vpop.permute.xlu0 %436 }
 0x1d9   : > { %v2331_v44 = vadd.f32 %v437_v43, %v429_v41  ;;  %v2400_v41 = vld [vmem:[%s2252_s26 + $0x8] sm:$0xff]   ;;  %v2404_v43 = vld [vmem:[%s2257_s30 + $0x10] sm:$0xff]  }
 0x1da   : > { %v748_v42 = vunpack.c.l.bf16 %v2400_v41 }
 0x1db   : > { %2081 = vtanh.f32 %v2331_v44 }
 0x1dc   : > { %v465_v46 = vpop.permute.xlu1 %464 }
 0x1dd   : > { %v2334_v47 = vadd.f32 %v465_v46, %v457_v45  ;;  %v752_v46 = vunpack.c.h.bf16 %v2404_v43 }
 0x1df   : > { %2083 = vtanh.f32 %v2334_v47 }
 0x1e8   : > { %v2082_v48 = vpop.eup %2081 }
 0x1e9   : > { %442 = vrot.lane.b32.xlu0 %v2082_v48, %s2209_s22 }
 0x1ec   : > { %v2084_v49 = vpop.eup %2083 }
 0x1ed   : > { %470 = vrot.lane.b32.xlu1 %v2084_v49, %s2209_s22 }
 0x25b   : > { %v443_v50 = vpop.permute.xlu0 %442 }
 0x25c   : > { %v445_v51 = vmul.f32 %v2078_v34, %v443_v50 }
 0x25e   : > { %v2339_v52 = vpack.c.bf16 %v445_v51, %v445_v51 }
 0x25f   : > { %v471_v53 = vpop.permute.xlu1 %470 }
 0x260   : > { %v473_v54 = vmul.f32 %v2080_v37, %v471_v53  ;;  %492 = vrot.lane.b32.xlu0 %v2339_v52, %s2208_s21 }
 0x262   : > { %v2343_v55 = vpack.c.bf16 %v473_v54, %v473_v54 }
 0x264   : > { %537 = vrot.lane.b32.xlu1 %v2343_v55, %s2208_s21 }
 0x2d2   : > { %v493_v56 = vpop.permute.xlu0 %492 }
 0x2d3   : > { %1944 = vmatmul.mubr.msk.bf16.vlgmr.msra.gmra.mxu0 %vm311_vm2, %v493_v56 }
 0x2d4   : > { %1956 = vmatpush3.bf16.msra.mxu0 %v2272_v1  ;;  %1959 = vmatprep.mubr.msk.bf16.mxu0 %vm2207_vm1, %v2206_v2 }
 0x2d5   : > { %1957 = vmatprep.subr.bf16.mxu0 %v2206_v2 }
 0x2d6   : > { %v538_v57 = vpop.permute.xlu1 %537 }
 0x2d7   : > { %1952 = vmatmul.mubr.msk.bf16.vlgmr.msra.gmra.mxu1 %vm311_vm2, %v538_v57 }
 0x2d8   : > { %1964 = vmatpush3.bf16.msra.mxu1 %v2279_v3  ;;  %1958 = vmatpush3.bf16.msra.mxu0 %v2285_v4 }
 0x2d9   : > { %1965 = vmatprep.subr.bf16.mxu1 %v2206_v2  ;;  %1967 = vmatprep.mubr.msk.bf16.mxu1 %vm2207_vm1, %v2206_v2 }
 0x2da   : > { %1971 = vmatprep.subr.bf16.mxu0 %v2206_v2 }
 0x2dc   : > { %1966 = vmatpush3.bf16.msra.mxu1 %v2294_v5 }
 0x2dd   : > { %1979 = vmatprep.subr.bf16.mxu1 %v2206_v2 }
 0x393   : > { %v531_v59 = vpop.f32.mrf.mxu0 }
 0x394   : > { %v585_v60 = vadd.f32 %v584_v58, %v531_v59 }
 0x395   : > { %v1945_v62 = vpop.f32.mrf.mxu0 }
 0x396   : > { %2085 = vtanh.f32 %v585_v60  ;;  %v1793_v12 = vmul.f32 -1.442695, %v585_v60 }
 0x397   : > { %v534_v63 = vpop.f32.mrf.mxu0  ;;  %v576_v0 = vpop.f32.mrf.mxu1 }
 0x398   : > { %v589_v6 = vadd.f32 %v588_v61, %v576_v0 }
 0x399   : > { %v1946_v7 = vpop.f32.mrf.mxu0  ;;  %v1953_v8 = vpop.f32.mrf.mxu1 }
 0x39a   : > { %2087 = vtanh.f32 %v589_v6  ;;  %v1794_v15 = vmul.f32 -1.442695, %v589_v6 }
 0x39b   : > { %v579_v9 = vpop.f32.mrf.mxu1  ;;  %2089 = vpow2.f32 %v1793_v12 }
 0x39c   : > { %2091 = vpow2.f32 %v1794_v15 }
 0x39d   : > { %v1954_v10 = vpop.f32.mrf.mxu1 }
 0x3a3   : > { %v2086_v11 = vpop.eup %2085 }
 0x3a4   : > { %599 = vrot.lane.b32.xlu0 %v2086_v11, %s2209_s22 }
 0x3a7   : > { %v2088_v14 = vpop.eup %2087 }
 0x3a8   : > { %623 = vrot.lane.b32.xlu1 %v2088_v14, %s2209_s22  ;;  %v2090_v13 = vpop.eup %2089 }
 0x3a9   : > { %v593_v16 = vadd.f32 1.0, %v2090_v13  ;;  %v2092_v17 = vpop.eup %2091 }
 0x3aa   : > { %v617_v18 = vadd.f32 1.0, %v2092_v17 }
 0x3ab   : > { %2093 = vrcp.f32 %v593_v16 }
 0x3ac   : > { %2095 = vrcp.f32 %v617_v18 }
 0x3b8   : > { %v2094_v19 = vpop.eup %2093 }
 0x3b9   : > { %v2096_v22 = vpop.eup %2095  ;;  %v597_v25 = vmul.f32 %v2094_v19, %v2331_v44 }
 0x3ba   : > { %v621_v28 = vmul.f32 %v2096_v22, %v2334_v47 }
 0x416   : > { %v600_v20 = vpop.permute.xlu0 %599 }
 0x417   : > { %v602_v21 = vmul.f32 %v2094_v19, %v600_v20 }
 0x419   : > { %604 = vrot.lane.b32.xlu0 %v602_v21, %s2208_s21 }
 0x41a   : > { %v624_v23 = vpop.permute.xlu1 %623 }
 0x41b   : > { %v626_v24 = vmul.f32 %v2096_v22, %v624_v23 }
 0x41d   : > { %628 = vrot.lane.b32.xlu1 %v626_v24, %s2208_s21 }
 0x48b   : > { %v605_v26 = vpop.permute.xlu0 %604 }
 0x48c   : > { %v2368_v27 = vadd.f32 %v605_v26, %v597_v25 }
 0x48e   : > { %2097 = vtanh.f32 %v2368_v27 }
 0x48f   : > { %v629_v29 = vpop.permute.xlu1 %628 }
 0x490   : > { %v2372_v30 = vadd.f32 %v629_v29, %v621_v28  ;;  %v912_v28 = vunpack.c.h.bf16 %v2400_v41 }
 0x492   : > { %2099 = vtanh.f32 %v2372_v30 }
 0x49b   : > { %v2098_v31 = vpop.eup %2097 }
 0x49c   : > { %610 = vrot.lane.b32.xlu0 %v2098_v31, %s2209_s22  ;;  %v916_v31 = vunpack.c.l.bf16 %v2404_v43 }
 0x49f   : > { %v2100_v32 = vpop.eup %2099 }
 0x4a0   : > { %634 = vrot.lane.b32.xlu1 %v2100_v32, %s2209_s22 }
 0x50e   : > { %v611_v33 = vpop.permute.xlu0 %610 }
 0x50f   : > { %v613_v34 = vmul.f32 %v2094_v19, %v611_v33 }
 0x511   : > { %v2377_v35 = vpack.c.bf16 %v613_v34, %v613_v34 }
 0x512   : > { %v635_v36 = vpop.permute.xlu1 %634 }
 0x513   : > { %v637_v37 = vmul.f32 %v2096_v22, %v635_v36  ;;  %656 = vrot.lane.b32.xlu0 %v2377_v35, %s2208_s21 }
 0x515   : > { %v2381_v38 = vpack.c.bf16 %v637_v37, %v637_v37 }
 0x517   : > { %701 = vrot.lane.b32.xlu1 %v2381_v38, %s2208_s21 }
 0x585   : > { %v657_v39 = vpop.permute.xlu0 %656 }
 0x586   : > { %1960 = vmatmul.mubr.msk.bf16.vlgmr.msra.gmra.mxu0 %vm311_vm2, %v657_v39 }
 0x587   : > { %1972 = vmatpush3.bf16.msra.mxu0 %v2272_v1  ;;  %1975 = vmatprep.mubr.msk.bf16.mxu0 %vm2207_vm1, %v2206_v2 }
 0x588   : > { %1973 = vmatprep.subr.bf16.mxu0 %v2206_v2 }
 0x589   : > { %v702_v40 = vpop.permute.xlu1 %701 }
 0x58a   : > { %1968 = vmatmul.mubr.msk.bf16.vlgmr.msra.gmra.mxu1 %vm311_vm2, %v702_v40 }
 0x58b   : > { %1980 = vmatpush3.bf16.msra.mxu1 %v2279_v3  ;;  %1974 = vmatpush3.bf16.msra.mxu0 %v2285_v4 }
 0x58c   : > { %1981 = vmatprep.subr.bf16.mxu1 %v2206_v2  ;;  %1983 = vmatprep.mubr.msk.bf16.mxu1 %vm2207_vm1, %v2206_v2 }
 0x58d   : > { %1987 = vmatprep.subr.bf16.mxu0 %v2206_v2 }
 0x58f   : > { %1982 = vmatpush3.bf16.msra.mxu1 %v2294_v5 }
 0x590   : > { %1995 = vmatprep.subr.bf16.mxu1 %v2206_v2 }
 0x646   : > { %v695_v44 = vpop.f32.mrf.mxu0 }
 0x647   : > { %v749_v45 = vadd.f32 %v748_v42, %v695_v44 }
 0x648   : > { %v1961_v47 = vpop.f32.mrf.mxu0 }
 0x649   : > { %2101 = vtanh.f32 %v749_v45  ;;  %v1803_v59 = vmul.f32 -1.442695, %v749_v45 }
 0x64a   : > { %v698_v48 = vpop.f32.mrf.mxu0  ;;  %v740_v49 = vpop.f32.mrf.mxu1 }
 0x64b   : > { %v753_v50 = vadd.f32 %v752_v46, %v740_v49 }
 0x64c   : > { %v1962_v51 = vpop.f32.mrf.mxu0  ;;  %v1969_v53 = vpop.f32.mrf.mxu1 }
 0x64d   : > { %2103 = vtanh.f32 %v753_v50  ;;  %v1804_v60 = vmul.f32 -1.442695, %v753_v50 }
 0x64e   : > { %v743_v54 = vpop.f32.mrf.mxu1  ;;  %2105 = vpow2.f32 %v1803_v59 }
 0x64f   : > { %2107 = vpow2.f32 %v1804_v60 }
 0x650   : > { %v1970_v56 = vpop.f32.mrf.mxu1 }
 0x656   : > { %v2102_v57 = vpop.eup %2101 }
 0x657   : > { %763 = vrot.lane.b32.xlu0 %v2102_v57, %s2209_s22 }
 0x65a   : > { %v2104_v58 = vpop.eup %2103 }
 0x65b   : > { %787 = vrot.lane.b32.xlu1 %v2104_v58, %s2209_s22  ;;  %v2106_v61 = vpop.eup %2105 }
 0x65c   : > { %v757_v62 = vadd.f32 1.0, %v2106_v61  ;;  %v2108_v63 = vpop.eup %2107 }
 0x65d   : > { %v781_v0 = vadd.f32 1.0, %v2108_v63 }
 0x65e   : > { %2109 = vrcp.f32 %v757_v62 }
 0x65f   : > { %2111 = vrcp.f32 %v781_v0 }
 0x66b   : > { %v2110_v6 = vpop.eup %2109 }
 0x66c   : > { %v2112_v9 = vpop.eup %2111  ;;  %v761_v14 = vmul.f32 %v2110_v6, %v2368_v27 }
 0x66d   : > { %v785_v13 = vmul.f32 %v2112_v9, %v2372_v30 }
 0x6c9   : > { %v764_v7 = vpop.permute.xlu0 %763 }
 0x6ca   : > { %v766_v8 = vmul.f32 %v2110_v6, %v764_v7 }
 0x6cc   : > { %768 = vrot.lane.b32.xlu0 %v766_v8, %s2208_s21 }
 0x6cd   : > { %v788_v10 = vpop.permute.xlu1 %787 }
 0x6ce   : > { %v790_v11 = vmul.f32 %v2112_v9, %v788_v10 }
 0x6d0   : > { %792 = vrot.lane.b32.xlu1 %v790_v11, %s2208_s21 }
 0x73e   : > { %v769_v12 = vpop.permute.xlu0 %768 }
 0x73f   : > { %v2412_v15 = vadd.f32 %v769_v12, %v761_v14 }
 0x741   : > { %2113 = vtanh.f32 %v2412_v15 }
 0x742   : > { %v793_v16 = vpop.permute.xlu1 %792 }
 0x743   : > { %v2416_v17 = vadd.f32 %v793_v16, %v785_v13  ;;  %v2482_v13 = vld [vmem:[%s2252_s26 + $0x10] sm:$0xff]  }
 0x744   : > { %v1076_v16 = vunpack.c.l.bf16 %v2482_v13 }
 0x745   : > { %2115 = vtanh.f32 %v2416_v17 }
 0x74e   : > { %v2114_v18 = vpop.eup %2113 }
 0x74f   : > { %774 = vrot.lane.b32.xlu0 %v2114_v18, %s2209_s22 }
 0x752   : > { %v2116_v19 = vpop.eup %2115 }
 0x753   : > { %798 = vrot.lane.b32.xlu1 %v2116_v19, %s2209_s22 }
 0x7c1   : > { %v775_v20 = vpop.permute.xlu0 %774 }
 0x7c2   : > { %v777_v21 = vmul.f32 %v2110_v6, %v775_v20 }
 0x7c4   : > { %v2421_v22 = vpack.c.bf16 %v777_v21, %v777_v21 }
 0x7c5   : > { %v799_v23 = vpop.permute.xlu1 %798 }
 0x7c6   : > { %v801_v24 = vmul.f32 %v2112_v9, %v799_v23  ;;  %820 = vrot.lane.b32.xlu0 %v2421_v22, %s2208_s21 }
 0x7c8   : > { %v2425_v25 = vpack.c.bf16 %v801_v24, %v801_v24 }
 0x7ca   : > { %865 = vrot.lane.b32.xlu1 %v2425_v25, %s2208_s21 }
 0x838   : > { %v821_v26 = vpop.permute.xlu0 %820 }
 0x839   : > { %1976 = vmatmul.mubr.msk.bf16.vlgmr.msra.gmra.mxu0 %vm311_vm2, %v821_v26 }
 0x83a   : > { %1988 = vmatpush3.bf16.msra.mxu0 %v2272_v1  ;;  %1991 = vmatprep.mubr.msk.bf16.mxu0 %vm2207_vm1, %v2206_v2 }
 0x83b   : > { %1989 = vmatprep.subr.bf16.mxu0 %v2206_v2 }
 0x83c   : > { %v866_v27 = vpop.permute.xlu1 %865 }
 0x83d   : > { %1984 = vmatmul.mubr.msk.bf16.vlgmr.msra.gmra.mxu1 %vm311_vm2, %v866_v27 }
 0x83e   : > { %1996 = vmatpush3.bf16.msra.mxu1 %v2279_v3  ;;  %1990 = vmatpush3.bf16.msra.mxu0 %v2285_v4 }
 0x83f   : > { %1997 = vmatprep.subr.bf16.mxu1 %v2206_v2  ;;  %1999 = vmatprep.mubr.msk.bf16.mxu1 %vm2207_vm1, %v2206_v2 }
 0x840   : > { %2003 = vmatprep.subr.bf16.mxu0 %v2206_v2 }
 0x842   : > { %1998 = vmatpush3.bf16.msra.mxu1 %v2294_v5 }
 0x843   : > { %2011 = vmatprep.subr.bf16.mxu1 %v2206_v2 }
 0x8f9   : > { %v859_v29 = vpop.f32.mrf.mxu0 }
 0x8fa   : > { %v913_v30 = vadd.f32 %v912_v28, %v859_v29 }
 0x8fb   : > { %v1977_v32 = vpop.f32.mrf.mxu0 }
 0x8fc   : > { %2117 = vtanh.f32 %v913_v30  ;;  %v1813_v41 = vmul.f32 -1.442695, %v913_v30 }
 0x8fd   : > { %v862_v33 = vpop.f32.mrf.mxu0  ;;  %v904_v34 = vpop.f32.mrf.mxu1 }
 0x8fe   : > { %v917_v36 = vadd.f32 %v916_v31, %v904_v34 }
 0x8ff   : > { %v1978_v37 = vpop.f32.mrf.mxu0  ;;  %v1985_v39 = vpop.f32.mrf.mxu1 }
 0x900   : > { %2119 = vtanh.f32 %v917_v36  ;;  %v1814_v46 = vmul.f32 -1.442695, %v917_v36 }
 0x901   : > { %v907_v40 = vpop.f32.mrf.mxu1  ;;  %2121 = vpow2.f32 %v1813_v41 }
 0x902   : > { %2123 = vpow2.f32 %v1814_v46 }
 0x903   : > { %v1986_v42 = vpop.f32.mrf.mxu1 }
 0x909   : > { %v2118_v44 = vpop.eup %2117 }
 0x90a   : > { %927 = vrot.lane.b32.xlu0 %v2118_v44, %s2209_s22 }
 0x90d   : > { %v2120_v45 = vpop.eup %2119 }
 0x90e   : > { %951 = vrot.lane.b32.xlu1 %v2120_v45, %s2209_s22  ;;  %v2122_v43 = vpop.eup %2121 }
 0x90f   : > { %v921_v47 = vadd.f32 1.0, %v2122_v43  ;;  %v2124_v48 = vpop.eup %2123 }
 0x910   : > { %v945_v49 = vadd.f32 1.0, %v2124_v48 }
 0x911   : > { %2125 = vrcp.f32 %v921_v47 }
 0x912   : > { %2127 = vrcp.f32 %v945_v49 }
 0x91e   : > { %v2126_v50 = vpop.eup %2125 }
 0x91f   : > { %v2128_v54 = vpop.eup %2127  ;;  %v925_v58 = vmul.f32 %v2126_v50, %v2412_v15 }
 0x920   : > { %v949_v61 = vmul.f32 %v2128_v54, %v2416_v17  ;;  %v2486_v17 = vld [vmem:[%s2257_s30 + $0x8] sm:$0xff]  }
 0x921   : > { %v1080_v20 = vunpack.c.h.bf16 %v2486_v17 }
 0x97c   : > { %v928_v51 = vpop.permute.xlu0 %927 }
 0x97d   : > { %v930_v53 = vmul.f32 %v2126_v50, %v928_v51 }
 0x97f   : > { %932 = vrot.lane.b32.xlu0 %v930_v53, %s2208_s21 }
 0x980   : > { %v952_v56 = vpop.permute.xlu1 %951 }
 0x981   : > { %v954_v57 = vmul.f32 %v2128_v54, %v952_v56 }
 0x983   : > { %956 = vrot.lane.b32.xlu1 %v954_v57, %s2208_s21 }
 0x9f1   : > { %v933_v59 = vpop.permute.xlu0 %932 }
 0x9f2   : > { %v2450_v60 = vadd.f32 %v933_v59, %v925_v58 }
 0x9f4   : > { %2129 = vtanh.f32 %v2450_v60 }
 0x9f5   : > { %v957_v62 = vpop.permute.xlu1 %956 }
 0x9f6   : > { %v2454_v63 = vadd.f32 %v957_v62, %v949_v61 }
 0x9f8   : > { %2131 = vtanh.f32 %v2454_v63 }
 0xa01   : > { %v2130_v0 = vpop.eup %2129 }
 0xa02   : > { %938 = vrot.lane.b32.xlu0 %v2130_v0, %s2209_s22 }
 0xa05   : > { %v2132_v6 = vpop.eup %2131 }
 0xa06   : > { %962 = vrot.lane.b32.xlu1 %v2132_v6, %s2209_s22  ;;  %v1240_v6 = vunpack.c.h.bf16 %v2482_v13 }
 0xa74   : > { %v939_v7 = vpop.permute.xlu0 %938 }
 0xa75   : > { %v941_v8 = vmul.f32 %v2126_v50, %v939_v7 }
 0xa77   : > { %v2459_v9 = vpack.c.bf16 %v941_v8, %v941_v8 }
 0xa78   : > { %v963_v10 = vpop.permute.xlu1 %962 }
 0xa79   : > { %v965_v11 = vmul.f32 %v2128_v54, %v963_v10  ;;  %984 = vrot.lane.b32.xlu0 %v2459_v9, %s2208_s21  ;;  %v1244_v10 = vunpack.c.l.bf16 %v2486_v17 }
 0xa7b   : > { %v2463_v14 = vpack.c.bf16 %v965_v11, %v965_v11 }
 0xa7d   : > { %1029 = vrot.lane.b32.xlu1 %v2463_v14, %s2208_s21 }
 0xaeb   : > { %v985_v12 = vpop.permute.xlu0 %984 }
 0xaec   : > { %1992 = vmatmul.mubr.msk.bf16.vlgmr.msra.gmra.mxu0 %vm311_vm2, %v985_v12 }
 0xaed   : > { %2004 = vmatpush3.bf16.msra.mxu0 %v2272_v1  ;;  %2007 = vmatprep.mubr.msk.bf16.mxu0 %vm2207_vm1, %v2206_v2 }
 0xaee   : > { %2005 = vmatprep.subr.bf16.mxu0 %v2206_v2 }
 0xaef   : > { %v1030_v15 = vpop.permute.xlu1 %1029 }
 0xaf0   : > { %2000 = vmatmul.mubr.msk.bf16.vlgmr.msra.gmra.mxu1 %vm311_vm2, %v1030_v15 }
 0xaf1   : > { %2012 = vmatpush3.bf16.msra.mxu1 %v2279_v3  ;;  %2006 = vmatpush3.bf16.msra.mxu0 %v2285_v4 }
 0xaf2   : > { %2013 = vmatprep.subr.bf16.mxu1 %v2206_v2  ;;  %2015 = vmatprep.mubr.msk.bf16.mxu1 %vm2207_vm1, %v2206_v2 }
 0xaf3   : > { %2019 = vmatprep.subr.bf16.mxu0 %v2206_v2 }
 0xaf5   : > { %2014 = vmatpush3.bf16.msra.mxu1 %v2294_v5 }
 0xaf6   : > { %2027 = vmatprep.subr.bf16.mxu1 %v2206_v2 }
 0xbac   : > { %v1023_v18 = vpop.f32.mrf.mxu0 }
 0xbad   : > { %v1077_v19 = vadd.f32 %v1076_v16, %v1023_v18 }
 0xbae   : > { %v1993_v21 = vpop.f32.mrf.mxu0 }
 0xbaf   : > { %2133 = vtanh.f32 %v1077_v19  ;;  %v1823_v33 = vmul.f32 -1.442695, %v1077_v19 }
 0xbb0   : > { %v1026_v23 = vpop.f32.mrf.mxu0  ;;  %v1068_v24 = vpop.f32.mrf.mxu1 }
 0xbb1   : > { %v1081_v26 = vadd.f32 %v1080_v20, %v1068_v24 }
 0xbb2   : > { %v1994_v27 = vpop.f32.mrf.mxu0  ;;  %v2001_v28 = vpop.f32.mrf.mxu1 }
 0xbb3   : > { %2135 = vtanh.f32 %v1081_v26  ;;  %v1824_v34 = vmul.f32 -1.442695, %v1081_v26 }
 0xbb4   : > { %v1071_v29 = vpop.f32.mrf.mxu1  ;;  %2137 = vpow2.f32 %v1823_v33 }
 0xbb5   : > { %2139 = vpow2.f32 %v1824_v34 }
 0xbb6   : > { %v2002_v30 = vpop.f32.mrf.mxu1 }
 0xbbc   : > { %v2134_v31 = vpop.eup %2133 }
 0xbbd   : > { %1091 = vrot.lane.b32.xlu0 %v2134_v31, %s2209_s22 }
 0xbc0   : > { %v2136_v32 = vpop.eup %2135 }
 0xbc1   : > { %1115 = vrot.lane.b32.xlu1 %v2136_v32, %s2209_s22  ;;  %v2138_v36 = vpop.eup %2137 }
 0xbc2   : > { %v1085_v37 = vadd.f32 1.0, %v2138_v36  ;;  %v2140_v39 = vpop.eup %2139 }
 0xbc3   : > { %v1109_v40 = vadd.f32 1.0, %v2140_v39 }
 0xbc4   : > { %2141 = vrcp.f32 %v1085_v37 }
 0xbc5   : > { %2143 = vrcp.f32 %v1109_v40 }
 0xbd1   : > { %v2142_v42 = vpop.eup %2141 }
 0xbd2   : > { %v2144_v41 = vpop.eup %2143  ;;  %v1089_v47 = vmul.f32 %v2142_v42, %v2450_v60 }
 0xbd3   : > { %v1113_v50 = vmul.f32 %v2144_v41, %v2454_v63 }
 0xc2f   : > { %v1092_v44 = vpop.permute.xlu0 %1091 }
 0xc30   : > { %v1094_v45 = vmul.f32 %v2142_v42, %v1092_v44 }
 0xc32   : > { %1096 = vrot.lane.b32.xlu0 %v1094_v45, %s2208_s21 }
 0xc33   : > { %v1116_v46 = vpop.permute.xlu1 %1115 }
 0xc34   : > { %v1118_v43 = vmul.f32 %v2144_v41, %v1116_v46 }
 0xc36   : > { %1120 = vrot.lane.b32.xlu1 %v1118_v43, %s2208_s21 }
 0xca4   : > { %v1097_v48 = vpop.permute.xlu0 %1096 }
 0xca5   : > { %v2494_v49 = vadd.f32 %v1097_v48, %v1089_v47 }
 0xca7   : > { %2145 = vtanh.f32 %v2494_v49 }
 0xca8   : > { %v1121_v51 = vpop.permute.xlu1 %1120 }
 0xca9   : > { %v2498_v53 = vadd.f32 %v1121_v51, %v1113_v50 }
 0xcab   : > { %2147 = vtanh.f32 %v2498_v53 }
 0xcb4   : > { %v2146_v54 = vpop.eup %2145 }
 0xcb5   : > { %1102 = vrot.lane.b32.xlu0 %v2146_v54, %s2209_s22 }
 0xcb8   : > { %v2148_v56 = vpop.eup %2147 }
 0xcb9   : > { %1126 = vrot.lane.b32.xlu1 %v2148_v56, %s2209_s22 }
 0xd27   : > { %v1103_v57 = vpop.permute.xlu0 %1102 }
 0xd28   : > { %v1105_v58 = vmul.f32 %v2142_v42, %v1103_v57  ;;  %v2566_v57 = vld [vmem:[%s2257_s30] sm:$0xff]  }
 0xd2a   : > { %v2503_v59 = vpack.c.bf16 %v1105_v58, %v1105_v58 }
 0xd2b   : > { %v1127_v60 = vpop.permute.xlu1 %1126 }
 0xd2c   : > { %v1129_v61 = vmul.f32 %v2144_v41, %v1127_v60  ;;  %1148 = vrot.lane.b32.xlu0 %v2503_v59, %s2208_s21 }
 0xd2e   : > { %v2507_v62 = vpack.c.bf16 %v1129_v61, %v1129_v61  ;;  %v1408_v61 = vunpack.c.h.bf16 %v2566_v57 }
 0xd30   : > { %1193 = vrot.lane.b32.xlu1 %v2507_v62, %s2208_s21 }
 0xd9e   : > { %v1149_v63 = vpop.permute.xlu0 %1148 }
 0xd9f   : > { %2008 = vmatmul.mubr.msk.bf16.vlgmr.msra.gmra.mxu0 %vm311_vm2, %v1149_v63 }
 0xda0   : > { %2020 = vmatpush3.bf16.msra.mxu0 %v2272_v1  ;;  %2023 = vmatprep.mubr.msk.bf16.mxu0 %vm2207_vm1, %v2206_v2 }
 0xda1   : > { %2021 = vmatprep.subr.bf16.mxu0 %v2206_v2 }
 0xda2   : > { %v1194_v0 = vpop.permute.xlu1 %1193 }
 0xda3   : > { %2016 = vmatmul.mubr.msk.bf16.vlgmr.msra.gmra.mxu1 %vm311_vm2, %v1194_v0 }
 0xda4   : > { %2028 = vmatpush3.bf16.msra.mxu1 %v2279_v3  ;;  %2022 = vmatpush3.bf16.msra.mxu0 %v2285_v4 }
 0xda5   : > { %2029 = vmatprep.subr.bf16.mxu1 %v2206_v2  ;;  %2031 = vmatprep.mubr.msk.bf16.mxu1 %vm2207_vm1, %v2206_v2 }
 0xda6   : > { %2035 = vmatprep.subr.bf16.mxu0 %v2206_v2 }
 0xda8   : > { %2030 = vmatpush3.bf16.msra.mxu1 %v2294_v5 }
 0xda9   : > { %2043 = vmatprep.subr.bf16.mxu1 %v2206_v2 }
 0xe5f   : > { %v1187_v7 = vpop.f32.mrf.mxu0 }
 0xe60   : > { %v1241_v8 = vadd.f32 %v1240_v6, %v1187_v7 }
 0xe61   : > { %v2009_v11 = vpop.f32.mrf.mxu0 }
 0xe62   : > { %2149 = vtanh.f32 %v1241_v8  ;;  %v1833_v13 = vmul.f32 -1.442695, %v1241_v8 }
 0xe63   : > { %v1190_v12 = vpop.f32.mrf.mxu0  ;;  %v1232_v15 = vpop.f32.mrf.mxu1 }
 0xe64   : > { %v1245_v16 = vadd.f32 %v1244_v10, %v1232_v15 }
 0xe65   : > { %v2010_v18 = vpop.f32.mrf.mxu0  ;;  %v2017_v19 = vpop.f32.mrf.mxu1 }
 0xe66   : > { %2151 = vtanh.f32 %v1245_v16  ;;  %v1834_v26 = vmul.f32 -1.442695, %v1245_v16 }
 0xe67   : > { %v1235_v20 = vpop.f32.mrf.mxu1  ;;  %2153 = vpow2.f32 %v1833_v13 }
 0xe68   : > { %2155 = vpow2.f32 %v1834_v26 }
 0xe69   : > { %v2018_v21 = vpop.f32.mrf.mxu1 }
 0xe6f   : > { %v2150_v23 = vpop.eup %2149 }
 0xe70   : > { %1255 = vrot.lane.b32.xlu0 %v2150_v23, %s2209_s22 }
 0xe73   : > { %v2152_v24 = vpop.eup %2151 }
 0xe74   : > { %1279 = vrot.lane.b32.xlu1 %v2152_v24, %s2209_s22  ;;  %v2154_v17 = vpop.eup %2153 }
 0xe75   : > { %v1249_v27 = vadd.f32 1.0, %v2154_v17  ;;  %v2156_v28 = vpop.eup %2155 }
 0xe76   : > { %v1273_v29 = vadd.f32 1.0, %v2156_v28 }
 0xe77   : > { %2157 = vrcp.f32 %v1249_v27 }
 0xe78   : > { %2159 = vrcp.f32 %v1273_v29 }
 0xe84   : > { %v2158_v30 = vpop.eup %2157 }
 0xe85   : > { %v2160_v33 = vpop.eup %2159  ;;  %v1253_v37 = vmul.f32 %v2158_v30, %v2494_v49 }
 0xe86   : > { %v1277_v42 = vmul.f32 %v2160_v33, %v2498_v53 }
 0xee2   : > { %v1256_v31 = vpop.permute.xlu0 %1255 }
 0xee3   : > { %v1258_v32 = vmul.f32 %v2158_v30, %v1256_v31 }
 0xee5   : > { %1260 = vrot.lane.b32.xlu0 %v1258_v32, %s2208_s21 }
 0xee6   : > { %v1280_v34 = vpop.permute.xlu1 %1279 }
 0xee7   : > { %v1282_v36 = vmul.f32 %v2160_v33, %v1280_v34 }
 0xee9   : > { %1284 = vrot.lane.b32.xlu1 %v1282_v36, %s2208_s21 }
 0xf57   : > { %v1261_v39 = vpop.permute.xlu0 %1260 }
 0xf58   : > { %v2532_v40 = vadd.f32 %v1261_v39, %v1253_v37 }
 0xf5a   : > { %2161 = vtanh.f32 %v2532_v40 }
 0xf5b   : > { %v1285_v44 = vpop.permute.xlu1 %1284 }
 0xf5c   : > { %v2536_v45 = vadd.f32 %v1285_v44, %v1277_v42 }
 0xf5e   : > { %2163 = vtanh.f32 %v2536_v45 }
 0xf67   : > { %v2162_v41 = vpop.eup %2161 }
 0xf68   : > { %1266 = vrot.lane.b32.xlu0 %v2162_v41, %s2209_s22 }
 0xf6b   : > { %v2164_v46 = vpop.eup %2163 }
 0xf6c   : > { %1290 = vrot.lane.b32.xlu1 %v2164_v46, %s2209_s22 }
 0xfda   : > { %v1267_v43 = vpop.permute.xlu0 %1266 }
 0xfdb   : > { %v1269_v47 = vmul.f32 %v2158_v30, %v1267_v43 }
 0xfdd   : > { %v2541_v48 = vpack.c.bf16 %v1269_v47, %v1269_v47  ;;  %v1571_v47 = vunpack.c.l.bf16 %v2566_v57 }
 0xfde   : > { %v1291_v49 = vpop.permute.xlu1 %1290 }
 0xfdf   : > { %v1293_v50 = vmul.f32 %v2160_v33, %v1291_v49  ;;  %1312 = vrot.lane.b32.xlu0 %v2541_v48, %s2208_s21 }
 0xfe1   : > { %v2545_v51 = vpack.c.bf16 %v1293_v50, %v1293_v50 }
 0xfe3   : > { %1357 = vrot.lane.b32.xlu1 %v2545_v51, %s2208_s21 }
0x1051   : > { %v1313_v53 = vpop.permute.xlu0 %1312 }
0x1052   : > { %2024 = vmatmul.mubr.msk.bf16.vlgmr.msra.gmra.mxu0 %vm311_vm2, %v1313_v53 }
0x1053   : > { %2036 = vmatpush3.bf16.msra.mxu0 %v2272_v1  ;;  %2039 = vmatprep.mubr.msk.bf16.mxu0 %vm2207_vm1, %v2206_v2  ;;  %v2562_v1 = vld [vmem:[%s2252_s26 + $0x18] sm:$0xff]  }
0x1054   : > { %2037 = vmatprep.subr.bf16.mxu0 %v2206_v2  ;;  %v1404_v56 = vunpack.c.l.bf16 %v2562_v1  ;;  %v1568_v41 = vunpack.c.h.bf16 %v2562_v1 }
0x1055   : > { %v1358_v54 = vpop.permute.xlu1 %1357 }
0x1056   : > { %2032 = vmatmul.mubr.msk.bf16.vlgmr.msra.gmra.mxu1 %vm311_vm2, %v1358_v54 }
0x1057   : > { %2044 = vmatpush3.bf16.msra.mxu1 %v2279_v3  ;;  %2038 = vmatpush3.bf16.msra.mxu0 %v2285_v4 }
0x1058   : > { %2045 = vmatprep.subr.bf16.mxu1 %v2206_v2  ;;  %2047 = vmatprep.mubr.msk.bf16.mxu1 %vm2207_vm1, %v2206_v2 }
0x105b   : > { %2046 = vmatpush3.bf16.msra.mxu1 %v2294_v5 }
0x1112   : > { %v1351_v58 = vpop.f32.mrf.mxu0 }
0x1113   : > { %v1405_v60 = vadd.f32 %v1404_v56, %v1351_v58 }
0x1114   : > { %v2025_v3 = vpop.f32.mrf.mxu0 }
0x1115   : > { %2165 = vtanh.f32 %v1405_v60  ;;  %v1843_v11 = vmul.f32 -1.442695, %v1405_v60 }
0x1116   : > { %v1354_v4 = vpop.f32.mrf.mxu0  ;;  %v1396_v63 = vpop.f32.mrf.mxu1 }
0x1117   : > { %v1409_v0 = vadd.f32 %v1408_v61, %v1396_v63 }
0x1118   : > { %v2026_v6 = vpop.f32.mrf.mxu0  ;;  %v2033_v7 = vpop.f32.mrf.mxu1 }
0x1119   : > { %2167 = vtanh.f32 %v1409_v0  ;;  %v1844_v12 = vmul.f32 -1.442695, %v1409_v0 }
0x111a   : > { %v1399_v2 = vpop.f32.mrf.mxu1  ;;  %2169 = vpow2.f32 %v1843_v11 }
0x111b   : > { %2171 = vpow2.f32 %v1844_v12 }
0x111c   : > { %v2034_v5 = vpop.f32.mrf.mxu1 }
0x1122   : > { %v2166_v8 = vpop.eup %2165 }
0x1123   : > { %1419 = vrot.lane.b32.xlu0 %v2166_v8, %s2209_s22 }
0x1126   : > { %v2168_v10 = vpop.eup %2167 }
0x1127   : > { %1443 = vrot.lane.b32.xlu1 %v2168_v10, %s2209_s22  ;;  %v2170_v15 = vpop.eup %2169 }
0x1128   : > { %v1413_v16 = vadd.f32 1.0, %v2170_v15  ;;  %v2172_v18 = vpop.eup %2171 }
0x1129   : > { %v1437_v19 = vadd.f32 1.0, %v2172_v18 }
0x112a   : > { %2173 = vrcp.f32 %v1413_v16 }
0x112b   : > { %2175 = vrcp.f32 %v1437_v19 }
0x1137   : > { %v2174_v20 = vpop.eup %2173 }
0x1138   : > { %v2176_v24 = vpop.eup %2175  ;;  %v1417_v17 = vmul.f32 %v2174_v20, %v2532_v40 }
0x1139   : > { %v1441_v29 = vmul.f32 %v2176_v24, %v2536_v45 }
0x1195   : > { %v1420_v21 = vpop.permute.xlu0 %1419 }
0x1196   : > { %v1422_v23 = vmul.f32 %v2174_v20, %v1420_v21 }
0x1198   : > { %1424 = vrot.lane.b32.xlu0 %v1422_v23, %s2208_s21 }
0x1199   : > { %v1444_v13 = vpop.permute.xlu1 %1443 }
0x119a   : > { %v1446_v26 = vmul.f32 %v2176_v24, %v1444_v13 }
0x119c   : > { %1448 = vrot.lane.b32.xlu1 %v1446_v26, %s2208_s21 }
0x120a   : > { %v1425_v27 = vpop.permute.xlu0 %1424 }
0x120b   : > { %v1427_v28 = vadd.f32 %v1425_v27, %v1417_v17 }
0x120d   : > { %2177 = vtanh.f32 %v1427_v28 }
0x120e   : > { %v1449_v30 = vpop.permute.xlu1 %1448 }
0x120f   : > { %v1451_v31 = vadd.f32 %v1449_v30, %v1441_v29 }
0x1211   : > { %2179 = vtanh.f32 %v1451_v31 }
0x121a   : > { %v2178_v32 = vpop.eup %2177 }
0x121b   : > { %1430 = vrot.lane.b32.xlu0 %v2178_v32, %s2209_s22 }
0x121e   : > { %v2180_v33 = vpop.eup %2179 }
0x121f   : > { %1454 = vrot.lane.b32.xlu1 %v2180_v33, %s2209_s22 }
0x128d   : > { %v1431_v34 = vpop.permute.xlu0 %1430 }
0x128e   : > { %v1433_v36 = vmul.f32 %v2174_v20, %v1431_v34 }
0x1290   : > { %v2577_v37 = vpack.c.bf16 %v1433_v36, %v1433_v36 }
0x1291   : > { %v1455_v39 = vpop.permute.xlu1 %1454 }
0x1292   : > { %v1457_v40 = vmul.f32 %v2176_v24, %v1455_v39  ;;  %1476 = vrot.lane.b32.xlu0 %v2577_v37, %s2208_s21 }
0x1294   : > { %v2581_v42 = vpack.c.bf16 %v1457_v40, %v1457_v40 }
0x1296   : > { %1521 = vrot.lane.b32.xlu1 %v2581_v42, %s2208_s21 }
0x1304   : > { %v1477_v44 = vpop.permute.xlu0 %1476 }
0x1305   : > { %2040 = vmatmul.mubr.msk.bf16.vlgmr.msra.gmra.mxu0 %vm311_vm2, %v1477_v44 }
0x1308   : > { %v1522_v45 = vpop.permute.xlu1 %1521 }
0x1309   : > { %2048 = vmatmul.mubr.msk.bf16.vlgmr.msra.gmra.mxu1 %vm311_vm2, %v1522_v45 }
0x13c5   : > { %v1515_v46 = vpop.f32.mrf.mxu0 }
0x13c6   : > { %v1569_v43 = vadd.f32 %v1568_v41, %v1515_v46 }
0x13c7   : > { %v2041_v49 = vpop.f32.mrf.mxu0 }
0x13c8   : > { %2181 = vtanh.f32 %v1569_v43  ;;  %v1852_v1 = vmul.f32 -1.442695, %v1569_v43 }
0x13c9   : > { %v1518_v50 = vpop.f32.mrf.mxu0  ;;  %v1560_v53 = vpop.f32.mrf.mxu1 }
0x13ca   : > { %v1572_v54 = vadd.f32 %v1571_v47, %v1560_v53 }
0x13cb   : > { %v2042_v56 = vpop.f32.mrf.mxu0  ;;  %v2049_v58 = vpop.f32.mrf.mxu1 }
0x13cc   : > { %2183 = vtanh.f32 %v1572_v54  ;;  %v1853_v63 = vmul.f32 -1.442695, %v1572_v54 }
0x13cd   : > { %v1563_v60 = vpop.f32.mrf.mxu1  ;;  %2185 = vpow2.f32 %v1852_v1 }
0x13ce   : > { %2187 = vpow2.f32 %v1853_v63 }
0x13cf   : > { %v2050_v61 = vpop.f32.mrf.mxu1 }
0x13d5   : > { %v2182_v3 = vpop.eup %2181 }
0x13d6   : > { %1582 = vrot.lane.b32.xlu0 %v2182_v3, %s2209_s22 }
0x13d9   : > { %v2184_v4 = vpop.eup %2183 }
0x13da   : > { %1606 = vrot.lane.b32.xlu1 %v2184_v4, %s2209_s22  ;;  %v2186_v57 = vpop.eup %2185 }
0x13db   : > { %v1576_v0 = vadd.f32 1.0, %v2186_v57  ;;  %v2188_v6 = vpop.eup %2187 }
0x13dc   : > { %v1600_v7 = vadd.f32 1.0, %v2188_v6 }
0x13dd   : > { %2189 = vrcp.f32 %v1576_v0 }
0x13de   : > { %2191 = vrcp.f32 %v1600_v7 }
0x13ea   : > { %v2190_v2 = vpop.eup %2189 }
0x13eb   : > { %v2192_v10 = vpop.eup %2191  ;;  %v1580_v15 = vmul.f32 %v2190_v2, %v1427_v28 }
0x13ec   : > { %v1604_v19 = vmul.f32 %v2192_v10, %v1451_v31 }
0x1448   : > { %v1583_v5 = vpop.permute.xlu0 %1582 }
0x1449   : > { %v1585_v8 = vmul.f32 %v2190_v2, %v1583_v5 }
0x144b   : > { %1587 = vrot.lane.b32.xlu0 %v1585_v8, %s2208_s21 }
0x144c   : > { %v1607_v11 = vpop.permute.xlu1 %1606 }
0x144d   : > { %v1609_v12 = vmul.f32 %v2192_v10, %v1607_v11 }
0x144f   : > { %1611 = vrot.lane.b32.xlu1 %v1609_v12, %s2208_s21 }
0x14bd   : > { %v1588_v16 = vpop.permute.xlu0 %1587 }
0x14be   : > { %v1590_v18 = vadd.f32 %v1588_v16, %v1580_v15 }
0x14c0   : > { %2193 = vtanh.f32 %v1590_v18 }
0x14c1   : > { %v1612_v20 = vpop.permute.xlu1 %1611 }
0x14c2   : > { %v1614_v21 = vadd.f32 %v1612_v20, %v1604_v19 }
0x14c4   : > { %2195 = vtanh.f32 %v1614_v21 }
0x14cd   : > { %v2194_v23 = vpop.eup %2193 }
0x14ce   : > { %1593 = vrot.lane.b32.xlu0 %v2194_v23, %s2209_s22 }
0x14d1   : > { %v2196_v24 = vpop.eup %2195 }
0x14d2   : > { %1617 = vrot.lane.b32.xlu1 %v2196_v24, %s2209_s22  ;;  %478 = vrot.lane.b32.xlu0 %v2339_v52, %s2208_s21 }
0x14d6   : > { %487 = vrot.lane.b32.xlu1 %v2343_v55, %s2208_s21  ;;  %642 = vrot.lane.b32.xlu0 %v2377_v35, %s2208_s21 }
0x14da   : > { %651 = vrot.lane.b32.xlu1 %v2381_v38, %s2208_s21  ;;  %806 = vrot.lane.b32.xlu0 %v2421_v22, %s2208_s21 }
0x14de   : > { %815 = vrot.lane.b32.xlu1 %v2425_v25, %s2208_s21  ;;  %970 = vrot.lane.b32.xlu0 %v2459_v9, %s2208_s21 }
0x14e2   : > { %979 = vrot.lane.b32.xlu1 %v2463_v14, %s2208_s21  ;;  %1134 = vrot.lane.b32.xlu0 %v2503_v59, %s2208_s21 }
0x14e6   : > { %1143 = vrot.lane.b32.xlu1 %v2507_v62, %s2208_s21  ;;  %1298 = vrot.lane.b32.xlu0 %v2541_v48, %s2208_s21 }
0x14ea   : > { %1307 = vrot.lane.b32.xlu1 %v2545_v51, %s2208_s21  ;;  %1462 = vrot.lane.b32.xlu0 %v2577_v37, %s2208_s21 }
0x14ee   : > { %1471 = vrot.lane.b32.xlu1 %v2581_v42, %s2208_s21 }
0x14f2   : > { %1644 = vrot.lane.b32.xlu1 %v1590_v18, %s2210_s23 }
0x1540   : > { %v1594_v52 = vpop.permute.xlu0 %1593 }
0x1541   : > { %v1596_v55 = vmul.f32 %v2190_v2, %v1594_v52 }
0x1543   : > { %1639 = vrot.lane.b32.xlu0 %v1596_v55, %s2208_s21  ;;  %v1873_v22 = vpack.c.bf16 %v1596_v55, %v1596_v55 }
0x1544   : > { %v1618_v35 = vpop.permute.xlu1 %1617  ;;  %v479_v38 = vpop.permute.xlu0 %478 }
0x1545   : > { %v1620_v25 = vmul.f32 %v2192_v10, %v1618_v35  ;;  %482 = vst.msk [vmem:[%s2262_s8] sm:$0xf] %vm481_vm3, %v479_v38 }
0x1547   : > { %v1874_v9 = vpack.c.bf16 %v1620_v25, %v1620_v25  ;;  %1625 = vrot.lane.b32.xlu0 %v1873_v22, %s2208_s21 }
0x1548   : > { %v488_v14 = vpop.permute.xlu1 %487  ;;  %v643_v59 = vpop.permute.xlu0 %642 }
0x1549   : > { %1788 = vst.msk [vmem:[%s2267_s11 + $0x1c] sm:$0xf] %vm481_vm3, %v488_v14  ;;  %1796 = vst.msk [vmem:[%s2262_s8 + $0x4] sm:$0xf] %vm481_vm3, %v643_v59  ;;  %1634 = vrot.lane.b32.xlu1 %v1874_v9, %s2208_s21 }
0x154b   : > { %1649 = vrot.lane.b32.xlu0 %v1620_v25, %s2208_s21 }
0x154c   : > { %v652_v62 = vpop.permute.xlu1 %651  ;;  %v807_v48 = vpop.permute.xlu0 %806 }
0x154d   : > { %1798 = vst.msk [vmem:[%s2267_s11 + $0x18] sm:$0xf] %vm481_vm3, %v652_v62  ;;  %1806 = vst.msk [vmem:[%s2262_s8 + $0x8] sm:$0xf] %vm481_vm3, %v807_v48  ;;  %1654 = vrot.lane.b32.xlu1 %v1614_v21, %s2210_s23 }
0x1550   : > { %v816_v51 = vpop.permute.xlu1 %815  ;;  %v971_v13 = vpop.permute.xlu0 %970 }
0x1551   : > { %1808 = vst.msk [vmem:[%s2267_s11 + $0x14] sm:$0xf] %vm481_vm3, %v816_v51  ;;  %1816 = vst.msk [vmem:[%s2262_s8 + $0xc] sm:$0xf] %vm481_vm3, %v971_v13 }
0x1554   : > { %v980_v26 = vpop.permute.xlu1 %979  ;;  %v1135_v17 = vpop.permute.xlu0 %1134 }
0x1555   : > { %1818 = vst.msk [vmem:[%s2267_s11 + $0x10] sm:$0xf] %vm481_vm3, %v980_v26  ;;  %1826 = vst.msk [vmem:[%s2262_s8 + $0x10] sm:$0xf] %vm481_vm3, %v1135_v17 }
0x1558   : > { %v1144_v27 = vpop.permute.xlu1 %1143  ;;  %v1299_v28 = vpop.permute.xlu0 %1298 }
0x1559   : > { %1828 = vst.msk [vmem:[%s2267_s11 + $0xc] sm:$0xf] %vm481_vm3, %v1144_v27  ;;  %1836 = vst.msk [vmem:[%s2262_s8 + $0x14] sm:$0xf] %vm481_vm3, %v1299_v28 }
0x155c   : > { %v1308_v29 = vpop.permute.xlu1 %1307  ;;  %v1463_v30 = vpop.permute.xlu0 %1462 }
0x155d   : > { %1838 = vst.msk [vmem:[%s2267_s11 + $0x8] sm:$0xf] %vm481_vm3, %v1308_v29  ;;  %1846 = vst.msk [vmem:[%s2262_s8 + $0x18] sm:$0xf] %vm481_vm3, %v1463_v30 }
0x1560   : > { %v1472_v31 = vpop.permute.xlu1 %1471 }
0x1561   : > { %1848 = vst.msk [vmem:[%s2267_s11 + $0x4] sm:$0xf] %vm481_vm3, %v1472_v31 }
0x1564   : > { %v1645_v32 = vpop.permute.xlu1 %1644 }
0x1565   : > { %1647 = vst.msk [vmem:[#allocation3] sm:$0xff] %vm311_vm2, %v1645_v32 }
0x15b5   : > { %v1640_v33 = vpop.permute.xlu0 %1639 }
0x15b6   : > { %1642 = vst.msk [vmem:[#allocation2] sm:$0xff] %vm311_vm2, %v1640_v33 }
0x15b9   : > { %v1626_v34 = vpop.permute.xlu0 %1625 }
0x15ba   : > { %1855 = vst.msk [vmem:[%s2262_s8 + $0x1c] sm:$0xf] %vm481_vm3, %v1626_v34 }
0x15bb   : > { %v1635_v36 = vpop.permute.xlu1 %1634 }
0x15bc   : > { %1637 = vst.msk [vmem:[%s2267_s11] sm:$0xf] %vm481_vm3, %v1635_v36 }
0x15bd   : > { %v1650_v37 = vpop.permute.xlu0 %1649 }
0x15be   : > { %1652 = vst.msk [vmem:[#allocation4] sm:$0xff] %vm311_vm2, %v1650_v37 }
0x15bf   : > { %v1655_v39 = vpop.permute.xlu1 %1654 }
0x15c0   : > { %1657 = vst.msk [vmem:[#allocation5] sm:$0xff] %vm311_vm2, %v1655_v39 }
0x15c1 PF: > { %s16_s18 = sadd.s32 1, %s2203_s18  }
0x15c2   : > { %p13_p6 = scmp.ge.s32.totalorder %s16_s18, 5  }
0x15c4   :  { %15 = sbr.rel (!%p13_p6) target bundleno = 1 (0x1), region = 113 }

</bundles_post_ra>
